<compile_context>
chip_gen: v5e
topology: v5e:2x2
jax: 0.10.0
libtpu: 0.0.40
codegen_flags: <defaults>
</compile_context>

<pallas_src>
import jax
import jax.numpy as jnp
from jax import lax
from jax.experimental import pallas as pl
from jax.experimental.pallas import tpu as pltpu

C_IN = 28          # 24 + 4 input point features
C1, C2, C3 = 32, 48, 64
HID = 64           # LSTM hidden size
NLAYERS = 3


# ----------------------------------------------------------------------------
# Kernel 1: fused GlobalPointNet (1x1 convs + BN(eval) + ReLU, attn, softmax,
#           attention-weighted sum)
# ----------------------------------------------------------------------------
def pointnet_kernel(x_ref, w1_ref, b1_ref, w2_ref, b2_ref, w3_ref, b3_ref,
                    wa_ref, ba_ref, vec_ref, attw_ref):
    S, N, C = x_ref.shape
    x = x_ref[...].reshape(S * N, C)                              # bf16 rows

    h = jnp.dot(x, w1_ref[...], preferred_element_type=jnp.float32) + b1_ref[...]
    h = jnp.maximum(h, 0.0)
    h = jnp.dot(h.astype(jnp.bfloat16), w2_ref[...],
                preferred_element_type=jnp.float32) + b2_ref[...]
    h = jnp.maximum(h, 0.0)
    h = jnp.dot(h.astype(jnp.bfloat16), w3_ref[...],
                preferred_element_type=jnp.float32) + b3_ref[...]
    h = jnp.maximum(h, 0.0)                                       # (S*N, 64) f32

    logits = jnp.dot(h.astype(jnp.bfloat16), wa_ref[...],
                     preferred_element_type=jnp.float32) + ba_ref[...]  # (S*N, 1)

    lg = logits.reshape(S, N, 1)
    lg = lg - jnp.max(lg, axis=1, keepdims=True)                  # stable softmax
    e = jnp.exp(lg)
    w = e / jnp.sum(e, axis=1, keepdims=True)                     # (S, N, 1)

    h3 = h.reshape(S, N, C3)
    vec_ref[...] = jnp.sum(h3 * w, axis=1)                        # (S, 64)
    attw_ref[...] = w                                             # (S, N, 1)


def _pick_sample_block(bl):
    # Prefer sample blocks that are multiples of 8 (sublane-aligned output
    # tiles) and keep at least 2 grid steps so the "parallel" axis can shard
    # across TensorCores; otherwise process everything in one full block.
    for s in (64, 32, 16, 8):
        if bl % s == 0 and bl // s >= 2:
            return s
    return bl


def run_pointnet(x, pn_params):
    w1, b1, w2, b2, w3, b3, wa, ba = pn_params
    BL, N, C = x.shape
    S = _pick_sample_block(BL)
    grid = (BL // S,)
    xb = x.astype(jnp.bfloat16)

    attn_vec, attn_w = pl.pallas_call(
        pointnet_kernel,
        out_shape=(
            jax.ShapeDtypeStruct((BL, C3), jnp.float32),
            jax.ShapeDtypeStruct((BL, N, 1), jnp.float32),
        ),
        grid=grid,
        in_specs=[
            pl.BlockSpec((S, N, C), lambda i: (i, 0, 0)),
            pl.BlockSpec(w1.shape, lambda i: (0, 0)),
            pl.BlockSpec(b1.shape, lambda i: (0, 0)),
            pl.BlockSpec(w2.shape, lambda i: (0, 0)),
            pl.BlockSpec(b2.shape, lambda i: (0, 0)),
            pl.BlockSpec(w3.shape, lambda i: (0, 0)),
            pl.BlockSpec(b3.shape, lambda i: (0, 0)),
            pl.BlockSpec(wa.shape, lambda i: (0, 0)),
            pl.BlockSpec(ba.shape, lambda i: (0, 0)),
        ],
        out_specs=(
            pl.BlockSpec((S, C3), lambda i: (i, 0)),
            pl.BlockSpec((S, N, 1), lambda i: (i, 0, 0)),
        ),
        compiler_params=pltpu.CompilerParams(
            dimension_semantics=("parallel",)),
    )(xb, w1, b1, w2, b2, w3, b3, wa, ba)
    return attn_vec, attn_w


# ----------------------------------------------------------------------------
# Kernel 2: fused GlobalRNN (3-layer LSTM + fc1/ReLU/fc2 head)
#   x is passed time-major (L, B, 64); outputs g_vec/g_loc are time-major too.
# ----------------------------------------------------------------------------
def grnn_kernel(x_ref, h0_ref, c0_ref, wih_ref, whh_ref, b_ref,
                wf1_ref, bf1_ref, wf2_ref, bf2_ref,
                gvec_ref, gloc_ref, hn_ref, cn_ref):
    L = x_ref.shape[0]
    H = HID

    wih = wih_ref[...]        # (3, 64, 256)
    whh = whh_ref[...]        # (3, 64, 256)
    bias = b_ref[...]         # (3, 1, 256)
    wf1, bf1 = wf1_ref[...], bf1_ref[...]
    wf2, bf2 = wf2_ref[...], bf2_ref[...]

    h_init = h0_ref[...]      # (3, B, 64)
    c_init = c0_ref[...]

    def cell(xt, h_prev, c_prev, l):
        gates = (jnp.dot(xt, wih[l], preferred_element_type=jnp.float32)
                 + jnp.dot(h_prev, whh[l], preferred_element_type=jnp.float32)
                 + bias[l])                                  # (B, 4H)
        i = jax.nn.sigmoid(gates[:, 0:H])
        f = jax.nn.sigmoid(gates[:, H:2 * H])
        g = jnp.tanh(gates[:, 2 * H:3 * H])
        o = jax.nn.sigmoid(gates[:, 3 * H:4 * H])
        c_new = f * c_prev + i * g
        h_new = o * jnp.tanh(c_new)
        return h_new, c_new

    def step(t, carry):
        hs, cs = carry
        inp = x_ref[t]                                       # (B, 64)
        new_hs, new_cs = [], []
        for l in range(NLAYERS):
            h_new, c_new = cell(inp, hs[l], cs[l], l)
            new_hs.append(h_new)
            new_cs.append(c_new)
            inp = h_new                                      # eval: no dropout
        gvec_ref[t] = inp                                    # top-layer hidden
        loc = jnp.maximum(
            jnp.dot(inp, wf1, preferred_element_type=jnp.float32) + bf1, 0.0)
        gloc_ref[t] = jnp.dot(loc, wf2,
                              preferred_element_type=jnp.float32) + bf2
        return (tuple(new_hs), tuple(new_cs))

    init_carry = ((h_init[0], h_init[1], h_init[2]),
                  (c_init[0], c_init[1], c_init[2]))
    hs, cs = lax.fori_loop(0, L, step, init_carry)
    for l in range(NLAYERS):
        hn_ref[l] = hs[l]
        cn_ref[l] = cs[l]


def run_grnn(x_lbd, h0, c0, rnn_params):
    wih, whh, blstm, wf1, bf1, wf2, bf2 = rnn_params
    L, B, H = x_lbd.shape
    return pl.pallas_call(
        grnn_kernel,
        out_shape=(
            jax.ShapeDtypeStruct((L, B, H), jnp.float32),     # g_vec (time-major)
            jax.ShapeDtypeStruct((L, B, 2), jnp.float32),     # g_loc (time-major)
            jax.ShapeDtypeStruct((NLAYERS, B, H), jnp.float32),  # hn
            jax.ShapeDtypeStruct((NLAYERS, B, H), jnp.float32),  # cn
        ),
    )(x_lbd, h0, c0, wih, whh, blstm, wf1, bf1, wf2, bf2)


# ----------------------------------------------------------------------------
# Full GlobalModule forward
# ----------------------------------------------------------------------------
def global_forward(x, h0, c0, batch_size, length_size, params):
    pn_params, rnn_params = params
    attn_vec, attn_w = run_pointnet(x, pn_params)             # (B*L, 64), (B*L, N, 1)

    feat = attn_vec.reshape(batch_size, length_size, HID)
    feat_lbd = jnp.transpose(feat, (1, 0, 2))                 # (L, B, 64)

    g_vec_l, g_loc_l, hn, cn = run_grnn(feat_lbd, h0, c0, rnn_params)
    g_vec = jnp.transpose(g_vec_l, (1, 0, 2))                 # (B, L, 64)
    g_loc = jnp.transpose(g_loc_l, (1, 0, 2))                 # (B, L, 2)
    return g_vec, g_loc, attn_w, hn, cn


# ----------------------------------------------------------------------------
# Deterministic parameter init (mimics torch defaults; BN folded, eval mode)
# ----------------------------------------------------------------------------
def init_params(key):
    ks = iter(jax.random.split(key, 32))

    def uinit(k, shape, fan_in):
        bound = 1.0 / jnp.sqrt(jnp.float32(fan_in))
        return jax.random.uniform(k, shape, jnp.float32, -bound, bound)

    def conv_bn(cin, cout):
        w = uinit(next(ks), (cout, cin), cin)      # Conv1d weight (out,in,1) squeezed
        b = uinit(next(ks), (cout,), cin)
        gamma = 1.0 + 0.1 * jax.random.normal(next(ks), (cout,), jnp.float32)
        beta = 0.1 * jax.random.normal(next(ks), (cout,), jnp.float32)
        mean = jnp.zeros((cout,), jnp.float32)     # eval-mode running stats
        var = jnp.ones((cout,), jnp.float32)
        scale = gamma / jnp.sqrt(var + 1e-5)
        w_f = (w * scale[:, None]).T               # (in, out), BN folded
        b_f = ((b - mean) * scale + beta)[None, :]
        return w_f.astype(jnp.bfloat16), b_f

    w1, b1 = conv_bn(C_IN, C1)
    w2, b2 = conv_bn(C1, C2)
    w3, b3 = conv_bn(C2, C3)
    wa = uinit(next(ks), (1, C3), C3).T.astype(jnp.bfloat16)   # (64, 1)
    ba = uinit(next(ks), (1,), C3)[None, :]                    # (1, 1)

    wih, whh, blstm = [], [], []
    for _ in range(NLAYERS):
        w_ih = uinit(next(ks), (4 * HID, HID), HID)
        b_ih = uinit(next(ks), (4 * HID,), HID)
        w_hh = uinit(next(ks), (4 * HID, HID), HID)
        b_hh = uinit(next(ks), (4 * HID,), HID)
        wih.append(w_ih.T)                         # (64, 256)
        whh.append(w_hh.T)
        blstm.append((b_ih + b_hh)[None, :])       # (1, 256)
    wih = jnp.stack(wih)                           # (3, 64, 256)
    whh = jnp.stack(whh)
    blstm = jnp.stack(blstm)                       # (3, 1, 256)

    wf1 = uinit(next(ks), (16, HID), HID).T        # (64, 16)
    bf1 = uinit(next(ks), (16,), HID)[None, :]
    wf2 = uinit(next(ks), (2, 16), 16).T           # (16, 2)
    bf2 = uinit(next(ks), (2,), 16)[None, :]

    pn = (w1, b1, w2, b2, w3, b3, wa, ba)
    rnn = (wih, whh, blstm, wf1, bf1, wf2, bf2)
    return pn, rnn


if __name__ == "__main__":
    key = jax.random.PRNGKey(0)
    kp, kx, kh, kc = jax.random.split(key, 4)

    batch_size, length_size, n_points = 2, 8, 64
    params = init_params(kp)

    x = jax.random.normal(kx, (batch_size * length_size, n_points, C_IN),
                          jnp.float32)
    h0 = 0.1 * jax.random.normal(kh, (NLAYERS, batch_size, HID), jnp.float32)
    c0 = 0.1 * jax.random.normal(kc, (NLAYERS, batch_size, HID), jnp.float32)

    g_vec, g_loc, attn_w, hn, cn = global_forward(
        x, h0, c0, batch_size, length_size, params)
    jax.block_until_ready((g_vec, g_loc, attn_w, hn, cn))

    assert g_vec.shape == (batch_size, length_size, HID)
    assert g_loc.shape == (batch_size, length_size, 2)
    assert attn_w.shape == (batch_size * length_size, n_points, 1)
    assert hn.shape == (NLAYERS, batch_size, HID)
    assert cn.shape == (NLAYERS, batch_size, HID)
    # attention weights must be a softmax over the points axis
    assert jnp.allclose(jnp.sum(attn_w, axis=1), 1.0, atol=1e-3)
    print("KERNEL_OK")
</pallas_src>

<mosaic_0001>
module attributes {stable_mosaic.version = 11 : i64} {
  func.func @pointnet_kernel(%arg0: i32, %arg1: memref<8x64x28xbf16, #tpu.memory_space<vmem>>, %arg2: memref<28x32xbf16, #tpu.memory_space<vmem>>, %arg3: memref<1x32xf32, #tpu.memory_space<vmem>>, %arg4: memref<32x48xbf16, #tpu.memory_space<vmem>>, %arg5: memref<1x48xf32, #tpu.memory_space<vmem>>, %arg6: memref<48x64xbf16, #tpu.memory_space<vmem>>, %arg7: memref<1x64xf32, #tpu.memory_space<vmem>>, %arg8: memref<64x1xbf16, #tpu.memory_space<vmem>>, %arg9: memref<1x1xf32, #tpu.memory_space<vmem>>, %arg10: memref<8x64xf32, #tpu.memory_space<vmem>>, %arg11: memref<8x64x1xf32, #tpu.memory_space<vmem>>) attributes {dimension_semantics = [#tpu.dimension_semantics<parallel>], iteration_bounds = array<i64: 2>, scalar_prefetch = 0 : i64, scratch_operands = 0 : i64, tpu.core_type = #tpu.core_type<tc>, window_params = [{transform_indices = @transform_0, window_bounds = array<i64: 8, 64, 28>}, {pipeline_mode = #tpu.pipeline_mode<synchronous>, transform_indices = @transform_1, window_bounds = array<i64: 28, 32>}, {pipeline_mode = #tpu.pipeline_mode<synchronous>, transform_indices = @transform_2, window_bounds = array<i64: 1, 32>}, {pipeline_mode = #tpu.pipeline_mode<synchronous>, transform_indices = @transform_3, window_bounds = array<i64: 32, 48>}, {pipeline_mode = #tpu.pipeline_mode<synchronous>, transform_indices = @transform_4, window_bounds = array<i64: 1, 48>}, {pipeline_mode = #tpu.pipeline_mode<synchronous>, transform_indices = @transform_5, window_bounds = array<i64: 48, 64>}, {pipeline_mode = #tpu.pipeline_mode<synchronous>, transform_indices = @transform_6, window_bounds = array<i64: 1, 64>}, {pipeline_mode = #tpu.pipeline_mode<synchronous>, transform_indices = @transform_7, window_bounds = array<i64: 64, 1>}, {pipeline_mode = #tpu.pipeline_mode<synchronous>, transform_indices = @transform_8, window_bounds = array<i64: 1, 1>}, {transform_indices = @transform_9, window_bounds = array<i64: 8, 64>}, {transform_indices = @transform_10, window_bounds = array<i64: 8, 64, 1>}]} {
    %c0 = arith.constant 0 : index
    %c0_0 = arith.constant 0 : index
    %c0_1 = arith.constant 0 : index
    %0 = vector.load %arg1[%c0, %c0_0, %c0_1] : memref<8x64x28xbf16, #tpu.memory_space<vmem>>, vector<8x64x28xbf16>
    %1 = vector.shape_cast %0 : vector<8x64x28xbf16> to vector<512x28xbf16>
    %c0_2 = arith.constant 0 : index
    %c0_3 = arith.constant 0 : index
    %2 = vector.load %arg2[%c0_2, %c0_3] : memref<28x32xbf16, #tpu.memory_space<vmem>>, vector<28x32xbf16>
    %cst = arith.constant dense<0.000000e+00> : vector<512x32xf32>
    %3 = tpu.matmul %1, %2, %cst {dimension_numbers = #tpu.dot_dimension_numbers<[1], [0], [0], [1], [0, 0, 1, 1], [], []>} : vector<512x28xbf16>, vector<28x32xbf16>, vector<512x32xf32> -> vector<512x32xf32>
    %c0_4 = arith.constant 0 : index
    %c0_5 = arith.constant 0 : index
    %4 = vector.load %arg3[%c0_4, %c0_5] : memref<1x32xf32, #tpu.memory_space<vmem>>, vector<1x32xf32>
    %5 = vector.broadcast %4 : vector<1x32xf32> to vector<512x32xf32>
    %6 = arith.addf %3, %5 : vector<512x32xf32>
    %cst_6 = arith.constant 0.000000e+00 : f32
    %7 = vector.broadcast %cst_6 : f32 to vector<512x32xf32>
    %8 = arith.maximumf %6, %7 : vector<512x32xf32>
    %9 = arith.truncf %8 : vector<512x32xf32> to vector<512x32xbf16>
    %c0_7 = arith.constant 0 : index
    %c0_8 = arith.constant 0 : index
    %10 = vector.load %arg4[%c0_7, %c0_8] : memref<32x48xbf16, #tpu.memory_space<vmem>>, vector<32x48xbf16>
    %cst_9 = arith.constant dense<0.000000e+00> : vector<512x48xf32>
    %11 = tpu.matmul %9, %10, %cst_9 {dimension_numbers = #tpu.dot_dimension_numbers<[1], [0], [0], [1], [0, 0, 1, 1], [], []>} : vector<512x32xbf16>, vector<32x48xbf16>, vector<512x48xf32> -> vector<512x48xf32>
    %c0_10 = arith.constant 0 : index
    %c0_11 = arith.constant 0 : index
    %12 = vector.load %arg5[%c0_10, %c0_11] : memref<1x48xf32, #tpu.memory_space<vmem>>, vector<1x48xf32>
    %13 = vector.broadcast %12 : vector<1x48xf32> to vector<512x48xf32>
    %14 = arith.addf %11, %13 : vector<512x48xf32>
    %cst_12 = arith.constant 0.000000e+00 : f32
    %15 = vector.broadcast %cst_12 : f32 to vector<512x48xf32>
    %16 = arith.maximumf %14, %15 : vector<512x48xf32>
    %17 = arith.truncf %16 : vector<512x48xf32> to vector<512x48xbf16>
    %c0_13 = arith.constant 0 : index
    %c0_14 = arith.constant 0 : index
    %18 = vector.load %arg6[%c0_13, %c0_14] : memref<48x64xbf16, #tpu.memory_space<vmem>>, vector<48x64xbf16>
    %cst_15 = arith.constant dense<0.000000e+00> : vector<512x64xf32>
    %19 = tpu.matmul %17, %18, %cst_15 {dimension_numbers = #tpu.dot_dimension_numbers<[1], [0], [0], [1], [0, 0, 1, 1], [], []>} : vector<512x48xbf16>, vector<48x64xbf16>, vector<512x64xf32> -> vector<512x64xf32>
    %c0_16 = arith.constant 0 : index
    %c0_17 = arith.constant 0 : index
    %20 = vector.load %arg7[%c0_16, %c0_17] : memref<1x64xf32, #tpu.memory_space<vmem>>, vector<1x64xf32>
    %21 = vector.broadcast %20 : vector<1x64xf32> to vector<512x64xf32>
    %22 = arith.addf %19, %21 : vector<512x64xf32>
    %cst_18 = arith.constant 0.000000e+00 : f32
    %23 = vector.broadcast %cst_18 : f32 to vector<512x64xf32>
    %24 = arith.maximumf %22, %23 : vector<512x64xf32>
    %25 = arith.truncf %24 : vector<512x64xf32> to vector<512x64xbf16>
    %c0_19 = arith.constant 0 : index
    %c0_20 = arith.constant 0 : index
    %26 = vector.load %arg8[%c0_19, %c0_20] : memref<64x1xbf16, #tpu.memory_space<vmem>>, vector<64x1xbf16>
    %cst_21 = arith.constant dense<0.000000e+00> : vector<512x1xf32>
    %27 = tpu.matmul %25, %26, %cst_21 {dimension_numbers = #tpu.dot_dimension_numbers<[1], [0], [0], [1], [0, 0, 1, 1], [], []>} : vector<512x64xbf16>, vector<64x1xbf16>, vector<512x1xf32> -> vector<512x1xf32>
    %c0_22 = arith.constant 0 : index
    %c0_23 = arith.constant 0 : index
    %28 = vector.load %arg9[%c0_22, %c0_23] : memref<1x1xf32, #tpu.memory_space<vmem>>, vector<1x1xf32>
    %29 = vector.broadcast %28 : vector<1x1xf32> to vector<512x1xf32>
    %30 = arith.addf %27, %29 : vector<512x1xf32>
    %31 = vector.shape_cast %30 : vector<512x1xf32> to vector<8x64x1xf32>
    %cst_24 = arith.constant dense<0xFF800000> : vector<8x1xf32>
    %32 = vector.multi_reduction <maximumf>, %31, %cst_24 [1] : vector<8x64x1xf32> to vector<8x1xf32>
    %33 = vector.shape_cast %32 : vector<8x1xf32> to vector<8x1x1xf32>
    %34 = vector.broadcast %33 : vector<8x1x1xf32> to vector<8x64x1xf32>
    %35 = arith.subf %31, %34 : vector<8x64x1xf32>
    %36 = math.exp %35 : vector<8x64x1xf32>
    %cst_25 = arith.constant dense<0.000000e+00> : vector<8x1xf32>
    %37 = vector.multi_reduction <add>, %36, %cst_25 [1] : vector<8x64x1xf32> to vector<8x1xf32>
    %38 = vector.shape_cast %37 : vector<8x1xf32> to vector<8x1x1xf32>
    %39 = vector.broadcast %38 : vector<8x1x1xf32> to vector<8x64x1xf32>
    %40 = arith.divf %36, %39 : vector<8x64x1xf32>
    %41 = vector.shape_cast %24 : vector<512x64xf32> to vector<8x64x64xf32>
    %42 = vector.broadcast %40 : vector<8x64x1xf32> to vector<8x64x64xf32>
    %43 = arith.mulf %41, %42 : vector<8x64x64xf32>
    %cst_26 = arith.constant dense<0.000000e+00> : vector<8x64xf32>
    %44 = vector.multi_reduction <add>, %43, %cst_26 [1] : vector<8x64x64xf32> to vector<8x64xf32>
    %c0_27 = arith.constant 0 : index
    %c0_28 = arith.constant 0 : index
    %45 = vector.load %arg10[%c0_27, %c0_28] : memref<8x64xf32, #tpu.memory_space<vmem>>, vector<8x64xf32>
    tpu.vector_store %arg10[%c0_27, %c0_28], %44 {strides = array<i32>} : memref<8x64xf32, #tpu.memory_space<vmem>>, vector<8x64xf32>,
    %c0_29 = arith.constant 0 : index
    %c0_30 = arith.constant 0 : index
    %c0_31 = arith.constant 0 : index
    %46 = vector.load %arg11[%c0_29, %c0_30, %c0_31] : memref<8x64x1xf32, #tpu.memory_space<vmem>>, vector<8x64x1xf32>
    tpu.vector_store %arg11[%c0_29, %c0_30, %c0_31], %40 {strides = array<i32>} : memref<8x64x1xf32, #tpu.memory_space<vmem>>, vector<8x64x1xf32>,
    return
  }
  func.func @transform_0(%arg0: i32) -> (i32, i32, i32) {
    %c0_i32 = arith.constant 0 : i32
    %c0_i32_0 = arith.constant 0 : i32
    %c0_i32_1 = arith.constant 0 : i32
    return %arg0, %c0_i32, %c0_i32_0 : i32, i32, i32
  }
  func.func @transform_1(%arg0: i32) -> (i32, i32) {
    %c0_i32 = arith.constant 0 : i32
    %c0_i32_0 = arith.constant 0 : i32
    %c0_i32_1 = arith.constant 0 : i32
    return %c0_i32, %c0_i32_0 : i32, i32
  }
  func.func @transform_2(%arg0: i32) -> (i32, i32) {
    %c0_i32 = arith.constant 0 : i32
    %c0_i32_0 = arith.constant 0 : i32
    %c0_i32_1 = arith.constant 0 : i32
    return %c0_i32, %c0_i32_0 : i32, i32
  }
  func.func @transform_3(%arg0: i32) -> (i32, i32) {
    %c0_i32 = arith.constant 0 : i32
    %c0_i32_0 = arith.constant 0 : i32
    %c0_i32_1 = arith.constant 0 : i32
    return %c0_i32, %c0_i32_0 : i32, i32
  }
  func.func @transform_4(%arg0: i32) -> (i32, i32) {
    %c0_i32 = arith.constant 0 : i32
    %c0_i32_0 = arith.constant 0 : i32
    %c0_i32_1 = arith.constant 0 : i32
    return %c0_i32, %c0_i32_0 : i32, i32
  }
  func.func @transform_5(%arg0: i32) -> (i32, i32) {
    %c0_i32 = arith.constant 0 : i32
    %c0_i32_0 = arith.constant 0 : i32
    %c0_i32_1 = arith.constant 0 : i32
    return %c0_i32, %c0_i32_0 : i32, i32
  }
  func.func @transform_6(%arg0: i32) -> (i32, i32) {
    %c0_i32 = arith.constant 0 : i32
    %c0_i32_0 = arith.constant 0 : i32
    %c0_i32_1 = arith.constant 0 : i32
    return %c0_i32, %c0_i32_0 : i32, i32
  }
  func.func @transform_7(%arg0: i32) -> (i32, i32) {
    %c0_i32 = arith.constant 0 : i32
    %c0_i32_0 = arith.constant 0 : i32
    %c0_i32_1 = arith.constant 0 : i32
    return %c0_i32, %c0_i32_0 : i32, i32
  }
  func.func @transform_8(%arg0: i32) -> (i32, i32) {
    %c0_i32 = arith.constant 0 : i32
    %c0_i32_0 = arith.constant 0 : i32
    %c0_i32_1 = arith.constant 0 : i32
    return %c0_i32, %c0_i32_0 : i32, i32
  }
  func.func @transform_9(%arg0: i32) -> (i32, i32) {
    %c0_i32 = arith.constant 0 : i32
    %c0_i32_0 = arith.constant 0 : i32
    return %arg0, %c0_i32 : i32, i32
  }
  func.func @transform_10(%arg0: i32) -> (i32, i32, i32) {
    %c0_i32 = arith.constant 0 : i32
    %c0_i32_0 = arith.constant 0 : i32
    %c0_i32_1 = arith.constant 0 : i32
    return %arg0, %c0_i32, %c0_i32_0 : i32, i32, i32
  }
}

</mosaic_0001>

<bundles_post_ra>
// kernel: tpu_custom_call.1
= control target key start
LH: loop header
LB: loop body
LE: loop exit
PB: predicated region body
PF: predicated region fallthrough
CT: control target
= control target key end

     0   :  { %s6116_s0 = inlined_call_operand.vmem [shape: bf16[16,64,28], index: 0, kind: input, shape index: {}]   ;;  %s6117_s1 = inlined_call_operand.vmem [shape: bf16[28,32], index: 1, kind: input, shape index: {}]   ;;  %s6118_s2 = inlined_call_operand.vmem [shape: f32[1,32], index: 2, kind: input, shape index: {}]   ;;  %s6119_s3 = inlined_call_operand.vmem [shape: bf16[32,48], index: 3, kind: input, shape index: {}]   ;;  %s6120_s4 = inlined_call_operand.vmem [shape: f32[1,48], index: 4, kind: input, shape index: {}]   ;;  %s6121_s5 = inlined_call_operand.vmem [shape: bf16[48,64], index: 5, kind: input, shape index: {}]   ;;  %s6122_s6 = inlined_call_operand.vmem [shape: f32[1,64], index: 6, kind: input, shape index: {}]   ;;  %s6123_s7 = inlined_call_operand.vmem [shape: bf16[64,1], index: 7, kind: input, shape index: {}]   ;;  %s6124_s8 = inlined_call_operand.<no memory space> [shape: f32[1,1], index: 8, kind: input, shape index: {}]   ;;  %s6125_s9 = inlined_call_operand.hbm [shape: f32[16,64], index: 9, kind: output, shape index: {0}]   ;;  %s6126_s10 = inlined_call_operand.vmem [shape: f32[16,64,1], index: 10, kind: output, shape index: {1}]  }
   0x1   :  { %v16_v0 = vstv %s6124_s8 }
   0x2   :  { %17 = vst [vmem:[#allocation2] sm:$0x1] %v16_v0 }
   0x3   :  { %18 = vsyncpa [#allocation4], 0 }
   0x4   :  { %20 = vsyncpa [#allocation4 + $0x1], 0  ;;  %s4201_s15 = smov 0   ;;  %s4203_s16 = smov 0  }
   0x5   :  { %s4205_s17 = smov 0   ;;  %s4207_s18 = smov 0  }
   0x6 LB: > { %s3520_s8 = sadd.s32 4294967295, %s4140_s18   ;;  %s3521_s19 = sadd.s32 4294967294, %s4140_s18   ;;  %s4140_s18 = sphi %s4207_s18, %s6332_s18   ;;  %s4136_s17 = sphi %s4205_s17, %s6331_s17   ;;  %s4132_s16 = sphi %s4203_s16, %s6330_s16   ;;  %s4128_s15 = sphi %s4201_s15, %s6329_s15  }
   0x7   : > { %s4224_s20 = sadd.s32 1, %s4140_s18   ;;  %s227_s21 = sadd.s32 1, %s4136_s17 }
   0x8   : > { %s224_s22 = ssub.s32 %s4140_s18, %s4224_s20  ;;  %p237_p0 = scmp.ne.s32.totalorder %s4136_s17, %s4132_s16 }
   0x9   : > { %p225_p1 = scmp.eq.s32.totalorder %s224_s22, 0  ;;  %p238_p2 = scmp.eq.s32.totalorder %s3520_s8, 1 }
   0xa   : > { %p243_p3 = scmp.ne.s32.totalorder %s4132_s16, %s4128_s15  ;;  %p244_p4 = scmp.eq.s32.totalorder %s3521_s19, 1 }
   0xb   : > { %s4234_s23 = scalar_select %p225_p1, %s4136_s17, %s227_s21  }
   0xc   : > { %p4236_p5 = por %p238_p2, %p237_p0  ;;  %p4240_p6 = por %p244_p4, %p243_p3 }
   0xd   : > { %p3524_p7 = scmp.ge.s32.totalorder %s4140_s18, 1  ;;  %p322_p8 = scmp.lt.s32.totalorder %s4140_s18, 3 }
   0xf   : > { %p323_p9 = pnand %p3524_p7, %p322_p8 }
  0x11   : > { %326 = sbr.rel (%p323_p9) target bundleno = 1323 (0x52b), region = 56 }
  0x16   : > { %v3666_v1 = vld [vmem:[%s6117_s1 + $0x8] sm:$0xf]  ;;  %v3871_v2 = vld [vmem:[%s6117_s1 + $0x8] sm:$0x30]  ;;  %vm722_vm0 = vcmask 1045504   ;;  %s4252_s30 = sshll.u32 %s3520_s8, 3 }
  0x17   : > { %v3667_v3 = vor.u32 %v3871_v2, %v3666_v1  ;;  %p368_p10 = scmp.lt.s32.totalorder %s4252_s30, 15  ;;  %v3870_v5 = vld [vmem:[%s6117_s1] sm:$0xff]  ;;  %vm625_vm1 = vcmask 228352   ;;  %v3873_v13 = vld [vmem:[%s6119_s3 + $0x8] sm:$0xff]  ;;  %vm1011_vm2 = vcmask 261120   ;;  %vm1401_vm3 = vcmask 392192  }
  0x18   : > { %1114 = vmatpush.bf16.msra.mxu1 %v3873_v13  ;;  %v3872_v14 = vld [vmem:[%s6119_s3] sm:$0xff]  ;;  %vm1799_vm4 = vcmask 523264   ;;  %vm2065_vm5 = vcmask 7168  }
  0x19   : > { %v724_v4 = vsel %vm722_vm0, %v3667_v3, 0  ;;  %s4259_s13 = scalar_select %p368_p10, %s4252_s30, 15  ;;  %v4293_v18 = vld [vmem:[%s6118_s2] ss:$0 sm:$0xff] }
  0x1a   : > { %732 = vmatpush.bf16.msra.mxu0 %v724_v4  ;;  %v3874_v13 = vld [vmem:[%s6121_s5] sm:$0xff] }
  0x1b   : > { %s3836_s14 = sshll.u32 %s4259_s13, 5 }
  0x1c   : > { %s4265_s22 = scalar_lea.vmem %s6116_s0, %s3836_s14  ;;  %1115 = vmatpush.bf16.msra.mxu1 %v3872_v14  ;;  %s3837_s14 = sshll.u32 %s4259_s13, 6 }
  0x1d   : > { %v3838_v6 = vld [vmem:[%s4265_s22] sm:$0xff]  ;;  %v3839_v7 = vld [vmem:[%s4265_s22 + $0x8] sm:$0xff]  ;;  %v3840_v8 = vld [vmem:[%s4265_s22 + $0x10] sm:$0xff]  ;;  %s4918_s8 = scalar_lea.vmem %s6126_s10, %s3837_s14  ;;  %s3427_s14 = scalar_lea.hbm %s6125_s9, %s4252_s30 }
  0x1e   : > { %733 = vmatpush.bf16.msra.mxu0 %v3870_v5  ;;  %v3841_v9 = vld [vmem:[%s4265_s22 + $0x18] sm:$0xff]  ;;  %v3842_v10 = vld [vmem:[%s4265_s22 + $0x20] sm:$0xff]  ;;  %v3843_v11 = vld [vmem:[%s4265_s22 + $0x28] sm:$0xff] }
  0x1f   : > { %v3844_v12 = vld [vmem:[%s4265_s22 + $0x30] sm:$0xff]  ;;  %v3845_v15 = vld [vmem:[%s4265_s22 + $0x38] sm:$0xff]  ;;  %v3846_v16 = vld [vmem:[%s4265_s22 + $0x40] sm:$0xff] }
  0x20   : > { %v3847_v25 = vld [vmem:[%s4265_s22 + $0x48] sm:$0xff]  ;;  %v3848_v33 = vld [vmem:[%s4265_s22 + $0x50] sm:$0xff]  ;;  %v3849_v41 = vld [vmem:[%s4265_s22 + $0x58] sm:$0xff] }
  0x21   : > { %3668 = vmatmul.msk.bf16.vlgmr.msra.gmra.mxu0 %vm625_vm1, %v3838_v6  ;;  %v3850_v49 = vld [vmem:[%s4265_s22 + $0x60] sm:$0xff]  ;;  %v3851_v57 = vld [vmem:[%s4265_s22 + $0x68] sm:$0xff]  ;;  %v3852_v1 = vld [vmem:[%s4265_s22 + $0x70] sm:$0xff] }
  0x31   : > { %3669 = vmatmul.msk.bf16.gmra.mxu0 %vm625_vm1, %v3839_v7 }
  0x41   : > { %3670 = vmatmul.msk.bf16.gmra.mxu0 %vm625_vm1, %v3840_v8 }
  0x51   : > { %3671 = vmatmul.msk.bf16.gmra.mxu0 %vm625_vm1, %v3841_v9  ;;  %v3876_v9 = vld [vmem:[%s6121_s5 + $0x10] sm:$0xff] }
  0x52   : > { %1503 = vmatpush.bf16.msra.mxu2 %v3876_v9 }
  0x61   : > { %3672 = vmatmul.msk.bf16.gmra.mxu0 %vm625_vm1, %v3842_v10  ;;  %v3853_v10 = vld [vmem:[%s4265_s22 + $0x78] sm:$0xff] }
  0x71   : > { %3673 = vmatmul.msk.bf16.gmra.mxu0 %vm625_vm1, %v3843_v11 }
  0x81   : > { %3674 = vmatmul.msk.bf16.gmra.mxu0 %vm625_vm1, %v3844_v12  ;;  %v3875_v12 = vld [vmem:[%s6121_s5 + $0x8] sm:$0xff] }
  0x82   : > { %1504 = vmatpush.bf16.msra.mxu2 %v3875_v12  ;;  %v3858_v12 = vld [vmem:[%s4265_s22 + $0xa0] sm:$0xff] }
  0x86   : > { %1505 = vmatpush.bf16.msra.mxu2 %v3874_v13 }
  0x91   : > { %3675 = vmatmul.msk.bf16.gmra.mxu0 %vm625_vm1, %v3845_v15 }
  0x9e   : > { %v735_v17 = vpop.f32.mrf.mxu0 }
  0x9f   : > { %v736_v19 = vadd.f32 %v4293_v18, %v735_v17 }
  0xa1   : > { %3676 = vmatmul.msk.bf16.gmra.mxu0 %vm625_vm1, %v3846_v16  ;;  %v895_v22 = vmax.f32 %v736_v19, 0.0 }
  0xa6   : > { %v737_v20 = vpop.f32.mrf.mxu0 }
  0xa7   : > { %v738_v21 = vadd.f32 %v4293_v18, %v737_v20 }
  0xa9   : > { %v896_v23 = vmax.f32 %v738_v21, 0.0  ;;  %v3854_v21 = vld [vmem:[%s4265_s22 + $0x80] sm:$0xff] }
  0xab   : > { %v959_v24 = vpack.c.bf16 %v896_v23, %v895_v22 }
  0xad   : > { %3708 = vmatmul.msk.bf16.vlgmr.msra.gmra.mxu1 %vm1011_vm2, %v959_v24 }
  0xae   : > { %v740_v26 = vpop.f32.mrf.mxu0 }
  0xaf   : > { %v741_v27 = vadd.f32 %v4293_v18, %v740_v26 }
  0xb1   : > { %3677 = vmatmul.msk.bf16.gmra.mxu0 %vm625_vm1, %v3847_v25  ;;  %v897_v30 = vmax.f32 %v741_v27, 0.0 }
  0xb6   : > { %v742_v28 = vpop.f32.mrf.mxu0 }
  0xb7   : > { %v743_v29 = vadd.f32 %v4293_v18, %v742_v28 }
  0xb9   : > { %v898_v31 = vmax.f32 %v743_v29, 0.0 }
  0xbb   : > { %v960_v32 = vpack.c.bf16 %v898_v31, %v897_v30  ;;  %v4350_v30 = vld [vmem:[%s6120_s4] ss:$0 sm:$0xff]  ;;  %v3855_v31 = vld [vmem:[%s4265_s22 + $0x88] sm:$0xff] }
  0xbd   : > { %3709 = vmatmul.msk.bf16.gmra.mxu1 %vm1011_vm2, %v960_v32 }
  0xbe   : > { %v745_v34 = vpop.f32.mrf.mxu0 }
  0xbf   : > { %v746_v35 = vadd.f32 %v4293_v18, %v745_v34 }
  0xc1   : > { %3678 = vmatmul.msk.bf16.gmra.mxu0 %vm625_vm1, %v3848_v33  ;;  %v899_v38 = vmax.f32 %v746_v35, 0.0 }
  0xc6   : > { %v747_v36 = vpop.f32.mrf.mxu0 }
  0xc7   : > { %v748_v37 = vadd.f32 %v4293_v18, %v747_v36 }
  0xc9   : > { %v900_v39 = vmax.f32 %v748_v37, 0.0 }
  0xcb   : > { %v961_v40 = vpack.c.bf16 %v900_v39, %v899_v38 }
  0xcd   : > { %3710 = vmatmul.msk.bf16.gmra.mxu1 %vm1011_vm2, %v961_v40 }
  0xce   : > { %v750_v42 = vpop.f32.mrf.mxu0 }
  0xcf   : > { %v751_v43 = vadd.f32 %v4293_v18, %v750_v42 }
  0xd1   : > { %3679 = vmatmul.msk.bf16.gmra.mxu0 %vm625_vm1, %v3849_v41  ;;  %v901_v46 = vmax.f32 %v751_v43, 0.0 }
  0xd6   : > { %v752_v44 = vpop.f32.mrf.mxu0 }
  0xd7   : > { %v753_v45 = vadd.f32 %v4293_v18, %v752_v44 }
  0xd9   : > { %v902_v47 = vmax.f32 %v753_v45, 0.0 }
  0xdb   : > { %v962_v48 = vpack.c.bf16 %v902_v47, %v901_v46  ;;  %v3856_v46 = vld [vmem:[%s4265_s22 + $0x90] sm:$0xff] }
  0xdd   : > { %3711 = vmatmul.msk.bf16.gmra.mxu1 %vm1011_vm2, %v962_v48 }
  0xde   : > { %v755_v50 = vpop.f32.mrf.mxu0 }
  0xdf   : > { %v756_v51 = vadd.f32 %v4293_v18, %v755_v50 }
  0xe1   : > { %3680 = vmatmul.msk.bf16.gmra.mxu0 %vm625_vm1, %v3850_v49  ;;  %v903_v54 = vmax.f32 %v756_v51, 0.0 }
  0xe6   : > { %v757_v52 = vpop.f32.mrf.mxu0 }
  0xe7   : > { %v758_v53 = vadd.f32 %v4293_v18, %v757_v52 }
  0xe9   : > { %v904_v55 = vmax.f32 %v758_v53, 0.0 }
  0xeb   : > { %v963_v56 = vpack.c.bf16 %v904_v55, %v903_v54 }
  0xed   : > { %3712 = vmatmul.msk.bf16.gmra.mxu1 %vm1011_vm2, %v963_v56 }
  0xee   : > { %v760_v58 = vpop.f32.mrf.mxu0 }
  0xef   : > { %v761_v59 = vadd.f32 %v4293_v18, %v760_v58 }
  0xf1   : > { %3681 = vmatmul.msk.bf16.gmra.mxu0 %vm625_vm1, %v3851_v57  ;;  %v905_v62 = vmax.f32 %v761_v59, 0.0 }
  0xf6   : > { %v762_v60 = vpop.f32.mrf.mxu0 }
  0xf7   : > { %v763_v61 = vadd.f32 %v4293_v18, %v762_v60 }
  0xf9   : > { %v906_v63 = vmax.f32 %v763_v61, 0.0  ;;  %v3857_v61 = vld [vmem:[%s4265_s22 + $0x98] sm:$0xff] }
  0xfb   : > { %v964_v0 = vpack.c.bf16 %v906_v63, %v905_v62 }
  0xfd   : > { %3713 = vmatmul.msk.bf16.gmra.mxu1 %vm1011_vm2, %v964_v0 }
  0xfe   : > { %v765_v2 = vpop.f32.mrf.mxu0 }
  0xff   : > { %v766_v3 = vadd.f32 %v4293_v18, %v765_v2 }
 0x101   : > { %3682 = vmatmul.msk.bf16.gmra.mxu0 %vm625_vm1, %v3852_v1  ;;  %v907_v6 = vmax.f32 %v766_v3, 0.0 }
 0x106   : > { %v767_v4 = vpop.f32.mrf.mxu0 }
 0x107   : > { %v768_v5 = vadd.f32 %v4293_v18, %v767_v4 }
 0x109   : > { %v908_v7 = vmax.f32 %v768_v5, 0.0 }
 0x10b   : > { %v965_v8 = vpack.c.bf16 %v908_v7, %v907_v6 }
 0x10d   : > { %3714 = vmatmul.msk.bf16.gmra.mxu1 %vm1011_vm2, %v965_v8 }
 0x10e   : > { %v770_v11 = vpop.f32.mrf.mxu0 }
 0x10f   : > { %v771_v14 = vadd.f32 %v4293_v18, %v770_v11 }
 0x111   : > { %3683 = vmatmul.msk.bf16.gmra.mxu0 %vm625_vm1, %v3853_v10  ;;  %v909_v17 = vmax.f32 %v771_v14, 0.0 }
 0x116   : > { %v772_v15 = vpop.f32.mrf.mxu0 }
 0x117   : > { %v773_v16 = vadd.f32 %v4293_v18, %v772_v15 }
 0x119   : > { %v910_v19 = vmax.f32 %v773_v16, 0.0 }
 0x11b   : > { %v966_v20 = vpack.c.bf16 %v910_v19, %v909_v17 }
 0x11d   : > { %3715 = vmatmul.msk.bf16.gmra.mxu1 %vm1011_vm2, %v966_v20 }
 0x11e   : > { %v775_v22 = vpop.f32.mrf.mxu0 }
 0x11f   : > { %v776_v23 = vadd.f32 %v4293_v18, %v775_v22 }
 0x121   : > { %3684 = vmatmul.msk.bf16.gmra.mxu0 %vm625_vm1, %v3854_v21  ;;  %v911_v26 = vmax.f32 %v776_v23, 0.0 }
 0x126   : > { %v777_v24 = vpop.f32.mrf.mxu0 }
 0x127   : > { %v778_v25 = vadd.f32 %v4293_v18, %v777_v24 }
 0x129   : > { %v912_v27 = vmax.f32 %v778_v25, 0.0 }
 0x12a   : > { %v1117_v28 = vpop.f32.mrf.mxu1 }
 0x12b   : > { %v967_v29 = vpack.c.bf16 %v912_v27, %v911_v26  ;;  %v1118_v33 = vadd.f32 %v4350_v30, %v1117_v28  ;;  %v3859_v28 = vld [vmem:[%s4265_s22 + $0xa8] sm:$0xff] }
 0x12d   : > { %3716 = vmatmul.msk.bf16.gmra.mxu1 %vm1011_vm2, %v967_v29  ;;  %v1277_v36 = vmax.f32 %v1118_v33, 0.0 }
 0x12e   : > { %v780_v32 = vpop.f32.mrf.mxu0 }
 0x12f   : > { %v781_v37 = vadd.f32 %v4293_v18, %v780_v32 }
 0x131   : > { %3685 = vmatmul.msk.bf16.gmra.mxu0 %vm625_vm1, %v3855_v31  ;;  %v913_v42 = vmax.f32 %v781_v37, 0.0 }
 0x132   : > { %v1119_v34 = vpop.f32.mrf.mxu1 }
 0x133   : > { %v1120_v35 = vadd.f32 %v4350_v30, %v1119_v34 }
 0x135   : > { %v1278_v38 = vmax.f32 %v1120_v35, 0.0 }
 0x136   : > { %v782_v39 = vpop.f32.mrf.mxu0 }
 0x137   : > { %v783_v40 = vadd.f32 %v4293_v18, %v782_v39  ;;  %v1341_v41 = vpack.c.bf16 %v1278_v38, %v1277_v36 }
 0x139   : > { %v914_v43 = vmax.f32 %v783_v40, 0.0  ;;  %3752 = vmatmul.msk.bf16.vlgmr.msra.gmra.mxu2 %vm1401_vm3, %v1341_v41 }
 0x13a   : > { %v1122_v44 = vpop.f32.mrf.mxu1 }
 0x13b   : > { %v968_v45 = vpack.c.bf16 %v914_v43, %v913_v42  ;;  %v1123_v48 = vadd.f32 %v4350_v30, %v1122_v44  ;;  %v3860_v44 = vld [vmem:[%s4265_s22 + $0xb0] sm:$0xff] }
 0x13d   : > { %3717 = vmatmul.msk.bf16.gmra.mxu1 %vm1011_vm2, %v968_v45  ;;  %v1279_v51 = vmax.f32 %v1123_v48, 0.0 }
 0x13e   : > { %v785_v47 = vpop.f32.mrf.mxu0 }
 0x13f   : > { %v786_v52 = vadd.f32 %v4293_v18, %v785_v47 }
 0x141   : > { %3686 = vmatmul.msk.bf16.gmra.mxu0 %vm625_vm1, %v3856_v46  ;;  %v915_v57 = vmax.f32 %v786_v52, 0.0 }
 0x142   : > { %v1124_v49 = vpop.f32.mrf.mxu1 }
 0x143   : > { %v1125_v50 = vadd.f32 %v4350_v30, %v1124_v49 }
 0x145   : > { %v1280_v53 = vmax.f32 %v1125_v50, 0.0 }
 0x146   : > { %v787_v54 = vpop.f32.mrf.mxu0 }
 0x147   : > { %v788_v55 = vadd.f32 %v4293_v18, %v787_v54  ;;  %v1342_v56 = vpack.c.bf16 %v1280_v53, %v1279_v51 }
 0x149   : > { %v916_v58 = vmax.f32 %v788_v55, 0.0  ;;  %3753 = vmatmul.msk.bf16.gmra.mxu2 %vm1401_vm3, %v1342_v56 }
 0x14a   : > { %v1127_v59 = vpop.f32.mrf.mxu1 }
 0x14b   : > { %v969_v60 = vpack.c.bf16 %v916_v58, %v915_v57  ;;  %v1128_v63 = vadd.f32 %v4350_v30, %v1127_v59  ;;  %v3861_v59 = vld [vmem:[%s4265_s22 + $0xb8] sm:$0xff] }
 0x14d   : > { %3718 = vmatmul.msk.bf16.gmra.mxu1 %vm1011_vm2, %v969_v60  ;;  %v1281_v2 = vmax.f32 %v1128_v63, 0.0 }
 0x14e   : > { %v790_v62 = vpop.f32.mrf.mxu0 }
 0x14f   : > { %v791_v3 = vadd.f32 %v4293_v18, %v790_v62 }
 0x151   : > { %3687 = vmatmul.msk.bf16.gmra.mxu0 %vm625_vm1, %v3857_v61  ;;  %v917_v8 = vmax.f32 %v791_v3, 0.0 }
 0x152   : > { %v1129_v0 = vpop.f32.mrf.mxu1 }
 0x153   : > { %v1130_v1 = vadd.f32 %v4350_v30, %v1129_v0 }
 0x155   : > { %v1282_v4 = vmax.f32 %v1130_v1, 0.0 }
 0x156   : > { %v792_v5 = vpop.f32.mrf.mxu0 }
 0x157   : > { %v793_v6 = vadd.f32 %v4293_v18, %v792_v5  ;;  %v1343_v7 = vpack.c.bf16 %v1282_v4, %v1281_v2 }
 0x159   : > { %v918_v9 = vmax.f32 %v793_v6, 0.0  ;;  %3754 = vmatmul.msk.bf16.gmra.mxu2 %vm1401_vm3, %v1343_v7 }
 0x15a   : > { %v1132_v10 = vpop.f32.mrf.mxu1 }
 0x15b   : > { %v970_v11 = vpack.c.bf16 %v918_v9, %v917_v8  ;;  %v1133_v14 = vadd.f32 %v4350_v30, %v1132_v10  ;;  %v3880_v9 = vld [vmem:[%s6123_s7 + $0x18] sm:$0xff] }
 0x15c   : > { %1900 = vmatpush.bf16.msra.mxu3 %v3880_v9 }
 0x15d   : > { %3719 = vmatmul.msk.bf16.gmra.mxu1 %vm1011_vm2, %v970_v11  ;;  %v1283_v17 = vmax.f32 %v1133_v14, 0.0  ;;  %v3862_v11 = vld [vmem:[%s4265_s22 + $0xc0] sm:$0xff] }
 0x15e   : > { %v795_v13 = vpop.f32.mrf.mxu0 }
 0x15f   : > { %v796_v19 = vadd.f32 %v4293_v18, %v795_v13  ;;  %v3879_v13 = vld [vmem:[%s6123_s7 + $0x10] sm:$0xff] }
 0x160   : > { %1901 = vmatpush.bf16.msra.mxu3 %v3879_v13 }
 0x161   : > { %3688 = vmatmul.msk.bf16.gmra.mxu0 %vm625_vm1, %v3858_v12  ;;  %v919_v24 = vmax.f32 %v796_v19, 0.0 }
 0x162   : > { %v1134_v15 = vpop.f32.mrf.mxu1 }
 0x163   : > { %v1135_v16 = vadd.f32 %v4350_v30, %v1134_v15 }
 0x165   : > { %v1284_v20 = vmax.f32 %v1135_v16, 0.0  ;;  %v3878_v16 = vld [vmem:[%s6123_s7 + $0x8] sm:$0xff] }
 0x166   : > { %v797_v21 = vpop.f32.mrf.mxu0  ;;  %1902 = vmatpush.bf16.msra.mxu3 %v3878_v16 }
 0x167   : > { %v798_v22 = vadd.f32 %v4293_v18, %v797_v21  ;;  %v1344_v23 = vpack.c.bf16 %v1284_v20, %v1283_v17 }
 0x169   : > { %v920_v25 = vmax.f32 %v798_v22, 0.0  ;;  %3755 = vmatmul.msk.bf16.gmra.mxu2 %vm1401_vm3, %v1344_v23  ;;  %v3877_v23 = vld [vmem:[%s6123_s7] sm:$0xff] }
 0x16a   : > { %v1137_v26 = vpop.f32.mrf.mxu1  ;;  %1903 = vmatpush.bf16.msra.mxu3 %v3877_v23 }
 0x16b   : > { %v971_v27 = vpack.c.bf16 %v920_v25, %v919_v24  ;;  %v1138_v31 = vadd.f32 %v4350_v30, %v1137_v26 }
 0x16d   : > { %3720 = vmatmul.msk.bf16.gmra.mxu1 %vm1011_vm2, %v971_v27  ;;  %v1285_v34 = vmax.f32 %v1138_v31, 0.0  ;;  %v3863_v31 = vld [vmem:[%s4265_s22 + $0xc8] sm:$0xff] }
 0x16e   : > { %v800_v29 = vpop.f32.mrf.mxu0 }
 0x16f   : > { %v801_v35 = vadd.f32 %v4293_v18, %v800_v29 }
 0x171   : > { %3689 = vmatmul.msk.bf16.gmra.mxu0 %vm625_vm1, %v3859_v28  ;;  %v921_v40 = vmax.f32 %v801_v35, 0.0 }
 0x172   : > { %v1139_v32 = vpop.f32.mrf.mxu1 }
 0x173   : > { %v1140_v33 = vadd.f32 %v4350_v30, %v1139_v32 }
 0x175   : > { %v1286_v36 = vmax.f32 %v1140_v33, 0.0 }
 0x176   : > { %v802_v37 = vpop.f32.mrf.mxu0 }
 0x177   : > { %v803_v38 = vadd.f32 %v4293_v18, %v802_v37  ;;  %v1345_v39 = vpack.c.bf16 %v1286_v36, %v1285_v34 }
 0x179   : > { %v922_v41 = vmax.f32 %v803_v38, 0.0  ;;  %3756 = vmatmul.msk.bf16.gmra.mxu2 %vm1401_vm3, %v1345_v39 }
 0x17a   : > { %v1142_v42 = vpop.f32.mrf.mxu1 }
 0x17b   : > { %v972_v43 = vpack.c.bf16 %v922_v41, %v921_v40  ;;  %v1143_v46 = vadd.f32 %v4350_v30, %v1142_v42 }
 0x17d   : > { %3721 = vmatmul.msk.bf16.gmra.mxu1 %vm1011_vm2, %v972_v43  ;;  %v1287_v49 = vmax.f32 %v1143_v46, 0.0 }
 0x17e   : > { %v805_v45 = vpop.f32.mrf.mxu0 }
 0x17f   : > { %v806_v50 = vadd.f32 %v4293_v18, %v805_v45 }
 0x181   : > { %3690 = vmatmul.msk.bf16.gmra.mxu0 %vm625_vm1, %v3860_v44  ;;  %v923_v55 = vmax.f32 %v806_v50, 0.0 }
 0x182   : > { %v1144_v47 = vpop.f32.mrf.mxu1 }
 0x183   : > { %v1145_v48 = vadd.f32 %v4350_v30, %v1144_v47  ;;  %v3864_v47 = vld [vmem:[%s4265_s22 + $0xd0] sm:$0xff] }
 0x185   : > { %v1288_v51 = vmax.f32 %v1145_v48, 0.0 }
 0x186   : > { %v807_v52 = vpop.f32.mrf.mxu0 }
 0x187   : > { %v808_v53 = vadd.f32 %v4293_v18, %v807_v52  ;;  %v1346_v54 = vpack.c.bf16 %v1288_v51, %v1287_v49  ;;  %v4441_v49 = vld [vmem:[%s6122_s6] ss:$0 sm:$0xff] }
 0x189   : > { %v924_v56 = vmax.f32 %v808_v53, 0.0  ;;  %3757 = vmatmul.msk.bf16.gmra.mxu2 %vm1401_vm3, %v1346_v54 }
 0x18a   : > { %v1147_v57 = vpop.f32.mrf.mxu1 }
 0x18b   : > { %v973_v58 = vpack.c.bf16 %v924_v56, %v923_v55  ;;  %v1148_v61 = vadd.f32 %v4350_v30, %v1147_v57 }
 0x18d   : > { %3722 = vmatmul.msk.bf16.gmra.mxu1 %vm1011_vm2, %v973_v58  ;;  %v1289_v0 = vmax.f32 %v1148_v61, 0.0 }
 0x18e   : > { %v810_v60 = vpop.f32.mrf.mxu0 }
 0x18f   : > { %v811_v1 = vadd.f32 %v4293_v18, %v810_v60 }
 0x191   : > { %3691 = vmatmul.msk.bf16.gmra.mxu0 %vm625_vm1, %v3861_v59  ;;  %v925_v6 = vmax.f32 %v811_v1, 0.0 }
 0x192   : > { %v1149_v62 = vpop.f32.mrf.mxu1 }
 0x193   : > { %v1150_v63 = vadd.f32 %v4350_v30, %v1149_v62 }
 0x195   : > { %v1290_v2 = vmax.f32 %v1150_v63, 0.0 }
 0x196   : > { %v812_v3 = vpop.f32.mrf.mxu0 }
 0x197   : > { %v813_v4 = vadd.f32 %v4293_v18, %v812_v3  ;;  %v1347_v5 = vpack.c.bf16 %v1290_v2, %v1289_v0 }
 0x199   : > { %v926_v7 = vmax.f32 %v813_v4, 0.0  ;;  %3758 = vmatmul.msk.bf16.gmra.mxu2 %vm1401_vm3, %v1347_v5 }
 0x19a   : > { %v1152_v8 = vpop.f32.mrf.mxu1 }
 0x19b   : > { %v974_v10 = vpack.c.bf16 %v926_v7, %v925_v6  ;;  %v1153_v14 = vadd.f32 %v4350_v30, %v1152_v8  ;;  %v3865_v6 = vld [vmem:[%s4265_s22 + $0xd8] sm:$0xff] }
 0x19d   : > { %3723 = vmatmul.msk.bf16.gmra.mxu1 %vm1011_vm2, %v974_v10  ;;  %v1291_v19 = vmax.f32 %v1153_v14, 0.0 }
 0x19e   : > { %v815_v12 = vpop.f32.mrf.mxu0 }
 0x19f   : > { %v816_v20 = vadd.f32 %v4293_v18, %v815_v12 }
 0x1a1   : > { %3692 = vmatmul.msk.bf16.gmra.mxu0 %vm625_vm1, %v3862_v11  ;;  %v927_v26 = vmax.f32 %v816_v20, 0.0 }
 0x1a2   : > { %v1154_v15 = vpop.f32.mrf.mxu1 }
 0x1a3   : > { %v1155_v17 = vadd.f32 %v4350_v30, %v1154_v15 }
 0x1a5   : > { %v1292_v21 = vmax.f32 %v1155_v17, 0.0 }
 0x1a6   : > { %v817_v22 = vpop.f32.mrf.mxu0 }
 0x1a7   : > { %v818_v24 = vadd.f32 %v4293_v18, %v817_v22  ;;  %v1348_v25 = vpack.c.bf16 %v1292_v21, %v1291_v19 }
 0x1a9   : > { %v928_v27 = vmax.f32 %v818_v24, 0.0  ;;  %3759 = vmatmul.msk.bf16.gmra.mxu2 %vm1401_vm3, %v1348_v25 }
 0x1aa   : > { %v1157_v28 = vpop.f32.mrf.mxu1 }
 0x1ab   : > { %v975_v29 = vpack.c.bf16 %v928_v27, %v927_v26  ;;  %v1158_v33 = vadd.f32 %v4350_v30, %v1157_v28 }
 0x1ad   : > { %3724 = vmatmul.msk.bf16.gmra.mxu1 %vm1011_vm2, %v975_v29  ;;  %v1293_v36 = vmax.f32 %v1158_v33, 0.0  ;;  %v3866_v29 = vld [vmem:[%s4265_s22 + $0xe0] sm:$0xff] }
 0x1ae   : > { %v820_v32 = vpop.f32.mrf.mxu0 }
 0x1af   : > { %v821_v37 = vadd.f32 %v4293_v18, %v820_v32 }
 0x1b1   : > { %3693 = vmatmul.msk.bf16.gmra.mxu0 %vm625_vm1, %v3863_v31  ;;  %v929_v42 = vmax.f32 %v821_v37, 0.0 }
 0x1b2   : > { %v1159_v34 = vpop.f32.mrf.mxu1 }
 0x1b3   : > { %v1160_v35 = vadd.f32 %v4350_v30, %v1159_v34 }
 0x1b5   : > { %v1294_v38 = vmax.f32 %v1160_v35, 0.0 }
 0x1b6   : > { %v822_v39 = vpop.f32.mrf.mxu0 }
 0x1b7   : > { %v823_v40 = vadd.f32 %v4293_v18, %v822_v39  ;;  %v1349_v41 = vpack.c.bf16 %v1294_v38, %v1293_v36 }
 0x1b9   : > { %v930_v43 = vmax.f32 %v823_v40, 0.0  ;;  %3760 = vmatmul.msk.bf16.gmra.mxu2 %vm1401_vm3, %v1349_v41 }
 0x1ba   : > { %v1162_v44 = vpop.f32.mrf.mxu1 }
 0x1bb   : > { %v976_v45 = vpack.c.bf16 %v930_v43, %v929_v42  ;;  %v1163_v50 = vadd.f32 %v4350_v30, %v1162_v44 }
 0x1bc   : > { %v1507_v46 = vpop.f32.mrf.mxu2 }
 0x1bd   : > { %3725 = vmatmul.msk.bf16.gmra.mxu1 %vm1011_vm2, %v976_v45  ;;  %v4446_v52 = vadd.f32 %v4441_v49, %v1507_v46  ;;  %v1295_v55 = vmax.f32 %v1163_v50, 0.0 }
 0x1be   : > { %v825_v48 = vpop.f32.mrf.mxu0 }
 0x1bf   : > { %v826_v56 = vadd.f32 %v4293_v18, %v825_v48  ;;  %v6158_v60 = vmax.f32 %v4446_v52, 0.0 }
 0x1c1   : > { %3694 = vmatmul.msk.bf16.gmra.mxu0 %vm625_vm1, %v3864_v47  ;;  %v931_v0 = vmax.f32 %v826_v56, 0.0 }
 0x1c2   : > { %v1164_v51 = vpop.f32.mrf.mxu1 }
 0x1c3   : > { %v1165_v53 = vadd.f32 %v4350_v30, %v1164_v51 }
 0x1c4   : > { %v1509_v54 = vpop.f32.mrf.mxu2 }
 0x1c5   : > { %v1296_v57 = vmax.f32 %v1165_v53, 0.0  ;;  %v4451_v58 = vadd.f32 %v4441_v49, %v1509_v54  ;;  %v3867_v54 = vld [vmem:[%s4265_s22 + $0xe8] sm:$0xff] }
 0x1c6   : > { %v827_v59 = vpop.f32.mrf.mxu0 }
 0x1c7   : > { %v6154_v61 = vmax.f32 %v4451_v58, 0.0  ;;  %v828_v62 = vadd.f32 %v4293_v18, %v827_v59  ;;  %v1350_v63 = vpack.c.bf16 %v1296_v57, %v1295_v55 }
 0x1c9   : > { %v932_v1 = vmax.f32 %v828_v62, 0.0  ;;  %3761 = vmatmul.msk.bf16.gmra.mxu2 %vm1401_vm3, %v1350_v63  ;;  %v1731_v2 = vpack.c.bf16 %v6154_v61, %v6158_v60 }
 0x1ca   : > { %v1167_v3 = vpop.f32.mrf.mxu1 }
 0x1cb   : > { %v977_v4 = vpack.c.bf16 %v932_v1, %v931_v0  ;;  %3800 = vmatmul.msk.bf16.vlgmr.msra.gmra.mxu3 %vm1799_vm4, %v1731_v2  ;;  %v1168_v8 = vadd.f32 %v4350_v30, %v1167_v3 }
 0x1cc   : > { %v1512_v5 = vpop.f32.mrf.mxu2 }
 0x1cd   : > { %3726 = vmatmul.msk.bf16.gmra.mxu1 %vm1011_vm2, %v977_v4  ;;  %v4467_v10 = vadd.f32 %v4441_v49, %v1512_v5  ;;  %v1297_v13 = vmax.f32 %v1168_v8, 0.0 }
 0x1ce   : > { %v830_v7 = vpop.f32.mrf.mxu0 }
 0x1cf   : > { %v831_v14 = vadd.f32 %v4293_v18, %v830_v7  ;;  %v6155_v19 = vmax.f32 %v4467_v10, 0.0 }
 0x1d1   : > { %3695 = vmatmul.msk.bf16.gmra.mxu0 %vm625_vm1, %v3865_v6  ;;  %v933_v23 = vmax.f32 %v831_v14, 0.0 }
 0x1d2   : > { %v1169_v9 = vpop.f32.mrf.mxu1 }
 0x1d3   : > { %v1170_v11 = vadd.f32 %v4350_v30, %v1169_v9 }
 0x1d4   : > { %v1514_v12 = vpop.f32.mrf.mxu2 }
 0x1d5   : > { %v1298_v15 = vmax.f32 %v1170_v11, 0.0  ;;  %v4472_v16 = vadd.f32 %v4441_v49, %v1514_v12 }
 0x1d6   : > { %v832_v17 = vpop.f32.mrf.mxu0 }
 0x1d7   : > { %v6152_v20 = vmax.f32 %v4472_v16, 0.0  ;;  %v833_v21 = vadd.f32 %v4293_v18, %v832_v17  ;;  %v1351_v22 = vpack.c.bf16 %v1298_v15, %v1297_v13  ;;  %v3868_v17 = vld [vmem:[%s4265_s22 + $0xf0] sm:$0xff] }
 0x1d9   : > { %v934_v24 = vmax.f32 %v833_v21, 0.0  ;;  %3762 = vmatmul.msk.bf16.gmra.mxu2 %vm1401_vm3, %v1351_v22  ;;  %v1732_v25 = vpack.c.bf16 %v6152_v20, %v6155_v19 }
 0x1da   : > { %v1172_v26 = vpop.f32.mrf.mxu1 }
 0x1db   : > { %v978_v27 = vpack.c.bf16 %v934_v24, %v933_v23  ;;  %3801 = vmatmul.msk.bf16.gmra.mxu3 %vm1799_vm4, %v1732_v25  ;;  %v1173_v32 = vadd.f32 %v4350_v30, %v1172_v26 }
 0x1dc   : > { %v1517_v28 = vpop.f32.mrf.mxu2 }
 0x1dd   : > { %3727 = vmatmul.msk.bf16.gmra.mxu1 %vm1011_vm2, %v978_v27  ;;  %v4488_v34 = vadd.f32 %v4441_v49, %v1517_v28  ;;  %v1299_v37 = vmax.f32 %v1173_v32, 0.0 }
 0x1de   : > { %v835_v31 = vpop.f32.mrf.mxu0 }
 0x1df   : > { %v836_v38 = vadd.f32 %v4293_v18, %v835_v31  ;;  %v6153_v42 = vmax.f32 %v4488_v34, 0.0 }
 0x1e1   : > { %3696 = vmatmul.msk.bf16.gmra.mxu0 %vm625_vm1, %v3866_v29  ;;  %v935_v46 = vmax.f32 %v836_v38, 0.0 }
 0x1e2   : > { %v1174_v33 = vpop.f32.mrf.mxu1 }
 0x1e3   : > { %v1175_v35 = vadd.f32 %v4350_v30, %v1174_v33 }
 0x1e4   : > { %v1519_v36 = vpop.f32.mrf.mxu2 }
 0x1e5   : > { %v1300_v39 = vmax.f32 %v1175_v35, 0.0  ;;  %v4493_v40 = vadd.f32 %v4441_v49, %v1519_v36 }
 0x1e6   : > { %v837_v41 = vpop.f32.mrf.mxu0 }
 0x1e7   : > { %v6147_v43 = vmax.f32 %v4493_v40, 0.0  ;;  %v838_v44 = vadd.f32 %v4293_v18, %v837_v41  ;;  %v1352_v45 = vpack.c.bf16 %v1300_v39, %v1299_v37 }
 0x1e9   : > { %v936_v47 = vmax.f32 %v838_v44, 0.0  ;;  %3763 = vmatmul.msk.bf16.gmra.mxu2 %vm1401_vm3, %v1352_v45  ;;  %v1733_v48 = vpack.c.bf16 %v6147_v43, %v6153_v42 }
 0x1ea   : > { %v1177_v50 = vpop.f32.mrf.mxu1 }
 0x1eb   : > { %v979_v51 = vpack.c.bf16 %v936_v47, %v935_v46  ;;  %3802 = vmatmul.msk.bf16.gmra.mxu3 %vm1799_vm4, %v1733_v48  ;;  %v1178_v56 = vadd.f32 %v4350_v30, %v1177_v50  ;;  %v3869_v47 = vld [vmem:[%s4265_s22 + $0xf8] sm:$0xff]  ;;  %s356_s22 = sand.u32 1, %s4132_s16  }
 0x1ec   : > { %v1522_v53 = vpop.f32.mrf.mxu2  ;;  %s3525_s29 = sshll.u32 %s356_s22, 3  ;;  %s3411_s30 = scalar_lea.sflag [#allocation4], %s356_s22 }
 0x1ed   : > { %3728 = vmatmul.msk.bf16.gmra.mxu1 %vm1011_vm2, %v979_v51  ;;  %v4509_v59 = vadd.f32 %v4441_v49, %v1522_v53  ;;  %v1301_v0 = vmax.f32 %v1178_v56, 0.0  ;;  %s358_s19 = scalar_lea.vmem [#allocation3], %s3525_s29  ;;  %s4098_s29 = scalar_lea.hbm %s6125_s9, 16 }
 0x1ee   : > { %v840_v55 = vpop.f32.mrf.mxu0  ;;  %s3429_s21 = sshll.u32 %s358_s19, 4  ;;  %s3430_s21 = int_to_ptr.vmem [resolvable:$true] %s3429_s21 }
 0x1ef   : > { %v841_v1 = vadd.f32 %v4293_v18, %v840_v55  ;;  %v6146_v5 = vmax.f32 %v4509_v59, 0.0 }
 0x1f1   : > { %3697 = vmatmul.msk.bf16.gmra.mxu0 %vm625_vm1, %v3867_v54  ;;  %v937_v9 = vmax.f32 %v841_v1, 0.0 }
 0x1f2   : > { %v1179_v57 = vpop.f32.mrf.mxu1 }
 0x1f3   : > { %v1180_v62 = vadd.f32 %v4350_v30, %v1179_v57 }
 0x1f4   : > { %v1524_v63 = vpop.f32.mrf.mxu2 }
 0x1f5   : > { %v1302_v2 = vmax.f32 %v1180_v62, 0.0  ;;  %v4514_v3 = vadd.f32 %v4441_v49, %v1524_v63 }
 0x1f6   : > { %v842_v4 = vpop.f32.mrf.mxu0 }
 0x1f7   : > { %v1353_v6 = vpack.c.bf16 %v1302_v2, %v1301_v0  ;;  %v6145_v7 = vmax.f32 %v4514_v3, 0.0  ;;  %v843_v8 = vadd.f32 %v4293_v18, %v842_v4 }
 0x1f9   : > { %v938_v11 = vmax.f32 %v843_v8, 0.0  ;;  %3764 = vmatmul.msk.bf16.gmra.mxu2 %vm1401_vm3, %v1353_v6  ;;  %v1734_v12 = vpack.c.bf16 %v6145_v7, %v6146_v5 }
 0x1fa   : > { %v1182_v13 = vpop.f32.mrf.mxu1 }
 0x1fb   : > { %v980_v14 = vpack.c.bf16 %v938_v11, %v937_v9  ;;  %3803 = vmatmul.msk.bf16.gmra.mxu3 %vm1799_vm4, %v1734_v12  ;;  %v1183_v22 = vadd.f32 %v4350_v30, %v1182_v13 }
 0x1fc   : > { %v1527_v15 = vpop.f32.mrf.mxu2 }
 0x1fd   : > { %3729 = vmatmul.msk.bf16.gmra.mxu1 %vm1011_vm2, %v980_v14  ;;  %v4530_v24 = vadd.f32 %v4441_v49, %v1527_v15  ;;  %v1303_v27 = vmax.f32 %v1183_v22, 0.0 }
 0x1fe   : > { %v845_v21 = vpop.f32.mrf.mxu0 }
 0x1ff   : > { %v846_v28 = vadd.f32 %v4293_v18, %v845_v21  ;;  %v6144_v33 = vmax.f32 %v4530_v24, 0.0 }
 0x201   : > { %3698 = vmatmul.msk.bf16.gmra.mxu0 %vm625_vm1, %v3868_v17  ;;  %v939_v38 = vmax.f32 %v846_v28, 0.0 }
 0x202   : > { %v1184_v23 = vpop.f32.mrf.mxu1 }
 0x203   : > { %v1185_v25 = vadd.f32 %v4350_v30, %v1184_v23 }
 0x204   : > { %v1529_v26 = vpop.f32.mrf.mxu2 }
 0x205   : > { %v1304_v29 = vmax.f32 %v1185_v25, 0.0  ;;  %v4535_v31 = vadd.f32 %v4441_v49, %v1529_v26 }
 0x206   : > { %v847_v32 = vpop.f32.mrf.mxu0 }
 0x207   : > { %v1354_v35 = vpack.c.bf16 %v1304_v29, %v1303_v27  ;;  %v6140_v36 = vmax.f32 %v4535_v31, 0.0  ;;  %v848_v37 = vadd.f32 %v4293_v18, %v847_v32 }
 0x209   : > { %v940_v39 = vmax.f32 %v848_v37, 0.0  ;;  %3765 = vmatmul.msk.bf16.gmra.mxu2 %vm1401_vm3, %v1354_v35  ;;  %v1735_v41 = vpack.c.bf16 %v6140_v36, %v6144_v33 }
 0x20a   : > { %v1187_v44 = vpop.f32.mrf.mxu1 }
 0x20b   : > { %v981_v45 = vpack.c.bf16 %v940_v39, %v939_v38  ;;  %3804 = vmatmul.msk.bf16.gmra.mxu3 %vm1799_vm4, %v1735_v41  ;;  %v1188_v50 = vadd.f32 %v4350_v30, %v1187_v44 }
 0x20c   : > { %v1532_v46 = vpop.f32.mrf.mxu2 }
 0x20d   : > { %3730 = vmatmul.msk.bf16.gmra.mxu1 %vm1011_vm2, %v981_v45  ;;  %v4551_v53 = vadd.f32 %v4441_v49, %v1532_v46  ;;  %v1305_v56 = vmax.f32 %v1188_v50, 0.0 }
 0x20e   : > { %v850_v48 = vpop.f32.mrf.mxu0 }
 0x20f   : > { %v851_v57 = vadd.f32 %v4293_v18, %v850_v48  ;;  %v6141_v1 = vmax.f32 %v4551_v53, 0.0 }
 0x211   : > { %3699 = vmatmul.msk.bf16.gmra.mxu0 %vm625_vm1, %v3869_v47  ;;  %v941_v8 = vmax.f32 %v851_v57, 0.0 }
 0x212   : > { %v1189_v51 = vpop.f32.mrf.mxu1 }
 0x213   : > { %v1190_v54 = vadd.f32 %v4350_v30, %v1189_v51 }
 0x214   : > { %v1534_v55 = vpop.f32.mrf.mxu2 }
 0x215   : > { %v1306_v62 = vmax.f32 %v1190_v54, 0.0  ;;  %v4556_v63 = vadd.f32 %v4441_v49, %v1534_v55 }
 0x216   : > { %v852_v0 = vpop.f32.mrf.mxu0 }
 0x217   : > { %v1355_v2 = vpack.c.bf16 %v1306_v62, %v1305_v56  ;;  %v6139_v4 = vmax.f32 %v4556_v63, 0.0  ;;  %v853_v6 = vadd.f32 %v4293_v18, %v852_v0 }
 0x219   : > { %v942_v9 = vmax.f32 %v853_v6, 0.0  ;;  %3766 = vmatmul.msk.bf16.gmra.mxu2 %vm1401_vm3, %v1355_v2  ;;  %v1736_v11 = vpack.c.bf16 %v6139_v4, %v6141_v1 }
 0x21a   : > { %v1192_v12 = vpop.f32.mrf.mxu1 }
 0x21b   : > { %v982_v13 = vpack.c.bf16 %v942_v9, %v941_v8  ;;  %3805 = vmatmul.msk.bf16.gmra.mxu3 %vm1799_vm4, %v1736_v11  ;;  %v1193_v17 = vadd.f32 %v4350_v30, %v1192_v12 }
 0x21c   : > { %v1537_v14 = vpop.f32.mrf.mxu2 }
 0x21d   : > { %3731 = vmatmul.msk.bf16.gmra.mxu1 %vm1011_vm2, %v982_v13  ;;  %v4570_v22 = vadd.f32 %v4441_v49, %v1537_v14  ;;  %v1307_v26 = vmax.f32 %v1193_v17, 0.0 }
 0x21e   : > { %v855_v15 = vpop.f32.mrf.mxu0 }
 0x21f   : > { %v856_v27 = vadd.f32 %v4293_v18, %v855_v15  ;;  %v6137_v35 = vmax.f32 %v4570_v22, 0.0 }
 0x221   : > { %v943_v41 = vmax.f32 %v856_v27, 0.0 }
 0x222   : > { %v1194_v21 = vpop.f32.mrf.mxu1 }
 0x223   : > { %v1195_v23 = vadd.f32 %v4350_v30, %v1194_v21 }
 0x224   : > { %v1539_v25 = vpop.f32.mrf.mxu2 }
 0x225   : > { %v1308_v28 = vmax.f32 %v1195_v23, 0.0  ;;  %v4575_v29 = vadd.f32 %v4441_v49, %v1539_v25 }
 0x226   : > { %v857_v32 = vpop.f32.mrf.mxu0 }
 0x227   : > { %v1356_v37 = vpack.c.bf16 %v1308_v28, %v1307_v26  ;;  %v6138_v38 = vmax.f32 %v4575_v29, 0.0  ;;  %v858_v39 = vadd.f32 %v4293_v18, %v857_v32 }
 0x229   : > { %v944_v44 = vmax.f32 %v858_v39, 0.0  ;;  %3767 = vmatmul.msk.bf16.gmra.mxu2 %vm1401_vm3, %v1356_v37  ;;  %v1737_v45 = vpack.c.bf16 %v6138_v38, %v6137_v35 }
 0x22a   : > { %v1197_v46 = vpop.f32.mrf.mxu1 }
 0x22b   : > { %v983_v47 = vpack.c.bf16 %v944_v44, %v943_v41  ;;  %3806 = vmatmul.msk.bf16.gmra.mxu3 %vm1799_vm4, %v1737_v45  ;;  %v1198_v51 = vadd.f32 %v4350_v30, %v1197_v46 }
 0x22c   : > { %v1542_v48 = vpop.f32.mrf.mxu2 }
 0x22d   : > { %3732 = vmatmul.msk.bf16.gmra.mxu1 %vm1011_vm2, %v983_v47  ;;  %v4589_v55 = vadd.f32 %v4441_v49, %v1542_v48  ;;  %v1309_v62 = vmax.f32 %v1198_v51, 0.0 }
 0x22e   : > { %v860_v50 = vpop.f32.mrf.mxu0 }
 0x22f   : > { %v861_v0 = vadd.f32 %v4293_v18, %v860_v50  ;;  %v6136_v9 = vmax.f32 %v4589_v55, 0.0 }
 0x231   : > { %v945_v14 = vmax.f32 %v861_v0, 0.0 }
 0x232   : > { %v1199_v54 = vpop.f32.mrf.mxu1 }
 0x233   : > { %v1200_v56 = vadd.f32 %v4350_v30, %v1199_v54 }
 0x234   : > { %v1544_v57 = vpop.f32.mrf.mxu2 }
 0x235   : > { %v1310_v2 = vmax.f32 %v1200_v56, 0.0  ;;  %v4594_v6 = vadd.f32 %v4441_v49, %v1544_v57 }
 0x236   : > { %v862_v8 = vpop.f32.mrf.mxu0 }
 0x237   : > { %v1357_v11 = vpack.c.bf16 %v1310_v2, %v1309_v62  ;;  %v6135_v12 = vmax.f32 %v4594_v6, 0.0  ;;  %v863_v13 = vadd.f32 %v4293_v18, %v862_v8 }
 0x239   : > { %v946_v15 = vmax.f32 %v863_v13, 0.0  ;;  %3768 = vmatmul.msk.bf16.gmra.mxu2 %vm1401_vm3, %v1357_v11  ;;  %v1738_v17 = vpack.c.bf16 %v6135_v12, %v6136_v9 }
 0x23a   : > { %v1202_v21 = vpop.f32.mrf.mxu1 }
 0x23b   : > { %v984_v23 = vpack.c.bf16 %v946_v15, %v945_v14  ;;  %3807 = vmatmul.msk.bf16.gmra.mxu3 %vm1799_vm4, %v1738_v17  ;;  %v1203_v27 = vadd.f32 %v4350_v30, %v1202_v21 }
 0x23c   : > { %v1547_v25 = vpop.f32.mrf.mxu2 }
 0x23d   : > { %3733 = vmatmul.msk.bf16.gmra.mxu1 %vm1011_vm2, %v984_v23  ;;  %v4608_v32 = vadd.f32 %v4441_v49, %v1547_v25  ;;  %v1311_v41 = vmax.f32 %v1203_v27, 0.0 }
 0x23e   : > { %v865_v26 = vpop.f32.mrf.mxu0 }
 0x23f   : > { %v866_v44 = vadd.f32 %v4293_v18, %v865_v26  ;;  %v6131_v48 = vmax.f32 %v4608_v32, 0.0 }
 0x241   : > { %v947_v56 = vmax.f32 %v866_v44, 0.0 }
 0x242   : > { %v1204_v28 = vpop.f32.mrf.mxu1 }
 0x243   : > { %v1205_v37 = vadd.f32 %v4350_v30, %v1204_v28 }
 0x244   : > { %v1549_v39 = vpop.f32.mrf.mxu2 }
 0x245   : > { %v1312_v45 = vmax.f32 %v1205_v37, 0.0  ;;  %v4613_v46 = vadd.f32 %v4441_v49, %v1549_v39 }
 0x246   : > { %v867_v47 = vpop.f32.mrf.mxu0 }
 0x247   : > { %v1358_v50 = vpack.c.bf16 %v1312_v45, %v1311_v41  ;;  %v6134_v51 = vmax.f32 %v4613_v46, 0.0  ;;  %v868_v54 = vadd.f32 %v4293_v18, %v867_v47  ;;  %v4641_v47 = vld [vmem:[%s6118_s2] ss:$0 sm:$0xff] }
 0x249   : > { %v948_v57 = vmax.f32 %v868_v54, 0.0  ;;  %3769 = vmatmul.msk.bf16.gmra.mxu2 %vm1401_vm3, %v1358_v50  ;;  %v1739_v62 = vpack.c.bf16 %v6134_v51, %v6131_v48 }
 0x24a   : > { %v1207_v0 = vpop.f32.mrf.mxu1 }
 0x24b   : > { %v985_v2 = vpack.c.bf16 %v948_v57, %v947_v56  ;;  %3808 = vmatmul.msk.bf16.gmra.mxu3 %vm1799_vm4, %v1739_v62  ;;  %v1208_v14 = vadd.f32 %v4350_v30, %v1207_v0 }
 0x24c   : > { %v1552_v8 = vpop.f32.mrf.mxu2 }
 0x24d   : > { %3734 = vmatmul.msk.bf16.gmra.mxu1 %vm1011_vm2, %v985_v2  ;;  %v4629_v17 = vadd.f32 %v4441_v49, %v1552_v8  ;;  %v1313_v25 = vmax.f32 %v1208_v14, 0.0 }
 0x24e   : > { %v870_v11 = vpop.f32.mrf.mxu0  ;;  %v4625_v13 = vpop.f32.mrf.mxu3 }
 0x24f   : > { %v871_v26 = vadd.f32 %v4293_v18, %v870_v11  ;;  %v6130_v41 = vmax.f32 %v4629_v17, 0.0 }
 0x251   : > { %v949_v54 = vmax.f32 %v871_v26, 0.0 }
 0x252   : > { %v1209_v15 = vpop.f32.mrf.mxu1 }
 0x253   : > { %v1210_v21 = vadd.f32 %v4350_v30, %v1209_v15 }
 0x254   : > { %v1554_v23 = vpop.f32.mrf.mxu2 }
 0x255   : > { %v1314_v27 = vmax.f32 %v1210_v21, 0.0  ;;  %v4634_v28 = vadd.f32 %v4441_v49, %v1554_v23 }
 0x256   : > { %v872_v37 = vpop.f32.mrf.mxu0  ;;  %v1907_v39 = vpop.f32.mrf.mxu3 }
 0x257   : > { %v1359_v44 = vpack.c.bf16 %v1314_v27, %v1313_v25  ;;  %v6128_v45 = vmax.f32 %v4634_v28, 0.0  ;;  %v873_v50 = vadd.f32 %v4641_v47, %v872_v37 }
 0x259   : > { %v950_v18 = vmax.f32 %v873_v50, 0.0  ;;  %3770 = vmatmul.msk.bf16.gmra.mxu2 %vm1401_vm3, %v1359_v44  ;;  %v1740_v56 = vpack.c.bf16 %v6128_v45, %v6130_v41 }
 0x25a   : > { %v1212_v57 = vpop.f32.mrf.mxu1 }
 0x25b   : > { %v986_v62 = vpack.c.bf16 %v950_v18, %v949_v54  ;;  %3809 = vmatmul.msk.bf16.gmra.mxu3 %vm1799_vm4, %v1740_v56  ;;  %v1213_v11 = vadd.f32 %v4350_v30, %v1212_v57 }
 0x25c   : > { %v1557_v0 = vpop.f32.mrf.mxu2 }
 0x25d   : > { %3735 = vmatmul.msk.bf16.gmra.mxu1 %vm1011_vm2, %v986_v62  ;;  %v4653_v15 = vadd.f32 %v4441_v49, %v1557_v0  ;;  %v1315_v25 = vmax.f32 %v1213_v11, 0.0 }
 0x25e   : > { %v875_v2 = vpop.f32.mrf.mxu0  ;;  %v1910_v8 = vpop.f32.mrf.mxu3 }
 0x25f   : > { %v876_v26 = vadd.f32 %v4641_v47, %v875_v2  ;;  %v6129_v54 = vmax.f32 %v4653_v15, 0.0 }
 0x261   : > { %v951_v62 = vmax.f32 %v876_v26, 0.0 }
 0x262   : > { %v1214_v14 = vpop.f32.mrf.mxu1 }
 0x263   : > { %v1215_v21 = vadd.f32 %v4350_v30, %v1214_v14 }
 0x264   : > { %v1559_v23 = vpop.f32.mrf.mxu2 }
 0x265   : > { %v1316_v27 = vmax.f32 %v1215_v21, 0.0  ;;  %v4658_v37 = vadd.f32 %v4441_v49, %v1559_v23 }
 0x266   : > { %v877_v44 = vpop.f32.mrf.mxu0  ;;  %v1912_v50 = vpop.f32.mrf.mxu3 }
 0x267   : > { %v1360_v18 = vpack.c.bf16 %v1316_v27, %v1315_v25  ;;  %v6127_v56 = vmax.f32 %v4658_v37, 0.0  ;;  %v878_v57 = vadd.f32 %v4641_v47, %v877_v44 }
 0x269   : > { %v952_v0 = vmax.f32 %v878_v57, 0.0  ;;  %3771 = vmatmul.msk.bf16.gmra.mxu2 %vm1401_vm3, %v1360_v18  ;;  %v1741_v2 = vpack.c.bf16 %v6127_v56, %v6129_v54  ;;  %v4675_v57 = vld [vmem:[#allocation2] ss:$0 sm:$0xff] }
 0x26a   : > { %v1217_v11 = vpop.f32.mrf.mxu1 }
 0x26b   : > { %v987_v14 = vpack.c.bf16 %v952_v0, %v951_v62  ;;  %3810 = vmatmul.msk.bf16.gmra.mxu3 %vm1799_vm4, %v1741_v2  ;;  %v1218_v27 = vadd.f32 %v4350_v30, %v1217_v11 }
 0x26c   : > { %v1562_v21 = vpop.f32.mrf.mxu2 }
 0x26d   : > { %3736 = vmatmul.msk.bf16.gmra.mxu1 %vm1011_vm2, %v987_v14  ;;  %v4672_v44 = vadd.f32 %v4441_v49, %v1562_v21  ;;  %v1317_v45 = vmax.f32 %v1218_v27, 0.0  ;;  %v4682_v14 = vadd.f32 %v4675_v57, %v1907_v39  ;;  %v4689_v27 = vadd.f32 %v4675_v57, %v4625_v13 }
 0x26e   : > { %v880_v23 = vpop.f32.mrf.mxu0  ;;  %v1915_v25 = vpop.f32.mrf.mxu3  ;;  %v4702_v13 = vadd.f32 %v4675_v57, %v1912_v50 }
 0x26f   : > { %6215 = vst [vmem:[#allocation6_spill] sm:$0xff] %v4672_v44  ;;  %v881_v62 = vadd.f32 %v4641_v47, %v880_v23  ;;  %v6132_v21 = vmax.f32 %v4672_v44, 0.0  ;;  %v4692_v23 = vadd.f32 %v4675_v57, %v1910_v8 }
 0x270   : > { %v2071_v50 = vsel %vm2065_vm5, %v4702_v13, -inf }
 0x272   : > { %v1219_v26 = vpop.f32.mrf.mxu1 }
 0x273   : > { %v1220_v18 = vadd.f32 %v4350_v30, %v1219_v26 }
 0x274   : > { %v1564_v56 = vpop.f32.mrf.mxu2 }
 0x275   : > { %v1318_v0 = vmax.f32 %v1220_v18, 0.0  ;;  %v4679_v2 = vadd.f32 %v4441_v49, %v1564_v56  ;;  %v953_v56 = vmax.f32 %v881_v62, 0.0  ;;  %v4710_v62 = vadd.f32 %v4675_v57, %v1915_v25 }
 0x276   : > { %v882_v11 = vpop.f32.mrf.mxu0  ;;  %v1917_v54 = vpop.f32.mrf.mxu3 }
 0x277   : > { %6216 = vst [vmem:[#allocation7_spill] sm:$0xff] %v4679_v2  ;;  %v1361_v41 = vpack.c.bf16 %v1318_v0, %v1317_v45  ;;  %v6133_v26 = vmax.f32 %v4679_v2, 0.0  ;;  %v883_v48 = vadd.f32 %v4641_v47, %v882_v11  ;;  %v2067_v0 = vsel %vm2065_vm5, %v4682_v14, -inf }
 0x278   : > { %v2073_v12 = vsel %vm2065_vm5, %v4710_v62, -inf }
 0x279   : > { %v954_v18 = vmax.f32 %v883_v48, 0.0  ;;  %3772 = vmatmul.msk.bf16.gmra.mxu2 %vm1401_vm3, %v1361_v41  ;;  %v1742_v39 = vpack.c.bf16 %v6133_v26, %v6132_v21  ;;  %v2066_v48 = vsel %vm2065_vm5, %v4689_v27, -inf  ;;  %v2069_v41 = vsel %vm2065_vm5, %v4692_v23, -inf }
 0x27a   : > { %v1222_v45 = vpop.f32.mrf.mxu1  ;;  %v2068_v21 = vmax.f32 %v2066_v48, %v2067_v0 }
 0x27b   : > { %v988_v11 = vpack.c.bf16 %v954_v18, %v953_v56  ;;  %3811 = vmatmul.msk.bf16.gmra.mxu3 %vm1799_vm4, %v1742_v39  ;;  %v4716_v56 = vadd.f32 %v4675_v57, %v1917_v54  ;;  %v1223_v39 = vadd.f32 %v4350_v30, %v1222_v45 }
 0x27c   : > { %v1567_v8 = vpop.f32.mrf.mxu2  ;;  %v2070_v18 = vmax.f32 %v2068_v21, %v2069_v41 }
 0x27d   : > { %3737 = vmatmul.msk.bf16.gmra.mxu1 %vm1011_vm2, %v988_v11  ;;  %v4725_v0 = vadd.f32 %v4441_v49, %v1567_v8  ;;  %v2075_v48 = vsel %vm2065_vm5, %v4716_v56, -inf  ;;  %v1319_v21 = vmax.f32 %v1223_v39, 0.0 }
 0x27e   : > { %v885_v26 = vpop.f32.mrf.mxu0  ;;  %v1920_v51 = vpop.f32.mrf.mxu3  ;;  %v2072_v9 = vmax.f32 %v2070_v18, %v2071_v50 }
 0x27f   : > { %v4722_v25 = vadd.f32 %v4675_v57, %v1920_v51  ;;  %6217 = vst [vmem:[#allocation8_spill] sm:$0xff] %v4725_v0  ;;  %v886_v45 = vadd.f32 %v4641_v47, %v885_v26  ;;  %v6142_v18 = vmax.f32 %v4725_v0, 0.0 }
 0x280   : > { %v2074_v35 = vmax.f32 %v2072_v9, %v2073_v12 }
 0x281   : > { %v2077_v38 = vsel %vm2065_vm5, %v4722_v25, -inf  ;;  %v955_v39 = vmax.f32 %v886_v45, 0.0 }
 0x282   : > { %v1224_v11 = vpop.f32.mrf.mxu1  ;;  %v2076_v8 = vmax.f32 %v2074_v35, %v2075_v48 }
 0x283   : > { %v1225_v54 = vadd.f32 %v4350_v30, %v1224_v11 }
 0x284   : > { %v1569_v41 = vpop.f32.mrf.mxu2  ;;  %v2078_v26 = vmax.f32 %v2076_v8, %v2077_v38 }
 0x285   : > { %v1320_v51 = vmax.f32 %v1225_v54, 0.0  ;;  %v4734_v50 = vadd.f32 %v4441_v49, %v1569_v41 }
 0x286   : > { %v887_v4 = vpop.f32.mrf.mxu0  ;;  %v1922_v36 = vpop.f32.mrf.mxu3 }
 0x287   : > { %6218 = vst [vmem:[#allocation9_spill] sm:$0xff] %v4734_v50  ;;  %v1362_v1 = vpack.c.bf16 %v1320_v51, %v1319_v21  ;;  %v6143_v30 = vmax.f32 %v4734_v50, 0.0  ;;  %v888_v9 = vadd.f32 %v4641_v47, %v887_v4  ;;  %v4740_v12 = vadd.f32 %v4675_v57, %v1922_v36 }
 0x289   : > { %v1743_v11 = vpack.c.bf16 %v6143_v30, %v6142_v18  ;;  %v956_v35 = vmax.f32 %v888_v9, 0.0  ;;  %v2079_v48 = vsel %vm2065_vm5, %v4740_v12, -inf  ;;  %3773 = vmatmul.msk.bf16.gmra.mxu2 %vm1401_vm3, %v1362_v1  ;;  %v4756_v9 = vld [vmem:[%s6120_s4] ss:$0 sm:$0xff] }
 0x28a   : > { %v2080_v54 = vmax.f32 %v2078_v26, %v2079_v48  ;;  %v1227_v21 = vpop.f32.mrf.mxu1 }
 0x28b   : > { %v989_v41 = vpack.c.bf16 %v956_v35, %v955_v39  ;;  %3812 = vmatmul.msk.bf16.gmra.mxu3 %vm1799_vm4, %v1743_v11  ;;  %v1228_v1 = vadd.f32 %v4756_v9, %v1227_v21 }
 0x28c   : > { %v2081_v36 = vrot.slane %v2080_v54, 4  ;;  %v1572_v4 = vpop.f32.mrf.mxu2 }
 0x28d   : > { %3738 = vmatmul.msk.bf16.gmra.mxu1 %vm1011_vm2, %v989_v41  ;;  %v4760_v11 = vadd.f32 %v4441_v49, %v1572_v4  ;;  %v1321_v41 = vmax.f32 %v1228_v1, 0.0 }
 0x28e   : > { %v2082_v38 = vmax.f32 %v2080_v54, %v2081_v36  ;;  %v890_v45 = vpop.f32.mrf.mxu0  ;;  %v4751_v51 = vpop.f32.mrf.mxu3 }
 0x28f   : > { %6219 = vst [vmem:[#allocation10_spill] sm:$0xff] %v4760_v11  ;;  %v891_v36 = vadd.f32 %v4641_v47, %v890_v45  ;;  %v6151_v21 = vmax.f32 %v4760_v11, 0.0 }
 0x290   : > { %v2083_v8 = vrot.slane %v2082_v38, 2 }
 0x292   : > { %v2084_v26 = vmax.f32 %v2082_v38, %v2083_v8  ;;  %v1229_v39 = vpop.f32.mrf.mxu1 }
 0x293   : > { %v1230_v35 = vadd.f32 %v4756_v9, %v1229_v39 }
 0x294   : > { %v2085_v48 = vrot.slane %v2084_v26, 1  ;;  %v1574_v54 = vpop.f32.mrf.mxu2 }
 0x295   : > { %v1322_v18 = vmax.f32 %v1230_v35, 0.0  ;;  %v4765_v30 = vadd.f32 %v4441_v49, %v1574_v54  ;;  %v957_v35 = vmax.f32 %v891_v36, 0.0 }
 0x296   : > { %v2086_v33 = vmax.f32 %v2084_v26, %v2085_v48  ;;  %v892_v7 = vpop.f32.mrf.mxu0  ;;  %v4767_v5 = vpop.f32.mrf.mxu3 }
 0x297   : > { %6220 = vst [vmem:[#allocation11_spill] sm:$0xff] %v4765_v30  ;;  %v1363_v38 = vpack.c.bf16 %v1322_v18, %v1321_v41  ;;  %v6149_v4 = vmax.f32 %v4765_v30, 0.0  ;;  %v893_v8 = vadd.f32 %v4641_v47, %v892_v7 }
 0x298   : > { %v2234_v39 = vsub.f32 %v4689_v27, %v2086_v33  ;;  %v2235_v1 = vsub.f32 %v4682_v14, %v2086_v33  ;;  %v2236_v45 = vsub.f32 %v4692_v23, %v2086_v33  ;;  %v2237_v18 = vsub.f32 %v4702_v13, %v2086_v33 }
 0x299   : > { %v1744_v26 = vpack.c.bf16 %v6149_v4, %v6151_v21  ;;  %v958_v48 = vmax.f32 %v893_v8, 0.0  ;;  %3774 = vmatmul.msk.bf16.gmra.mxu2 %vm1401_vm3, %v1363_v38  ;;  %v2238_v7 = vsub.f32 %v4710_v62, %v2086_v33  ;;  %v2239_v23 = vsub.f32 %v4716_v56, %v2086_v33 }
 0x29a   : > { %v1232_v54 = vpop.f32.mrf.mxu1  ;;  %v2298_v14 = vmul.f32 1.442695, %v2234_v39  ;;  %v2300_v41 = vmul.f32 1.442695, %v2235_v1  ;;  %v2302_v36 = vmul.f32 1.442695, %v2236_v45  ;;  %v2240_v13 = vsub.f32 %v4722_v25, %v2086_v33 }
 0x29b   : > { %v990_v47 = vpack.c.bf16 %v958_v48, %v957_v35  ;;  %3813 = vmatmul.msk.bf16.gmra.mxu3 %vm1799_vm4, %v1744_v26  ;;  %v2304_v43 = vmul.f32 1.442695, %v2237_v18  ;;  %v2306_v38 = vmul.f32 1.442695, %v2238_v7  ;;  %v2241_v62 = vsub.f32 %v4740_v12, %v2086_v33 }
 0x29c   : > { %v1577_v27 = vpop.f32.mrf.mxu2  ;;  %3928 = vpow2.f32 %v2298_v14  ;;  %v2308_v39 = vmul.f32 1.442695, %v2239_v23  ;;  %v1233_v35 = vadd.f32 %v4756_v9, %v1232_v54  ;;  %v2310_v1 = vmul.f32 1.442695, %v2240_v13 }
 0x29d   : > { %3739 = vmatmul.msk.bf16.gmra.mxu1 %vm1011_vm2, %v990_v47  ;;  %3930 = vpow2.f32 %v2300_v41  ;;  %v4793_v26 = vadd.f32 %v4441_v49, %v1577_v27  ;;  %v2312_v18 = vmul.f32 1.442695, %v2241_v62 }
 0x29e   : > { %v4785_v8 = vpop.f32.mrf.mxu3  ;;  %3932 = vpow2.f32 %v2302_v36  ;;  %v1323_v12 = vmax.f32 %v1233_v35, 0.0 }
 0x29f   : > { %3934 = vpow2.f32 %v2304_v43  ;;  %6221 = vst [vmem:[#allocation12_spill] sm:$0xff] %v4793_v26  ;;  %v6150_v36 = vmax.f32 %v4793_v26, 0.0 }
 0x2a0   : > { %3936 = vpow2.f32 %v2306_v38 }
 0x2a1   : > { %3938 = vpow2.f32 %v2308_v39 }
 0x2a2   : > { %v1234_v56 = vpop.f32.mrf.mxu1  ;;  %v4790_v45 = vpop.eup %3928  ;;  %3940 = vpow2.f32 %v2310_v1 }
 0x2a3   : > { %v1235_v48 = vadd.f32 %v4756_v9, %v1234_v56  ;;  %v4796_v25 = vpop.eup %3930  ;;  %v2426_v43 = vsel %vm2065_vm5, %v4790_v45, 0.0  ;;  %3942 = vpow2.f32 %v2312_v18 }
 0x2a4   : > { %v1579_v7 = vpop.f32.mrf.mxu2  ;;  %v4800_v33 = vpop.eup %3932  ;;  %v2427_v14 = vsel %vm2065_vm5, %v4796_v25, 0.0 }
 0x2a5   : > { %v1324_v54 = vmax.f32 %v1235_v48, 0.0  ;;  %v4803_v47 = vadd.f32 %v4441_v49, %v1579_v7  ;;  %v4807_v27 = vpop.eup %3934  ;;  %v2428_v41 = vadd.f32 %v2427_v14, %v2426_v43  ;;  %v2429_v62 = vsel %vm2065_vm5, %v4800_v33, 0.0 }
 0x2a6   : > { %v1932_v23 = vpop.f32.mrf.mxu3  ;;  %v4813_v39 = vpop.eup %3936  ;;  %v2431_v1 = vsel %vm2065_vm5, %v4807_v27, 0.0 }
 0x2a7   : > { %6222 = vst [vmem:[#allocation13_spill] sm:$0xff] %v4803_v47  ;;  %v1364_v13 = vpack.c.bf16 %v1324_v54, %v1323_v12  ;;  %v6148_v38 = vmax.f32 %v4803_v47, 0.0  ;;  %v2430_v35 = vadd.f32 %v2429_v62, %v2428_v41  ;;  %v4822_v48 = vpop.eup %3938  ;;  %v2433_v18 = vsel %vm2065_vm5, %v4813_v39, 0.0 }
 0x2a8   : > { %v4827_v12 = vpop.eup %3940  ;;  %v2435_v41 = vsel %vm2065_vm5, %v4822_v48, 0.0 }
 0x2a9   : > { %v1745_v56 = vpack.c.bf16 %v6148_v38, %v6150_v36  ;;  %3775 = vmatmul.msk.bf16.gmra.mxu2 %vm1401_vm3, %v1364_v13  ;;  %v2432_v43 = vadd.f32 %v2431_v1, %v2430_v35  ;;  %v4831_v13 = vpop.eup %3942  ;;  %v2437_v4 = vsel %vm2065_vm5, %v4827_v12, 0.0  ;;  %v4142_v35 = vmov 0  }
 0x2aa   : > { %v1237_v7 = vpop.f32.mrf.mxu1  ;;  %3923 = vset.pattern.permute.xlu2 %v4142_v35  ;;  %3922 = vset.pattern.permute.xlu1 %v4142_v35  ;;  %v2439_v1 = vsel %vm2065_vm5, %v4831_v13, 0.0 }
 0x2ab   : > { %3814 = vmatmul.msk.bf16.gmra.mxu3 %vm1799_vm4, %v1745_v56  ;;  %v2434_v14 = vadd.f32 %v2433_v18, %v2432_v43  ;;  %v1238_v36 = vadd.f32 %v4756_v9, %v1237_v7  ;;  %3921 = vset.pattern.permute.xlu0 %v4142_v35  ;;  %v4847_v7 = vadd.f32 %v4675_v57, %v4767_v5 }
 0x2ac   : > { %v1582_v54 = vpop.f32.mrf.mxu2 }
 0x2ad   : > { %v2436_v38 = vadd.f32 %v2435_v41, %v2434_v14  ;;  %v4839_v21 = vadd.f32 %v4441_v49, %v1582_v54  ;;  %v1325_v42 = vmax.f32 %v1238_v36, 0.0  ;;  %v4857_v36 = vadd.f32 %v4675_v57, %v4785_v8 }
 0x2ae   : > { %v1935_v62 = vpop.f32.mrf.mxu3 }
 0x2af   : > { %v2438_v56 = vadd.f32 %v2437_v4, %v2436_v38  ;;  %6223 = vst [vmem:[#allocation14_spill] sm:$0xff] %v4839_v21  ;;  %v6156_v35 = vmax.f32 %v4839_v21, 0.0 }
 0x2b1   : > { %v2440_v18 = vadd.f32 %v2439_v1, %v2438_v56 }
 0x2b2   : > { %v1239_v43 = vpop.f32.mrf.mxu1 }
 0x2b3   : > { %v1240_v14 = vadd.f32 %v4756_v9, %v1239_v43  ;;  %v2441_v20 = vrot.slane %v2440_v18, 4  ;;  %v4853_v43 = vadd.f32 %v4675_v57, %v4751_v51 }
 0x2b4   : > { %v1584_v41 = vpop.f32.mrf.mxu2 }
 0x2b5   : > { %v1326_v61 = vmax.f32 %v1240_v14, 0.0  ;;  %v4843_v19 = vadd.f32 %v4441_v49, %v1584_v41  ;;  %v2442_v38 = vadd.f32 %v2441_v20, %v2440_v18  ;;  %v4867_v18 = vadd.f32 %v4675_v57, %v1932_v23 }
 0x2b6   : > { %v1937_v4 = vpop.f32.mrf.mxu3  ;;  %v2087_v14 = vsel %vm2065_vm5, %v4853_v43, -inf  ;;  %v2090_v41 = vsel %vm2065_vm5, %v4857_v36, -inf }
 0x2b7   : > { %6224 = vst [vmem:[#allocation15_spill] sm:$0xff] %v4843_v19  ;;  %v1365_v56 = vpack.c.bf16 %v1326_v61, %v1325_v42  ;;  %v6157_v54 = vmax.f32 %v4843_v19, 0.0  ;;  %v2443_v1 = vrot.slane %v2442_v38, 2  ;;  %v2088_v42 = vsel %vm2065_vm5, %v4847_v7, -inf }
 0x2b8   : > { %v2092_v23 = vsel %vm2065_vm5, %v4867_v18, -inf }
 0x2b9   : > { %v1746_v20 = vpack.c.bf16 %v6157_v54, %v6156_v35  ;;  %3776 = vmatmul.msk.bf16.gmra.mxu2 %vm1401_vm3, %v1365_v56  ;;  %v2444_v61 = vadd.f32 %v2443_v1, %v2442_v38  ;;  %v4875_v56 = vadd.f32 %v4675_v57, %v1935_v62  ;;  %v2089_v38 = vmax.f32 %v2087_v14, %v2088_v42 }
 0x2ba   : > { %v1242_v5 = vpop.f32.mrf.mxu1  ;;  %v4880_v54 = vadd.f32 %v4675_v57, %v1937_v4 }
 0x2bb   : > { %3815 = vmatmul.msk.bf16.gmra.mxu3 %vm1799_vm4, %v1746_v20  ;;  %v2445_v8 = vrot.slane %v2444_v61, 1  ;;  %v2091_v20 = vmax.f32 %v2089_v38, %v2090_v41  ;;  %v2094_v60 = vsel %vm2065_vm5, %v4875_v56, -inf  ;;  %v1243_v21 = vadd.f32 %v4756_v9, %v1242_v5 }
 0x2bc   : > { %v1587_v51 = vpop.f32.mrf.mxu2 }
 0x2bd   : > { %v2446_v35 = vadd.f32 %v2445_v8, %v2444_v61  ;;  %v2093_v62 = vmax.f32 %v2091_v20, %v2092_v23  ;;  %v4889_v42 = vadd.f32 %v4441_v49, %v1587_v51  ;;  %v2096_v8 = vsel %vm2065_vm5, %v4880_v54, -inf }
 0x2be   : > { %v1940_v1 = vpop.f32.mrf.mxu3  ;;  %v1327_v38 = vmax.f32 %v1243_v21, 0.0 }
 0x2bf   : > { %3944 = vrcp.f32 %v2446_v35  ;;  %v4886_v19 = vadd.f32 %v4675_v57, %v1940_v1  ;;  %6225 = vst [vmem:[#allocation16_spill] sm:$0xff] %v4889_v42  ;;  %v2095_v14 = vmax.f32 %v2093_v62, %v2094_v60  ;;  %v6166_v51 = vmax.f32 %v4889_v42, 0.0 }
 0x2c0   : > { %vm2599_vm7 = vweird.f32 %v2446_v35 }
 0x2c1   : > { %v2098_v47 = vsel %vm2065_vm5, %v4886_v19, -inf  ;;  %v2097_v20 = vmax.f32 %v2095_v14, %v2096_v8 }
 0x2c2   : > { %v1244_v61 = vpop.f32.mrf.mxu1 }
 0x2c3   : > { %v1245_v4 = vadd.f32 %v4756_v9, %v1244_v61  ;;  %v2099_v21 = vmax.f32 %v2097_v20, %v2098_v47 }
 0x2c4   : > { %v1589_v41 = vpop.f32.mrf.mxu2 }
 0x2c5   : > { %v1328_v5 = vmax.f32 %v1245_v4, 0.0  ;;  %v4897_v1 = vadd.f32 %v4441_v49, %v1589_v41  ;;  %v3945_v23 = vpop.eup %3944  ;;  %v2605_v41 = vand.u32 2147483648, %v2446_v35 }
 0x2c6   : > { %v1942_v30 = vpop.f32.mrf.mxu3  ;;  %v2595_v60 = vmul.f32 %v3945_v23, %v2446_v35  ;;  %vm2600_vm6 = vweird.f32 %v3945_v23 }
 0x2c7   : > { %6226 = vst [vmem:[#allocation17_spill] sm:$0xff] %v4897_v1  ;;  %v1366_v26 = vpack.c.bf16 %v1328_v5, %v1327_v38  ;;  %v6165_v0 = vmax.f32 %v4897_v1, 0.0  ;;  %v4902_v61 = vadd.f32 %v4675_v57, %v1942_v30  ;;  %v2603_v38 = vand.u32 2147483647, %v2446_v35  ;;  %vm2601_vm8 = vmor %vm2599_vm7, %vm2600_vm6 }
 0x2c8   : > { %v2596_v8 = vsub.f32 1.0, %v2595_v60  ;;  %v2606_v1 = vor.u32 1.1754944e-38, %v2605_v41 }
 0x2c9   : > { %v1747_v49 = vpack.c.bf16 %v6165_v0, %v6166_v51  ;;  %v2100_v62 = vsel %vm2065_vm5, %v4902_v61, -inf  ;;  %3777 = vmatmul.msk.bf16.gmra.mxu2 %vm1401_vm3, %v1366_v26  ;;  %vm2604_vm9 = vcmp.eq.f32.partialorder %v2603_v38, 8.507059e+37 }
 0x2ca   : > { %v2101_v4 = vmax.f32 %v2099_v21, %v2100_v62  ;;  %v1247_v14 = vpop.f32.mrf.mxu1  ;;  %v2597_v30 = vmul.f32 %v3945_v23, %v2596_v8 }
 0x2cb   : > { %3816 = vmatmul.msk.bf16.gmra.mxu3 %vm1799_vm4, %v1747_v49  ;;  %v1248_v49 = vadd.f32 %v4756_v9, %v1247_v14 }
 0x2cc   : > { %v2102_v47 = vrot.slane %v2101_v4, 4  ;;  %v1592_v5 = vpop.f32.mrf.mxu2  ;;  %v2598_v20 = vadd.f32 %v3945_v23, %v2597_v30  ;;  %v4928_v30 = vld [vmem:[%s6122_s6] ss:$0 sm:$0xff] }
 0x2cd   : > { %v1329_v14 = vmax.f32 %v1248_v49, 0.0 }
 0x2ce   : > { %v2103_v0 = vmax.f32 %v2101_v4, %v2102_v47  ;;  %v4913_v51 = vpop.f32.mrf.mxu3  ;;  %v2602_v26 = vsel %vm2601_vm8, %v3945_v23, %v2598_v20  ;;  %vm3330_vm8 = vcmask 1041409  }
 0x2cf   : > { %v2607_v21 = vsel %vm2604_vm9, %v2606_v1, %v2602_v26  ;;  %v4931_v1 = vadd.f32 %v4928_v30, %v1592_v5 }
 0x2d0   : > { %v2104_v60 = vrot.slane %v2103_v0, 2  ;;  %v2612_v35 = vmul.f32 %v4813_v39, %v2607_v21  ;;  %v2610_v62 = vmul.f32 %v4800_v33, %v2607_v21  ;;  %v2608_v8 = vmul.f32 %v4790_v45, %v2607_v21 }
 0x2d1   : > { %v2613_v41 = vmul.f32 %v4822_v48, %v2607_v21  ;;  %6227 = vst [vmem:[#allocation18_spill] sm:$0xff] %v4931_v1  ;;  %v2609_v48 = vmul.f32 %v4796_v25, %v2607_v21  ;;  %v2615_v5 = vmul.f32 %v4831_v13, %v2607_v21  ;;  %v2614_v26 = vmul.f32 %v4827_v12, %v2607_v21 }
 0x2d2   : > { %v2105_v4 = vmax.f32 %v2103_v0, %v2104_v60  ;;  %v1249_v23 = vpop.f32.mrf.mxu1  ;;  %2792 = vperm.xlu2 %3923, %v2612_v35   ;;  %3350 = vst.msk [vmem:[%s4918_s8 + $0x20] sm:$0xff] %vm2065_vm5, %v2612_v35  ;;  %2782 = vperm.xlu1 %3922, %v2610_v62   ;;  %v2611_v0 = vmul.f32 %v4807_v27, %v2607_v21  ;;  %v6171_v25 = vmax.f32 %v4931_v1, 0.0 }
 0x2d3   : > { %v1250_v45 = vadd.f32 %v4756_v9, %v1249_v23  ;;  %3348 = vst.msk [vmem:[%s4918_s8 + $0x10] sm:$0xff] %vm2065_vm5, %v2610_v62  ;;  %2772 = vperm.xlu0 %3921, %v2608_v8  }
 0x2d4   : > { %v2106_v33 = vrot.slane %v2105_v4, 1  ;;  %v1594_v39 = vpop.f32.mrf.mxu2  ;;  %3346 = vst.msk [vmem:[%s4918_s8] sm:$0xff] %vm2065_vm5, %v2608_v8 }
 0x2d5   : > { %v1330_v38 = vmax.f32 %v1250_v45, 0.0  ;;  %v4943_v47 = vadd.f32 %v4928_v30, %v1594_v39  ;;  %3351 = vst.msk [vmem:[%s4918_s8 + $0x28] sm:$0xff] %vm2065_vm5, %v2613_v41 }
 0x2d6   : > { %v2107_v27 = vmax.f32 %v2105_v4, %v2106_v33  ;;  %v4946_v20 = vpop.f32.mrf.mxu3  ;;  %3349 = vst.msk [vmem:[%s4918_s8 + $0x18] sm:$0xff] %vm2065_vm5, %v2611_v0 }
 0x2d7   : > { %6228 = vst [vmem:[#allocation19_spill] sm:$0xff] %v4943_v47  ;;  %v1367_v60 = vpack.c.bf16 %v1330_v38, %v1329_v14  ;;  %v6170_v49 = vmax.f32 %v4943_v47, 0.0 }
 0x2d8   : > { %3347 = vst.msk [vmem:[%s4918_s8 + $0x8] sm:$0xff] %vm2065_vm5, %v2609_v48  ;;  %v2242_v35 = vsub.f32 %v4853_v43, %v2107_v27  ;;  %v2243_v13 = vsub.f32 %v4847_v7, %v2107_v27  ;;  %v2244_v62 = vsub.f32 %v4857_v36, %v2107_v27  ;;  %v2245_v21 = vsub.f32 %v4867_v18, %v2107_v27 }
 0x2d9   : > { %v1748_v12 = vpack.c.bf16 %v6170_v49, %v6171_v25  ;;  %3778 = vmatmul.msk.bf16.gmra.mxu2 %vm1401_vm3, %v1367_v60  ;;  %3353 = vst.msk [vmem:[%s4918_s8 + $0x38] sm:$0xff] %vm2065_vm5, %v2615_v5  ;;  %v2246_v43 = vsub.f32 %v4875_v56, %v2107_v27  ;;  %v2247_v45 = vsub.f32 %v4880_v54, %v2107_v27 }
 0x2da   : > { %v1252_v8 = vpop.f32.mrf.mxu1  ;;  %3352 = vst.msk [vmem:[%s4918_s8 + $0x30] sm:$0xff] %vm2065_vm5, %v2614_v26  ;;  %2797 = vperm.xlu2 %3923, %v2613_v41   ;;  %2787 = vperm.xlu1 %3922, %v2611_v0   ;;  %v2314_v7 = vmul.f32 1.442695, %v2242_v35  ;;  %v2316_v36 = vmul.f32 1.442695, %v2243_v13  ;;  %v2248_v18 = vsub.f32 %v4886_v19, %v2107_v27  ;;  %v2249_v56 = vsub.f32 %v4902_v61, %v2107_v27 }
 0x2db   : > { %v2318_v4 = vmul.f32 1.442695, %v2244_v62  ;;  %2777 = vperm.xlu0 %3921, %v2609_v48   ;;  %3817 = vmatmul.msk.bf16.gmra.mxu3 %vm1799_vm4, %v1748_v12  ;;  %v2320_v33 = vmul.f32 1.442695, %v2245_v21  ;;  %v2322_v14 = vmul.f32 1.442695, %v2246_v43  ;;  %v1253_v0 = vadd.f32 %v4756_v9, %v1252_v8 }
 0x2dc   : > { %v1597_v23 = vpop.f32.mrf.mxu2  ;;  %3946 = vpow2.f32 %v2314_v7  ;;  %v2324_v41 = vmul.f32 1.442695, %v2247_v45  ;;  %v2326_v38 = vmul.f32 1.442695, %v2248_v18  ;;  %v2328_v13 = vmul.f32 1.442695, %v2249_v56 }
 0x2dd   : > { %3948 = vpow2.f32 %v2316_v36  ;;  %v4981_v54 = vadd.f32 %v4928_v30, %v1597_v23  ;;  %v1331_v12 = vmax.f32 %v1253_v0, 0.0  ;;  %v5035_v25 = vadd.f32 %v4675_v57, %v4946_v20 }
 0x2de   : > { %v4973_v39 = vpop.f32.mrf.mxu3  ;;  %3950 = vpow2.f32 %v2318_v4 }
 0x2df   : > { %3952 = vpow2.f32 %v2320_v33  ;;  %6229 = vst [vmem:[#allocation20_spill] sm:$0xff] %v4981_v54  ;;  %v6168_v36 = vmax.f32 %v4981_v54, 0.0 }
 0x2e0   : > { %3954 = vpow2.f32 %v2322_v14 }
 0x2e1   : > { %3956 = vpow2.f32 %v2324_v41 }
 0x2e2   : > { %v1254_v48 = vpop.f32.mrf.mxu1  ;;  %v4978_v60 = vpop.eup %3946  ;;  %2807 = vperm.xlu1 %3922, %v2615_v5   ;;  %3958 = vpow2.f32 %v2326_v38 }
 0x2e3   : > { %v1255_v19 = vadd.f32 %v4756_v9, %v1254_v48  ;;  %v4984_v35 = vpop.eup %3948  ;;  %2802 = vperm.xlu0 %3921, %v2614_v26   ;;  %v2447_v27 = vsel %vm2065_vm5, %v4978_v60, 0.0  ;;  %3960 = vpow2.f32 %v2328_v13 }
 0x2e4   : > { %v1599_v61 = vpop.f32.mrf.mxu2  ;;  %v4988_v62 = vpop.eup %3950  ;;  %v2448_v5 = vsel %vm2065_vm5, %v4984_v35, 0.0 }
 0x2e5   : > { %v1332_v21 = vmax.f32 %v1255_v19, 0.0  ;;  %v4991_v8 = vadd.f32 %v4928_v30, %v1599_v61  ;;  %v4995_v43 = vpop.eup %3952  ;;  %v2449_v26 = vadd.f32 %v2448_v5, %v2447_v27  ;;  %v2450_v45 = vsel %vm2065_vm5, %v4988_v62, 0.0 }
 0x2e6   : > { %v1952_v7 = vpop.f32.mrf.mxu3  ;;  %v5001_v33 = vpop.eup %3954  ;;  %v2452_v56 = vsel %vm2065_vm5, %v4995_v43, 0.0 }
 0x2e7   : > { %6230 = vst [vmem:[#allocation21_spill] sm:$0xff] %v4991_v8  ;;  %v1368_v4 = vpack.c.bf16 %v1332_v21, %v1331_v12  ;;  %v6169_v23 = vmax.f32 %v4991_v8, 0.0  ;;  %v2451_v18 = vadd.f32 %v2450_v45, %v2449_v26  ;;  %v5010_v41 = vpop.eup %3956  ;;  %v2454_v38 = vsel %vm2065_vm5, %v5001_v33, 0.0 }
 0x2e8   : > { %v5014_v19 = vpop.eup %3958  ;;  %v2456_v27 = vsel %vm2065_vm5, %v5010_v41, 0.0 }
 0x2e9   : > { %v1749_v14 = vpack.c.bf16 %v6169_v23, %v6168_v36  ;;  %3779 = vmatmul.msk.bf16.gmra.mxu2 %vm1401_vm3, %v1368_v4  ;;  %v2453_v48 = vadd.f32 %v2452_v56, %v2451_v18  ;;  %v5019_v12 = vpop.eup %3960  ;;  %v2458_v26 = vsel %vm2065_vm5, %v5014_v19, 0.0 }
 0x2ea   : > { %v1257_v0 = vpop.f32.mrf.mxu1  ;;  %v2460_v45 = vsel %vm2065_vm5, %v5019_v12, 0.0 }
 0x2eb   : > { %3818 = vmatmul.msk.bf16.gmra.mxu3 %vm1799_vm4, %v1749_v14  ;;  %v2455_v61 = vadd.f32 %v2454_v38, %v2453_v48  ;;  %v1258_v18 = vadd.f32 %v4756_v9, %v1257_v0 }
 0x2ec   : > { %v1602_v13 = vpop.f32.mrf.mxu2 }
 0x2ed   : > { %v2457_v5 = vadd.f32 %v2456_v27, %v2455_v61  ;;  %v5027_v48 = vadd.f32 %v4928_v30, %v1602_v13  ;;  %v1333_v49 = vmax.f32 %v1258_v18, 0.0  ;;  %v2109_v18 = vsel %vm2065_vm5, %v5035_v25, -inf }
 0x2ee   : > { %v1955_v21 = vpop.f32.mrf.mxu3 }
 0x2ef   : > { %v2459_v4 = vadd.f32 %v2458_v26, %v2457_v5  ;;  %6231 = vst [vmem:[#allocation22_spill] sm:$0xff] %v5027_v48  ;;  %v6173_v0 = vmax.f32 %v5027_v48, 0.0 }
 0x2f1   : > { %v2461_v14 = vadd.f32 %v2460_v45, %v2459_v4 }
 0x2f2   : > { %v1259_v56 = vpop.f32.mrf.mxu1 }
 0x2f3   : > { %v1260_v38 = vadd.f32 %v4756_v9, %v1259_v56  ;;  %v2462_v23 = vrot.slane %v2461_v14, 4  ;;  %v5041_v56 = vadd.f32 %v4675_v57, %v4913_v51 }
 0x2f4   : > { %v1604_v36 = vpop.f32.mrf.mxu2 }
 0x2f5   : > { %v1334_v61 = vmax.f32 %v1260_v38, 0.0  ;;  %v5031_v27 = vadd.f32 %v4928_v30, %v1604_v36  ;;  %v2463_v26 = vadd.f32 %v2462_v23, %v2461_v14  ;;  %v5045_v36 = vadd.f32 %v4675_v57, %v4973_v39 }
 0x2f6   : > { %v1957_v5 = vpop.f32.mrf.mxu3  ;;  %v5055_v14 = vadd.f32 %v4675_v57, %v1952_v7  ;;  %v2108_v38 = vsel %vm2065_vm5, %v5041_v56, -inf }
 0x2f7   : > { %6232 = vst [vmem:[#allocation23_spill] sm:$0xff] %v5031_v27  ;;  %v1369_v4 = vpack.c.bf16 %v1334_v61, %v1333_v49  ;;  %v6172_v13 = vmax.f32 %v5031_v27, 0.0  ;;  %v2464_v45 = vrot.slane %v2463_v26, 2  ;;  %v2111_v61 = vsel %vm2065_vm5, %v5045_v36, -inf }
 0x2f8   : > { %v2113_v7 = vsel %vm2065_vm5, %v5055_v14, -inf }
 0x2f9   : > { %v1750_v20 = vpack.c.bf16 %v6172_v13, %v6173_v0  ;;  %3780 = vmatmul.msk.bf16.gmra.mxu2 %vm1401_vm3, %v1369_v4  ;;  %v2465_v49 = vadd.f32 %v2464_v45, %v2463_v26  ;;  %v5063_v4 = vadd.f32 %v4675_v57, %v1955_v21  ;;  %v2110_v26 = vmax.f32 %v2108_v38, %v2109_v18 }
 0x2fa   : > { %v1262_v23 = vpop.f32.mrf.mxu1  ;;  %v5068_v0 = vadd.f32 %v4675_v57, %v1957_v5 }
 0x2fb   : > { %3819 = vmatmul.msk.bf16.gmra.mxu3 %vm1799_vm4, %v1750_v20  ;;  %v2466_v39 = vrot.slane %v2465_v49, 1  ;;  %v2112_v20 = vmax.f32 %v2110_v26, %v2111_v61  ;;  %v2115_v27 = vsel %vm2065_vm5, %v5063_v4, -inf  ;;  %v1263_v48 = vadd.f32 %v4756_v9, %v1262_v23 }
 0x2fc   : > { %v1607_v51 = vpop.f32.mrf.mxu2 }
 0x2fd   : > { %v2467_v13 = vadd.f32 %v2466_v39, %v2465_v49  ;;  %v2114_v21 = vmax.f32 %v2112_v20, %v2113_v7  ;;  %v5077_v18 = vadd.f32 %v4928_v30, %v1607_v51  ;;  %v2117_v39 = vsel %vm2065_vm5, %v5068_v0, -inf }
 0x2fe   : > { %v1960_v45 = vpop.f32.mrf.mxu3  ;;  %v1335_v26 = vmax.f32 %v1263_v48, 0.0 }
 0x2ff   : > { %3962 = vrcp.f32 %v2467_v13  ;;  %v5074_v54 = vadd.f32 %v4675_v57, %v1960_v45  ;;  %6233 = vst [vmem:[#allocation24_spill] sm:$0xff] %v5077_v18  ;;  %v2116_v38 = vmax.f32 %v2114_v21, %v2115_v27  ;;  %v6183_v51 = vmax.f32 %v5077_v18, 0.0 }
 0x300   : > { %vm2621_vm11 = vweird.f32 %v2467_v13 }
 0x301   : > { %v2119_v8 = vsel %vm2065_vm5, %v5074_v54, -inf  ;;  %v2118_v20 = vmax.f32 %v2116_v38, %v2117_v39 }
 0x302   : > { %v1264_v49 = vpop.f32.mrf.mxu1 }
 0x303   : > { %v1265_v5 = vadd.f32 %v4756_v9, %v1264_v49  ;;  %v2120_v48 = vmax.f32 %v2118_v20, %v2119_v8 }
 0x304   : > { %v1609_v61 = vpop.f32.mrf.mxu2 }
 0x305   : > { %v1336_v23 = vmax.f32 %v1265_v5, 0.0  ;;  %v5085_v45 = vadd.f32 %v4928_v30, %v1609_v61  ;;  %v3963_v7 = vpop.eup %3962 }
 0x306   : > { %v1962_v47 = vpop.f32.mrf.mxu3  ;;  %v2617_v27 = vmul.f32 %v3963_v7, %v2467_v13  ;;  %vm2622_vm10 = vweird.f32 %v3963_v7 }
 0x307   : > { %6234 = vst [vmem:[#allocation25_spill] sm:$0xff] %v5085_v45  ;;  %v1370_v1 = vpack.c.bf16 %v1336_v23, %v1335_v26  ;;  %v6182_v42 = vmax.f32 %v5085_v45, 0.0  ;;  %v5090_v49 = vadd.f32 %v4675_v57, %v1962_v47  ;;  %v2627_v26 = vand.u32 2147483648, %v2467_v13  ;;  %vm2623_vm12 = vmor %vm2621_vm11, %vm2622_vm10 }
 0x308   : > { %v2618_v39 = vsub.f32 1.0, %v2617_v27  ;;  %v2625_v57 = vand.u32 2147483647, %v2467_v13 }
 0x309   : > { %v1751_v21 = vpack.c.bf16 %v6182_v42, %v6183_v51  ;;  %v2121_v5 = vsel %vm2065_vm5, %v5090_v49, -inf  ;;  %3781 = vmatmul.msk.bf16.gmra.mxu2 %vm1401_vm3, %v1370_v1  ;;  %v2628_v51 = vor.u32 1.1754944e-38, %v2627_v26 }
 0x30a   : > { %v2122_v38 = vmax.f32 %v2120_v48, %v2121_v5  ;;  %v1267_v61 = vpop.f32.mrf.mxu1  ;;  %v2619_v23 = vmul.f32 %v3963_v7, %v2618_v39  ;;  %vm2626_vm13 = vcmp.eq.f32.partialorder %v2625_v57, 8.507059e+37 }
 0x30b   : > { %3820 = vmatmul.msk.bf16.gmra.mxu3 %vm1799_vm4, %v1751_v21  ;;  %v1268_v5 = vadd.f32 %v4756_v9, %v1267_v61 }
 0x30c   : > { %v2123_v47 = vrot.slane %v2122_v38, 4  ;;  %v1612_v8 = vpop.f32.mrf.mxu2  ;;  %v2620_v20 = vadd.f32 %v3963_v7, %v2619_v23 }
 0x30d   : > { %v5108_v26 = vadd.f32 %v4928_v30, %v1612_v8 }
 0x30e   : > { %v2124_v45 = vmax.f32 %v2122_v38, %v2123_v47  ;;  %v5100_v42 = vpop.f32.mrf.mxu3  ;;  %v2624_v1 = vsel %vm2623_vm12, %v3963_v7, %v2620_v20 }
 0x30f   : > { %v2629_v48 = vsel %vm2626_vm13, %v2628_v51, %v2624_v1  ;;  %6235 = vst [vmem:[#allocation26_spill] sm:$0xff] %v5108_v26  ;;  %vm3332_vm13 = vcmask 1042434  }
 0x310   : > { %v2125_v27 = vrot.slane %v2124_v45, 2  ;;  %v2630_v39 = vmul.f32 %v4978_v60, %v2629_v48  ;;  %v2632_v21 = vmul.f32 %v4988_v62, %v2629_v48  ;;  %v2631_v23 = vmul.f32 %v4984_v35, %v2629_v48 }
 0x311   : > { %v2633_v47 = vmul.f32 %v4995_v43, %v2629_v48  ;;  %v2635_v60 = vmul.f32 %v5010_v41, %v2629_v48  ;;  %v2634_v43 = vmul.f32 %v5001_v33, %v2629_v48  ;;  %v2636_v57 = vmul.f32 %v5014_v19, %v2629_v48 }
 0x312   : > { %v2126_v13 = vmax.f32 %v2124_v45, %v2125_v27  ;;  %v1269_v38 = vpop.f32.mrf.mxu1  ;;  %3354 = vst.msk [vmem:[%s4918_s8 + $0x40] sm:$0xff] %vm2065_vm5, %v2630_v39  ;;  %2812 = vperm.xlu2 %3923, %v2630_v39   ;;  %2822 = vperm.xlu1 %3922, %v2632_v21   ;;  %v1337_v45 = vmax.f32 %v1268_v5, 0.0  ;;  %v2637_v20 = vmul.f32 %v5019_v12, %v2629_v48  ;;  %v6189_v33 = vmax.f32 %v5108_v26, 0.0 }
 0x313   : > { %v1270_v7 = vadd.f32 %v4756_v9, %v1269_v38  ;;  %3356 = vst.msk [vmem:[%s4918_s8 + $0x50] sm:$0xff] %vm2065_vm5, %v2632_v21  ;;  %2817 = vperm.xlu0 %3921, %v2631_v23  }
 0x314   : > { %v2127_v62 = vrot.slane %v2126_v13, 1  ;;  %v1614_v35 = vpop.f32.mrf.mxu2  ;;  %3355 = vst.msk [vmem:[%s4918_s8 + $0x48] sm:$0xff] %vm2065_vm5, %v2631_v23 }
 0x315   : > { %v1338_v51 = vmax.f32 %v1270_v7, 0.0  ;;  %v5120_v61 = vadd.f32 %v4928_v30, %v1614_v35  ;;  %3357 = vst.msk [vmem:[%s4918_s8 + $0x58] sm:$0xff] %vm2065_vm5, %v2633_v47 }
 0x316   : > { %v2128_v41 = vmax.f32 %v2126_v13, %v2127_v62  ;;  %v5123_v8 = vpop.f32.mrf.mxu3  ;;  %3359 = vst.msk [vmem:[%s4918_s8 + $0x68] sm:$0xff] %vm2065_vm5, %v2635_v60 }
 0x317   : > { %6236 = vst [vmem:[#allocation27_spill] sm:$0xff] %v5120_v61  ;;  %v1371_v1 = vpack.c.bf16 %v1338_v51, %v1337_v45  ;;  %v6188_v27 = vmax.f32 %v5120_v61, 0.0 }
 0x318   : > { %3358 = vst.msk [vmem:[%s4918_s8 + $0x60] sm:$0xff] %vm2065_vm5, %v2634_v43  ;;  %v2250_v5 = vsub.f32 %v5041_v56, %v2128_v41  ;;  %v2251_v19 = vsub.f32 %v5035_v25, %v2128_v41  ;;  %v2252_v39 = vsub.f32 %v5045_v36, %v2128_v41  ;;  %v2253_v48 = vsub.f32 %v5055_v14, %v2128_v41 }
 0x319   : > { %v1752_v12 = vpack.c.bf16 %v6188_v27, %v6189_v33  ;;  %3782 = vmatmul.msk.bf16.gmra.mxu2 %vm1401_vm3, %v1371_v1  ;;  %3360 = vst.msk [vmem:[%s4918_s8 + $0x70] sm:$0xff] %vm2065_vm5, %v2636_v57  ;;  %v2254_v56 = vsub.f32 %v5063_v4, %v2128_v41  ;;  %v2255_v38 = vsub.f32 %v5068_v0, %v2128_v41 }
 0x31a   : > { %v1272_v21 = vpop.f32.mrf.mxu1  ;;  %3361 = vst.msk [vmem:[%s4918_s8 + $0x78] sm:$0xff] %vm2065_vm5, %v2637_v20  ;;  %2827 = vperm.xlu2 %3923, %v2633_v47   ;;  %2837 = vperm.xlu1 %3922, %v2635_v60   ;;  %v2330_v25 = vmul.f32 1.442695, %v2250_v5  ;;  %v2332_v36 = vmul.f32 1.442695, %v2251_v19  ;;  %v2256_v14 = vsub.f32 %v5074_v54, %v2128_v41  ;;  %v2257_v4 = vsub.f32 %v5090_v49, %v2128_v41 }
 0x31b   : > { %v2334_v23 = vmul.f32 1.442695, %v2252_v39  ;;  %2832 = vperm.xlu0 %3921, %v2634_v43   ;;  %3821 = vmatmul.msk.bf16.gmra.mxu3 %vm1799_vm4, %v1752_v12  ;;  %v2336_v7 = vmul.f32 1.442695, %v2253_v48  ;;  %v2338_v35 = vmul.f32 1.442695, %v2254_v56  ;;  %v1273_v60 = vadd.f32 %v4756_v9, %v1272_v21 }
 0x31c   : > { %v1617_v13 = vpop.f32.mrf.mxu2  ;;  %3964 = vpow2.f32 %v2330_v25  ;;  %v2340_v47 = vmul.f32 1.442695, %v2255_v38  ;;  %v2342_v45 = vmul.f32 1.442695, %v2256_v14  ;;  %v2344_v5 = vmul.f32 1.442695, %v2257_v4 }
 0x31d   : > { %3966 = vpow2.f32 %v2332_v36  ;;  %v5158_v0 = vadd.f32 %v4928_v30, %v1617_v13  ;;  %v1339_v39 = vmax.f32 %v1273_v60, 0.0 }
 0x31e   : > { %v5150_v62 = vpop.f32.mrf.mxu3  ;;  %3968 = vpow2.f32 %v2334_v23 }
 0x31f   : > { %3970 = vpow2.f32 %v2336_v7  ;;  %6237 = vst [vmem:[#allocation28_spill] sm:$0xff] %v5158_v0  ;;  %v6185_v56 = vmax.f32 %v5158_v0, 0.0 }
 0x320   : > { %3972 = vpow2.f32 %v2338_v35 }
 0x321   : > { %3974 = vpow2.f32 %v2340_v47 }
 0x322   : > { %v1274_v43 = vpop.f32.mrf.mxu1  ;;  %v5155_v51 = vpop.eup %3964  ;;  %2842 = vperm.xlu2 %3923, %v2636_v57   ;;  %3976 = vpow2.f32 %v2342_v45 }
 0x323   : > { %v1275_v54 = vadd.f32 %v4756_v9, %v1274_v43  ;;  %v5161_v1 = vpop.eup %3966  ;;  %2847 = vperm.xlu0 %3921, %v2637_v20   ;;  %v2468_v41 = vsel %vm2065_vm5, %v5155_v51, 0.0  ;;  %3978 = vpow2.f32 %v2344_v5 }
 0x324   : > { %v1619_v49 = vpop.f32.mrf.mxu2  ;;  %v5165_v19 = vpop.eup %3968  ;;  %v2469_v57 = vsel %vm2065_vm5, %v5161_v1, 0.0 }
 0x325   : > { %v1340_v12 = vmax.f32 %v1275_v54, 0.0  ;;  %v5168_v48 = vadd.f32 %v4928_v30, %v1619_v49  ;;  %v5172_v9 = vpop.eup %3970  ;;  %v2470_v20 = vadd.f32 %v2469_v57, %v2468_v41  ;;  %v2471_v23 = vsel %vm2065_vm5, %v5165_v19, 0.0 }
 0x326   : > { %v1972_v21 = vpop.f32.mrf.mxu3  ;;  %v5178_v13 = vpop.eup %3972  ;;  %v2473_v14 = vsel %vm2065_vm5, %v5172_v9, 0.0 }
 0x327   : > { %6238 = vst [vmem:[#allocation29_spill] sm:$0xff] %v5168_v48  ;;  %v1372_v25 = vpack.c.bf16 %v1340_v12, %v1339_v39  ;;  %v6184_v36 = vmax.f32 %v5168_v48, 0.0  ;;  %v2472_v38 = vadd.f32 %v2471_v23, %v2470_v20  ;;  %v5187_v35 = vpop.eup %3974  ;;  %v2475_v47 = vsel %vm2065_vm5, %v5178_v13, 0.0 }
 0x328   : > { %v5191_v60 = vpop.eup %3976  ;;  %v2477_v54 = vsel %vm2065_vm5, %v5187_v35, 0.0 }
 0x329   : > { %v1753_v7 = vpack.c.bf16 %v6184_v36, %v6185_v56  ;;  %3783 = vmatmul.msk.bf16.gmra.mxu2 %vm1401_vm3, %v1372_v25  ;;  %v2474_v4 = vadd.f32 %v2473_v14, %v2472_v38  ;;  %v5196_v5 = vpop.eup %3978  ;;  %v2479_v39 = vsel %vm2065_vm5, %v5191_v60, 0.0 }
 0x32a   : > { %v2481_v57 = vsel %vm2065_vm5, %v5196_v5, 0.0 }
 0x32b   : > { %3822 = vmatmul.msk.bf16.gmra.mxu3 %vm1799_vm4, %v1753_v7  ;;  %v2476_v45 = vadd.f32 %v2475_v47, %v2474_v4  ;;  %v5208_v47 = vld [vmem:[#allocation2] ss:$0 sm:$0xff] }
 0x32c   : > { %v1622_v43 = vpop.f32.mrf.mxu2 }
 0x32d   : > { %v2478_v41 = vadd.f32 %v2477_v54, %v2476_v45  ;;  %v5203_v25 = vadd.f32 %v4928_v30, %v1622_v43  ;;  %v5212_v45 = vadd.f32 %v5208_v47, %v5123_v8  ;;  %v5218_v43 = vadd.f32 %v5208_v47, %v5100_v42 }
 0x32e   : > { %v1975_v49 = vpop.f32.mrf.mxu3 }
 0x32f   : > { %v2480_v12 = vadd.f32 %v2479_v39, %v2478_v41  ;;  %6239 = vst [vmem:[#allocation30_spill] sm:$0xff] %v5203_v25  ;;  %v6187_v54 = vmax.f32 %v5203_v25, 0.0  ;;  %v5239_v56 = vadd.f32 %v5208_v47, %v1975_v49 }
 0x331   : > { %v2482_v20 = vadd.f32 %v2481_v57, %v2480_v12  ;;  %v5222_v12 = vadd.f32 %v5208_v47, %v5150_v62  ;;  %v2129_v62 = vsel %vm2065_vm5, %v5218_v43, -inf  ;;  %v2136_v27 = vsel %vm2065_vm5, %v5239_v56, -inf }
 0x333   : > { %v2483_v38 = vrot.slane %v2482_v20, 4  ;;  %v2132_v36 = vsel %vm2065_vm5, %v5222_v12, -inf }
 0x334   : > { %v1624_v23 = vpop.f32.mrf.mxu2 }
 0x335   : > { %v5206_v7 = vadd.f32 %v4928_v30, %v1624_v23  ;;  %v2484_v4 = vadd.f32 %v2483_v38, %v2482_v20  ;;  %v2130_v20 = vsel %vm2065_vm5, %v5212_v45, -inf  ;;  %v5231_v23 = vadd.f32 %v5208_v47, %v1972_v21 }
 0x336   : > { %v1977_v14 = vpop.f32.mrf.mxu3 }
 0x337   : > { %6240 = vst [vmem:[#allocation31_spill] sm:$0xff] %v5206_v7  ;;  %v6186_v41 = vmax.f32 %v5206_v7, 0.0  ;;  %v2485_v39 = vrot.slane %v2484_v4, 2  ;;  %v2134_v21 = vsel %vm2065_vm5, %v5231_v23, -inf }
 0x339   : > { %v1754_v57 = vpack.c.bf16 %v6186_v41, %v6187_v54  ;;  %v2486_v8 = vadd.f32 %v2485_v39, %v2484_v4  ;;  %v2131_v4 = vmax.f32 %v2129_v62, %v2130_v20  ;;  %v5244_v54 = vadd.f32 %v5208_v47, %v1977_v14 }
 0x33b   : > { %3823 = vmatmul.msk.bf16.gmra.mxu3 %vm1799_vm4, %v1754_v57  ;;  %v2487_v38 = vrot.slane %v2486_v8, 1  ;;  %v2133_v57 = vmax.f32 %v2131_v4, %v2132_v36  ;;  %v2138_v49 = vsel %vm2065_vm5, %v5244_v54, -inf }
 0x33c   : > { %v1627_v42 = vpop.f32.mrf.mxu2 }
 0x33d   : > { %v2488_v41 = vadd.f32 %v2487_v38, %v2486_v8  ;;  %v2135_v7 = vmax.f32 %v2133_v57, %v2134_v21  ;;  %v5254_v8 = vadd.f32 %v4928_v30, %v1627_v42 }
 0x33e   : > { %v1980_v39 = vpop.f32.mrf.mxu3 }
 0x33f   : > { %3980 = vrcp.f32 %v2488_v41  ;;  %v5249_v33 = vadd.f32 %v5208_v47, %v1980_v39  ;;  %6241 = vst [vmem:[#allocation32_spill] sm:$0xff] %v5254_v8  ;;  %v2137_v20 = vmax.f32 %v2135_v7, %v2136_v27  ;;  %v6201_v21 = vmax.f32 %v5254_v8, 0.0  ;;  %v2793_v7 = vpop.permute.xlu2 %2792 }
 0x340   : > { %v2649_v26 = vand.u32 2147483648, %v2488_v41  ;;  %v2647_v11 = vand.u32 2147483647, %v2488_v41  ;;  %vm2643_vm15 = vweird.f32 %v2488_v41 }
 0x341   : > { %v2140_v14 = vsel %vm2065_vm5, %v5249_v33, -inf  ;;  %v2139_v25 = vmax.f32 %v2137_v20, %v2138_v49 }
 0x342   : > { %vm2648_vm1 = vcmp.eq.f32.partialorder %v2647_v11, 8.507059e+37 }
 0x343   : > { %v2141_v0 = vmax.f32 %v2139_v25, %v2140_v14 }
 0x344   : > { %v1629_v38 = vpop.f32.mrf.mxu2  ;;  %v2783_v36 = vpop.permute.xlu1 %2782 }
 0x345   : > { %v5259_v62 = vadd.f32 %v4928_v30, %v1629_v38  ;;  %v3981_v4 = vpop.eup %3980  ;;  %v2773_v39 = vpop.permute.xlu0 %2772 }
 0x346   : > { %v1982_v48 = vpop.f32.mrf.mxu3  ;;  %v2639_v27 = vmul.f32 %v3981_v4, %v2488_v41  ;;  %vm2644_vm14 = vweird.f32 %v3981_v4  ;;  %v6247_v41 = vmax.f32 %v4472_v16, 0.0 }
 0x347   : > { %6242 = vst [vmem:[#allocation33_spill] sm:$0xff] %v5259_v62  ;;  %v6202_v57 = vmax.f32 %v5259_v62, 0.0  ;;  %v5264_v42 = vadd.f32 %v5208_v47, %v1982_v48  ;;  %v6243_v48 = vmax.f32 %v4446_v52, 0.0  ;;  %vm2645_vm0 = vmor %vm2643_vm15, %vm2644_vm14 }
 0x348   : > { %v2640_v20 = vsub.f32 1.0, %v2639_v27  ;;  %v6244_v27 = vmax.f32 %v4467_v10, 0.0 }
 0x349   : > { %v1755_v38 = vpack.c.bf16 %v6202_v57, %v6201_v21  ;;  %v2142_v49 = vsel %vm2065_vm5, %v5264_v42, -inf  ;;  %v3090_v50 = vmul.f32 %v2773_v39, %v6243_v48 }
 0x34a   : > { %v2143_v61 = vmax.f32 %v2141_v0, %v2142_v49  ;;  %v2641_v18 = vmul.f32 %v3981_v4, %v2640_v20  ;;  %v2650_v0 = vor.u32 1.1754944e-38, %v2649_v26  ;;  %v3092_v49 = vmul.f32 %v2783_v36, %v6244_v27 }
 0x34b   : > { %3824 = vmatmul.msk.bf16.gmra.mxu3 %vm1799_vm4, %v1755_v38  ;;  %v6245_v20 = vmax.f32 %v4451_v58, 0.0  ;;  %v6246_v38 = vmax.f32 %v4488_v34, 0.0 }
 0x34c   : > { %v2144_v44 = vrot.slane %v2143_v61, 4  ;;  %v1632_v25 = vpop.f32.mrf.mxu2  ;;  %v2788_v14 = vpop.permute.xlu1 %2787  ;;  %v2642_v8 = vadd.f32 %v3981_v4, %v2641_v18  ;;  %v3154_v18 = vsel %vm1799_vm4, %v3090_v50, 0.0 }
 0x34d   : > { %v2778_v57 = vpop.permute.xlu0 %2777  ;;  %v3094_v48 = vmul.f32 %v2793_v7, %v6246_v38  ;;  %v3093_v2 = vmul.f32 %v2788_v14, %v6247_v41  ;;  %v5293_v16 = vadd.f32 %v4928_v30, %v1632_v25 }
 0x34e   : > { %v2145_v21 = vmax.f32 %v2143_v61, %v2144_v44  ;;  %v5275_v62 = vpop.f32.mrf.mxu3  ;;  %v3091_v52 = vmul.f32 %v2778_v57, %v6245_v20  ;;  %v2646_v39 = vsel %vm2645_vm0, %v3981_v4, %v2642_v8  ;;  %v2798_v8 = vpop.permute.xlu2 %2797  ;;  %v3157_v4 = vsel %vm1799_vm4, %v3092_v49, 0.0 }
 0x34f   : > { %v2651_v61 = vsel %vm2648_vm1, %v2650_v0, %v2646_v39  ;;  %v6248_v57 = vmax.f32 %v4493_v40, 0.0  ;;  %v3159_v25 = vsel %vm1799_vm4, %v3093_v2, 0.0  ;;  %v3161_v2 = vsel %vm1799_vm4, %v3094_v48, 0.0 }
 0x350   : > { %v2146_v44 = vrot.slane %v2145_v21, 2  ;;  %v3155_v26 = vsel %vm1799_vm4, %v3091_v52, 0.0  ;;  %v2653_v10 = vmul.f32 %v5161_v1, %v2651_v61  ;;  %v2652_v58 = vmul.f32 %v5155_v51, %v2651_v61 }
 0x351   : > { %v3156_v36 = vadd.f32 %v3155_v26, %v3154_v18  ;;  %v2654_v34 = vmul.f32 %v5165_v19, %v2651_v61  ;;  %v2656_v50 = vmul.f32 %v5178_v13, %v2651_v61  ;;  %v2655_v1 = vmul.f32 %v5172_v9, %v2651_v61 }
 0x352   : > { %v2147_v11 = vmax.f32 %v2145_v21, %v2146_v44  ;;  %3363 = vst.msk [vmem:[%s4918_s8 + $0x88] sm:$0xff] %vm2065_vm5, %v2653_v10  ;;  %2857 = vperm.xlu2 %3923, %v2653_v10   ;;  %2852 = vperm.xlu1 %3922, %v2652_v58   ;;  %v2657_v13 = vmul.f32 %v5187_v35, %v2651_v61  ;;  %v1717_v52 = vmax.f32 %v5293_v16, 0.0  ;;  %v6249_v39 = vmax.f32 %v4509_v59, 0.0 }
 0x353   : > { %v3158_v21 = vadd.f32 %v3157_v4, %v3156_v36  ;;  %3362 = vst.msk [vmem:[%s4918_s8 + $0x80] sm:$0xff] %vm2065_vm5, %v2652_v58  ;;  %2862 = vperm.xlu0 %3921, %v2654_v34   ;;  %v3095_v7 = vmul.f32 %v2798_v8, %v6248_v57  ;;  %v2659_v0 = vmul.f32 %v5196_v5, %v2651_v61 }
 0x354   : > { %v2148_v51 = vrot.slane %v2147_v11, 1  ;;  %v1634_v19 = vpop.f32.mrf.mxu2  ;;  %3364 = vst.msk [vmem:[%s4918_s8 + $0x90] sm:$0xff] %vm2065_vm5, %v2654_v34  ;;  %v2808_v14 = vpop.permute.xlu1 %2807  ;;  %v2658_v40 = vmul.f32 %v5191_v60, %v2651_v61  ;;  %v6250_v60 = vmax.f32 %v4514_v3, 0.0 }
 0x355   : > { %v5307_v9 = vadd.f32 %v4928_v30, %v1634_v19  ;;  %v3160_v49 = vadd.f32 %v3159_v25, %v3158_v21  ;;  %v2803_v20 = vpop.permute.xlu0 %2802  ;;  %3366 = vst.msk [vmem:[%s4918_s8 + $0xa0] sm:$0xff] %vm2065_vm5, %v2656_v50  ;;  %v3163_v41 = vsel %vm1799_vm4, %v3095_v7, 0.0 }
 0x356   : > { %v2149_v27 = vmax.f32 %v2147_v11, %v2148_v51  ;;  %v5310_v35 = vpop.f32.mrf.mxu3  ;;  %v3096_v38 = vmul.f32 %v2803_v20, %v6249_v39  ;;  %3365 = vst.msk [vmem:[%s4918_s8 + $0x98] sm:$0xff] %vm2065_vm5, %v2655_v1  ;;  %v3097_v61 = vmul.f32 %v2808_v14, %v6250_v60 }
 0x357   : > { %v1718_v5 = vmax.f32 %v5307_v9, 0.0  ;;  %v3162_v18 = vadd.f32 %v3161_v2, %v3160_v49  ;;  %3367 = vst.msk [vmem:[%s4918_s8 + $0xa8] sm:$0xff] %vm2065_vm5, %v2657_v13 }
 0x358   : > { %v2258_v44 = vsub.f32 %v5218_v43, %v2149_v27  ;;  %3369 = vst.msk [vmem:[%s4918_s8 + $0xb8] sm:$0xff] %vm2065_vm5, %v2659_v0  ;;  %v2259_v48 = vsub.f32 %v5212_v45, %v2149_v27  ;;  %v2260_v10 = vsub.f32 %v5222_v12, %v2149_v27  ;;  %v3165_v43 = vsel %vm1799_vm4, %v3096_v38, 0.0 }
 0x359   : > { %v1756_v59 = vpack.c.bf16 %v1718_v5, %v1717_v52  ;;  %v3164_v26 = vadd.f32 %v3163_v41, %v3162_v18  ;;  %3368 = vst.msk [vmem:[%s4918_s8 + $0xb0] sm:$0xff] %vm2065_vm5, %v2658_v40  ;;  %v2261_v3 = vsub.f32 %v5231_v23, %v2149_v27  ;;  %v2262_v58 = vsub.f32 %v5239_v56, %v2149_v27 }
 0x35a   : > { %2872 = vperm.xlu2 %3923, %v2656_v50   ;;  %2867 = vperm.xlu1 %3922, %v2655_v1   ;;  %v2346_v8 = vmul.f32 1.442695, %v2258_v44  ;;  %v2263_v45 = vsub.f32 %v5244_v54, %v2149_v27  ;;  %v2348_v34 = vmul.f32 1.442695, %v2259_v48  ;;  %v3167_v4 = vsel %vm1799_vm4, %v3097_v61, 0.0 }
 0x35b   : > { %v3166_v11 = vadd.f32 %v3165_v43, %v3164_v26  ;;  %2877 = vperm.xlu0 %3921, %v2657_v13   ;;  %3825 = vmatmul.msk.bf16.gmra.mxu3 %vm1799_vm4, %v1756_v59  ;;  %v2350_v12 = vmul.f32 1.442695, %v2260_v10  ;;  %v2352_v51 = vmul.f32 1.442695, %v2261_v3  ;;  %v2264_v23 = vsub.f32 %v5249_v33, %v2149_v27 }
 0x35c   : > { %v1637_v36 = vpop.f32.mrf.mxu2  ;;  %3982 = vpow2.f32 %v2346_v8  ;;  %v2354_v56 = vmul.f32 1.442695, %v2262_v58  ;;  %v2265_v21 = vsub.f32 %v5264_v42, %v2149_v27  ;;  %v2356_v19 = vmul.f32 1.442695, %v2263_v45 }
 0x35d   : > { %v5344_v50 = vadd.f32 %v3167_v4, %v3166_v11  ;;  %3984 = vpow2.f32 %v2348_v34  ;;  %v2358_v54 = vmul.f32 1.442695, %v2264_v23  ;;  %v5351_v57 = vadd.f32 %v4928_v30, %v1637_v36 }
 0x35e   : > { %v1990_v1 = vpop.f32.mrf.mxu3  ;;  %3986 = vpow2.f32 %v2350_v12  ;;  %v2360_v33 = vmul.f32 1.442695, %v2265_v21 }
 0x35f   : > { %3988 = vpow2.f32 %v2352_v51 }
 0x360   : > { %3990 = vpow2.f32 %v2354_v56 }
 0x361   : > { %3992 = vpow2.f32 %v2356_v19  ;;  %v5401_v19 = vadd.f32 %v5208_v47, %v5310_v35 }
 0x362   : > { %v5348_v13 = vpop.eup %3982  ;;  %2887 = vperm.xlu2 %3923, %v2659_v0   ;;  %2882 = vperm.xlu1 %3922, %v2658_v40   ;;  %3994 = vpow2.f32 %v2358_v54  ;;  %v1719_v40 = vmax.f32 %v5351_v57, 0.0 }
 0x363   : > { %v5353_v7 = vpop.eup %3984  ;;  %v2489_v14 = vsel %vm2065_vm5, %v5348_v13, 0.0  ;;  %3996 = vpow2.f32 %v2360_v33 }
 0x364   : > { %v1639_v25 = vpop.f32.mrf.mxu2  ;;  %v5357_v42 = vpop.eup %3986  ;;  %v2490_v49 = vsel %vm2065_vm5, %v5353_v7, 0.0 }
 0x365   : > { %v5360_v27 = vadd.f32 %v4928_v30, %v1639_v25  ;;  %v5364_v20 = vpop.eup %3988  ;;  %v2491_v0 = vadd.f32 %v2490_v49, %v2489_v14  ;;  %v2492_v38 = vsel %vm2065_vm5, %v5357_v42, 0.0  ;;  %v5407_v49 = vadd.f32 %v5208_v47, %v5275_v62 }
 0x366   : > { %v1992_v39 = vpop.f32.mrf.mxu3  ;;  %v5370_v18 = vpop.eup %3990  ;;  %v2494_v60 = vsel %vm2065_vm5, %v5364_v20, 0.0 }
 0x367   : > { %v6207_v2 = vmax.f32 %v5360_v27, 0.0  ;;  %v2493_v44 = vadd.f32 %v2492_v38, %v2491_v0  ;;  %v5378_v61 = vpop.eup %3992  ;;  %v2496_v48 = vsel %vm2065_vm5, %v5370_v18, 0.0  ;;  %v5410_v0 = vadd.f32 %v5208_v47, %v1990_v1 }
 0x368   : > { %v5382_v26 = vpop.eup %3994  ;;  %v2498_v3 = vsel %vm2065_vm5, %v5378_v61, 0.0  ;;  %v2150_v1 = vsel %vm2065_vm5, %v5407_v49, -inf }
 0x369   : > { %v1757_v41 = vpack.c.bf16 %v6207_v2, %v1719_v40  ;;  %v2495_v59 = vadd.f32 %v2494_v60, %v2493_v44  ;;  %v5387_v58 = vpop.eup %3996  ;;  %v2500_v36 = vsel %vm2065_vm5, %v5382_v26, 0.0  ;;  %v2151_v44 = vsel %vm2065_vm5, %v5401_v19, -inf }
 0x36a   : > { %v2502_v34 = vsel %vm2065_vm5, %v5387_v58, 0.0 }
 0x36b   : > { %3826 = vmatmul.msk.bf16.gmra.mxu3 %vm1799_vm4, %v1757_v41  ;;  %v2497_v43 = vadd.f32 %v2496_v48, %v2495_v59  ;;  %v5419_v41 = vadd.f32 %v5208_v47, %v1992_v39  ;;  %v2153_v59 = vsel %vm2065_vm5, %v5410_v0, -inf }
 0x36c   : > { %v1642_v10 = vpop.f32.mrf.mxu2 }
 0x36d   : > { %v2499_v8 = vadd.f32 %v2498_v3, %v2497_v43  ;;  %v5394_v12 = vadd.f32 %v4928_v30, %v1642_v10  ;;  %v2152_v10 = vmax.f32 %v2150_v1, %v2151_v44  ;;  %v2155_v3 = vsel %vm2065_vm5, %v5419_v41, -inf }
 0x36e   : > { %v1995_v11 = vpop.f32.mrf.mxu3 }
 0x36f   : > { %v2501_v45 = vadd.f32 %v2500_v36, %v2499_v8  ;;  %v6206_v54 = vmax.f32 %v5394_v12, 0.0  ;;  %v5427_v48 = vadd.f32 %v5208_v47, %v1995_v11  ;;  %v2154_v36 = vmax.f32 %v2152_v10, %v2153_v59  ;;  %v5439_v11 = vld [vmem:[%s6122_s6] ss:$0 sm:$0xff] }
 0x371   : > { %v2503_v4 = vadd.f32 %v2502_v34, %v2501_v45  ;;  %v2157_v45 = vsel %vm2065_vm5, %v5427_v48, -inf  ;;  %v2156_v34 = vmax.f32 %v2154_v36, %v2155_v3 }
 0x373   : > { %v2504_v23 = vrot.slane %v2503_v4, 4 }
 0x374   : > { %v1644_v51 = vpop.f32.mrf.mxu2 }
 0x375   : > { %v5397_v56 = vadd.f32 %v4928_v30, %v1644_v51  ;;  %v2505_v21 = vadd.f32 %v2504_v23, %v2503_v4  ;;  %v2813_v30 = vpop.permute.xlu2 %2812 }
 0x376   : > { %v1997_v25 = vpop.f32.mrf.mxu3 }
 0x377   : > { %v6205_v33 = vmax.f32 %v5397_v56, 0.0  ;;  %v2506_v14 = vrot.slane %v2505_v21, 2  ;;  %v5432_v39 = vadd.f32 %v5208_v47, %v1997_v25  ;;  %v6251_v25 = vmax.f32 %v4530_v24, 0.0 }
 0x378   : > { %v6253_v24 = vmax.f32 %v4535_v31, 0.0 }
 0x379   : > { %v1758_v35 = vpack.c.bf16 %v6205_v33, %v6206_v54  ;;  %v2507_v38 = vadd.f32 %v2506_v14, %v2505_v21  ;;  %v2159_v21 = vsel %vm2065_vm5, %v5432_v39, -inf  ;;  %v3098_v14 = vmul.f32 %v2813_v30, %v6251_v25 }
 0x37b   : > { %3827 = vmatmul.msk.bf16.gmra.mxu3 %vm1799_vm4, %v1758_v35  ;;  %v2508_v60 = vrot.slane %v2507_v38, 1  ;;  %v2158_v35 = vmax.f32 %v2156_v34, %v2157_v45 }
 0x37c   : > { %v1647_v62 = vpop.f32.mrf.mxu2 }
 0x37d   : > { %v2509_v43 = vadd.f32 %v2508_v60, %v2507_v38  ;;  %v5442_v4 = vadd.f32 %v5439_v11, %v1647_v62  ;;  %v2828_v23 = vpop.permute.xlu2 %2827  ;;  %v2160_v59 = vmax.f32 %v2158_v35, %v2159_v21  ;;  %v6254_v21 = vmax.f32 %v4556_v63, 0.0 }
 0x37e   : > { %v2000_v8 = vpop.f32.mrf.mxu3 }
 0x37f   : > { %3998 = vrcp.f32 %v2509_v43  ;;  %v5445_v51 = vadd.f32 %v5208_v47, %v2000_v8  ;;  %v6209_v62 = vmax.f32 %v5442_v4, 0.0  ;;  %v6252_v8 = vmax.f32 %v4551_v53, 0.0 }
 0x380   : > { %v3101_v35 = vmul.f32 %v2828_v23, %v6254_v21  ;;  %vm2665_vm3 = vweird.f32 %v2509_v43 }
 0x381   : > { %v2161_v10 = vsel %vm2065_vm5, %v5445_v51, -inf }
 0x382   : > { %v2162_v54 = vmax.f32 %v2160_v59, %v2161_v10 }
 0x384   : > { %v1649_v38 = vpop.f32.mrf.mxu2  ;;  %v2823_v44 = vpop.permute.xlu1 %2822 }
 0x385   : > { %v5452_v60 = vadd.f32 %v5439_v11, %v1649_v38  ;;  %v3999_v1 = vpop.eup %3998  ;;  %v2818_v3 = vpop.permute.xlu0 %2817  ;;  %v3100_v36 = vmul.f32 %v2823_v44, %v6252_v8  ;;  %v3175_v38 = vsel %vm1799_vm4, %v3098_v14, 0.0  ;;  %v2669_v14 = vand.u32 2147483647, %v2509_v43 }
 0x386   : > { %v3099_v30 = vmul.f32 %v2818_v3, %v6253_v24  ;;  %v2002_v34 = vpop.f32.mrf.mxu3  ;;  %v2661_v25 = vmul.f32 %v3999_v1, %v2509_v43  ;;  %v2671_v8 = vand.u32 2147483648, %v2509_v43  ;;  %vm2666_vm2 = vweird.f32 %v3999_v1 }
 0x387   : > { %v6208_v45 = vmax.f32 %v5452_v60, 0.0  ;;  %v5466_v33 = vadd.f32 %v5208_v47, %v2002_v34  ;;  %v3178_v63 = vsel %vm1799_vm4, %v3100_v36, 0.0  ;;  %v2843_v34 = vpop.permute.xlu2 %2842  ;;  %vm2667_vm6 = vmor %vm2665_vm3, %vm2666_vm2  ;;  %vm2670_vm7 = vcmp.eq.f32.partialorder %v2669_v14, 8.507059e+37 }
 0x388   : > { %v3176_v2 = vsel %vm1799_vm4, %v3099_v30, 0.0  ;;  %v2662_v53 = vsub.f32 1.0, %v2661_v25  ;;  %v3180_v30 = vsel %vm1799_vm4, %v3101_v35, 0.0  ;;  %v6257_v43 = vmax.f32 %v4589_v55, 0.0 }
 0x389   : > { %v1759_v31 = vpack.c.bf16 %v6208_v45, %v6209_v62  ;;  %v3177_v44 = vadd.f32 %v3176_v2, %v3175_v38  ;;  %v2163_v3 = vsel %vm2065_vm5, %v5466_v33, -inf  ;;  %v2672_v62 = vor.u32 1.1754944e-38, %v2671_v8 }
 0x38a   : > { %v2164_v23 = vmax.f32 %v2162_v54, %v2163_v3  ;;  %v2663_v24 = vmul.f32 %v3999_v1, %v2662_v53  ;;  %v6255_v54 = vmax.f32 %v4575_v29, 0.0  ;;  %vm3334_vm2 = vcmask 1043459  }
 0x38b   : > { %v3179_v59 = vadd.f32 %v3178_v63, %v3177_v44  ;;  %3828 = vmatmul.msk.bf16.gmra.mxu3 %vm1799_vm4, %v1759_v31  ;;  %v6256_v44 = vmax.f32 %v4570_v22, 0.0  ;;  %v3169_v63 = vrot.slane %v5344_v50, 4 }
 0x38c   : > { %v1652_v10 = vpop.f32.mrf.mxu2  ;;  %v2165_v21 = vrot.slane %v2164_v23, 4  ;;  %v2838_v25 = vpop.permute.xlu1 %2837  ;;  %v2664_v2 = vadd.f32 %v3999_v1, %v2663_v24  ;;  %v3104_v24 = vmul.f32 %v2843_v34, %v6257_v43 }
 0x38d   : > { %v3181_v38 = vadd.f32 %v3180_v30, %v3179_v59  ;;  %v2833_v45 = vpop.permute.xlu0 %2832  ;;  %v3103_v53 = vmul.f32 %v2838_v25, %v6255_v54  ;;  %v3170_v25 = vadd.f32 %v3169_v63, %v5344_v50 }
 0x38e   : > { %v2166_v36 = vmax.f32 %v2164_v23, %v2165_v21  ;;  %v3102_v31 = vmul.f32 %v2833_v45, %v6256_v44  ;;  %v5482_v3 = vpop.f32.mrf.mxu3  ;;  %v2668_v35 = vsel %vm2667_vm6, %v3999_v1, %v2664_v2  ;;  %v5491_v45 = vadd.f32 %v5439_v11, %v1652_v10 }
 0x38f   : > { %v2673_v59 = vsel %vm2670_vm7, %v2672_v62, %v2668_v35  ;;  %v3184_v62 = vsel %vm1799_vm4, %v3103_v53, 0.0  ;;  %v6258_v53 = vmax.f32 %v4594_v6, 0.0 }
 0x390   : > { %v2167_v14 = vrot.slane %v2166_v36, 2  ;;  %v3182_v8 = vsel %vm1799_vm4, %v3102_v31, 0.0  ;;  %v2676_v29 = vmul.f32 %v5357_v42, %v2673_v59  ;;  %v2675_v23 = vmul.f32 %v5353_v7, %v2673_v59 }
 0x391   : > { %v3183_v22 = vadd.f32 %v3182_v8, %v3181_v38  ;;  %v2674_v1 = vmul.f32 %v5348_v13, %v2673_v59  ;;  %v2679_v30 = vmul.f32 %v5378_v61, %v2673_v59  ;;  %v2678_v42 = vmul.f32 %v5370_v18, %v2673_v59 }
 0x392   : > { %v2168_v55 = vmax.f32 %v2166_v36, %v2167_v14  ;;  %3372 = vst.msk [vmem:[%s4918_s8 + $0xd0] sm:$0xff] %vm2065_vm5, %v2676_v29  ;;  %2902 = vperm.xlu2 %3923, %v2676_v29   ;;  %2897 = vperm.xlu1 %3922, %v2675_v23   ;;  %v2677_v34 = vmul.f32 %v5364_v20, %v2673_v59  ;;  %v3186_v13 = vsel %vm1799_vm4, %v3104_v24, 0.0  ;;  %v1725_v54 = vmax.f32 %v5491_v45, 0.0 }
 0x393   : > { %v3185_v7 = vadd.f32 %v3184_v62, %v3183_v22  ;;  %3371 = vst.msk [vmem:[%s4918_s8 + $0xc8] sm:$0xff] %vm2065_vm5, %v2675_v23  ;;  %2892 = vperm.xlu0 %3921, %v2674_v1   ;;  %v2681_v18 = vmul.f32 %v5387_v58, %v2673_v59  ;;  %v2680_v20 = vmul.f32 %v5382_v26, %v2673_v59  ;;  %v3171_v58 = vrot.slane %v3170_v25, 2 }
 0x394   : > { %v1654_v10 = vpop.f32.mrf.mxu2  ;;  %v2169_v61 = vrot.slane %v2168_v55, 1  ;;  %3370 = vst.msk [vmem:[%s4918_s8 + $0xc0] sm:$0xff] %vm2065_vm5, %v2674_v1 }
 0x395   : > { %v5506_v21 = vadd.f32 %v5439_v11, %v1654_v10  ;;  %v3187_v2 = vadd.f32 %v3186_v13, %v3185_v7  ;;  %v2848_v38 = vpop.permute.xlu0 %2847  ;;  %3375 = vst.msk [vmem:[%s4918_s8 + $0xe8] sm:$0xff] %vm2065_vm5, %v2679_v30 }
 0x396   : > { %v2170_v36 = vmax.f32 %v2168_v55, %v2169_v61  ;;  %v3105_v44 = vmul.f32 %v2848_v38, %v6258_v53  ;;  %v5517_v35 = vpop.f32.mrf.mxu3  ;;  %3374 = vst.msk [vmem:[%s4918_s8 + $0xe0] sm:$0xff] %vm2065_vm5, %v2678_v42  ;;  %v3172_v55 = vadd.f32 %v3171_v58, %v3170_v25 }
 0x397   : > { %v1726_v31 = vmax.f32 %v5506_v21, 0.0  ;;  %3373 = vst.msk [vmem:[%s4918_s8 + $0xd8] sm:$0xff] %vm2065_vm5, %v2677_v34 }
 0x398   : > { %v3188_v50 = vsel %vm1799_vm4, %v3105_v44, 0.0  ;;  %3377 = vst.msk [vmem:[%s4918_s8 + $0xf8] sm:$0xff] %vm2065_vm5, %v2681_v18  ;;  %v2266_v6 = vsub.f32 %v5407_v49, %v2170_v36  ;;  %v2267_v43 = vsub.f32 %v5401_v19, %v2170_v36  ;;  %v2268_v24 = vsub.f32 %v5410_v0, %v2170_v36 }
 0x399   : > { %v1760_v26 = vpack.c.bf16 %v1726_v31, %v1725_v54  ;;  %v3189_v63 = vadd.f32 %v3188_v50, %v3187_v2  ;;  %3376 = vst.msk [vmem:[%s4918_s8 + $0xf0] sm:$0xff] %vm2065_vm5, %v2680_v20  ;;  %v2269_v59 = vsub.f32 %v5419_v41, %v2170_v36  ;;  %v2270_v14 = vsub.f32 %v5427_v48, %v2170_v36 }
 0x39a   : > { %2917 = vperm.xlu2 %3923, %v2679_v30   ;;  %2912 = vperm.xlu1 %3922, %v2678_v42   ;;  %v2362_v49 = vmul.f32 1.442695, %v2266_v6  ;;  %v2271_v23 = vsub.f32 %v5432_v39, %v2170_v36  ;;  %v2364_v22 = vmul.f32 1.442695, %v2267_v43  ;;  %v2366_v1 = vmul.f32 1.442695, %v2268_v24 }
 0x39b   : > { %v3190_v8 = vrot.slane %v3189_v63, 4  ;;  %2907 = vperm.xlu0 %3921, %v2677_v34   ;;  %3829 = vmatmul.msk.bf16.gmra.mxu3 %vm1799_vm4, %v1760_v26  ;;  %v2368_v0 = vmul.f32 1.442695, %v2269_v59  ;;  %v2272_v41 = vsub.f32 %v5445_v51, %v2170_v36  ;;  %v2370_v48 = vmul.f32 1.442695, %v2270_v14 }
 0x39c   : > { %v1657_v29 = vpop.f32.mrf.mxu2  ;;  %4000 = vpow2.f32 %v2362_v49  ;;  %v2273_v42 = vsub.f32 %v5466_v33, %v2170_v36  ;;  %v2372_v7 = vmul.f32 1.442695, %v2271_v23  ;;  %v3173_v10 = vrot.slane %v3172_v55, 1 }
 0x39d   : > { %v3191_v19 = vadd.f32 %v3190_v8, %v3189_v63  ;;  %4002 = vpow2.f32 %v2364_v22  ;;  %v5544_v34 = vadd.f32 %v5439_v11, %v1657_v29  ;;  %v2374_v13 = vmul.f32 1.442695, %v2272_v41 }
 0x39e   : > { %v5539_v30 = vpop.f32.mrf.mxu3  ;;  %4004 = vpow2.f32 %v2366_v1  ;;  %v2376_v38 = vmul.f32 1.442695, %v2273_v42 }
 0x39f   : > { %v3192_v62 = vrot.slane %v3191_v19, 2  ;;  %4006 = vpow2.f32 %v2368_v0 }
 0x3a0   : > { %4008 = vpow2.f32 %v2370_v48 }
 0x3a1   : > { %v3193_v39 = vadd.f32 %v3192_v62, %v3191_v19  ;;  %4010 = vpow2.f32 %v2372_v7 }
 0x3a2   : > { %2927 = vperm.xlu1 %3922, %v2681_v18   ;;  %v5546_v61 = vpop.eup %4000  ;;  %v3174_v18 = vadd.f32 %v3173_v10, %v3172_v55  ;;  %4012 = vpow2.f32 %v2374_v13 }
 0x3a3   : > { %v3194_v51 = vrot.slane %v3193_v39, 1  ;;  %2922 = vperm.xlu0 %3921, %v2680_v20   ;;  %v5548_v2 = vpop.eup %4002  ;;  %v2510_v36 = vsel %vm2065_vm5, %v5546_v61, 0.0  ;;  %v6212_v20 = vmax.f32 %v5544_v34, 0.0  ;;  %4014 = vpow2.f32 %v2376_v38 }
 0x3a4   : > { %v1659_v25 = vpop.f32.mrf.mxu2  ;;  %v5555_v53 = vpop.eup %4004  ;;  %v2511_v50 = vsel %vm2065_vm5, %v5548_v2, 0.0 }
 0x3a5   : > { %v5551_v33 = vadd.f32 %v5439_v11, %v1659_v25  ;;  %v3195_v44 = vadd.f32 %v3194_v51, %v3193_v39  ;;  %v5559_v26 = vpop.eup %4006  ;;  %v2512_v63 = vadd.f32 %v2511_v50, %v2510_v36  ;;  %v2513_v24 = vsel %vm2065_vm5, %v5555_v53, 0.0 }
 0x3a6   : > { %v2012_v58 = vpop.f32.mrf.mxu3  ;;  %v5568_v59 = vpop.eup %4008  ;;  %v2515_v29 = vsel %vm2065_vm5, %v5559_v26, 0.0 }
 0x3a7   : > { %v1728_v6 = vmax.f32 %v5551_v33, 0.0  ;;  %v5564_v43 = vsel %vm3330_vm8, %v3195_v44, %v3174_v18  ;;  %v2514_v8 = vadd.f32 %v2513_v24, %v2512_v63  ;;  %v5576_v49 = vpop.eup %4010  ;;  %v2517_v1 = vsel %vm2065_vm5, %v5568_v59, 0.0 }
 0x3a8   : > { %v5581_v55 = vpop.eup %4012  ;;  %v2519_v0 = vsel %vm2065_vm5, %v5576_v49, 0.0  ;;  %v5601_v63 = vadd.f32 %v5208_v47, %v5517_v35  ;;  %v5618_v35 = vadd.f32 %v5208_v47, %v2012_v58 }
 0x3a9   : > { %v1761_v14 = vpack.c.bf16 %v1728_v6, %v6212_v20  ;;  %v2516_v23 = vadd.f32 %v2515_v29, %v2514_v8  ;;  %v5585_v41 = vpop.eup %4014  ;;  %v2521_v42 = vsel %vm2065_vm5, %v5581_v55, 0.0  ;;  %v5613_v8 = vadd.f32 %v5208_v47, %v5539_v30 }
 0x3aa   : > { %v2523_v10 = vsel %vm2065_vm5, %v5585_v41, 0.0  ;;  %v2176_v58 = vsel %vm2065_vm5, %v5618_v35, -inf }
 0x3ab   : > { %3830 = vmatmul.msk.bf16.gmra.mxu3 %vm1799_vm4, %v1761_v14  ;;  %v2518_v19 = vadd.f32 %v2517_v1, %v2516_v23  ;;  %v2172_v23 = vsel %vm2065_vm5, %v5601_v63, -inf }
 0x3ac   : > { %v1662_v22 = vpop.f32.mrf.mxu2 }
 0x3ad   : > { %v2520_v62 = vadd.f32 %v2519_v0, %v2518_v19  ;;  %v5592_v39 = vadd.f32 %v5439_v11, %v1662_v22  ;;  %v2858_v0 = vpop.permute.xlu2 %2857 }
 0x3ae   : > { %v2015_v48 = vpop.f32.mrf.mxu3 }
 0x3af   : > { %v2522_v7 = vadd.f32 %v2521_v42, %v2520_v62  ;;  %v6211_v36 = vmax.f32 %v5592_v39, 0.0  ;;  %v5626_v19 = vadd.f32 %v5208_v47, %v2015_v48 }
 0x3b1   : > { %v2524_v13 = vadd.f32 %v2523_v10, %v2522_v7 }
 0x3b3   : > { %v2525_v38 = vrot.slane %v2524_v13, 4 }
 0x3b4   : > { %v1664_v51 = vpop.f32.mrf.mxu2 }
 0x3b5   : > { %v5595_v25 = vadd.f32 %v5439_v11, %v1664_v51  ;;  %v2526_v50 = vadd.f32 %v2525_v38, %v2524_v13  ;;  %v5609_v11 = vadd.f32 %v5208_v47, %v5482_v3  ;;  %v2174_v3 = vsel %vm2065_vm5, %v5613_v8, -inf }
 0x3b6   : > { %v2017_v44 = vpop.f32.mrf.mxu3  ;;  %v2178_v13 = vsel %vm2065_vm5, %v5626_v19, -inf  ;;  %v6259_v38 = vmax.f32 %v4613_v46, 0.0 }
 0x3b7   : > { %v6210_v18 = vmax.f32 %v5595_v25, 0.0  ;;  %v2527_v14 = vrot.slane %v2526_v50, 2  ;;  %v2171_v1 = vsel %vm2065_vm5, %v5609_v11, -inf  ;;  %v5631_v7 = vadd.f32 %v5208_v47, %v2017_v44 }
 0x3b8   : > { %v2173_v30 = vmax.f32 %v2171_v1, %v2172_v23  ;;  %v6260_v23 = vmax.f32 %v4608_v32, 0.0 }
 0x3b9   : > { %v1762_v24 = vpack.c.bf16 %v6210_v18, %v6211_v36  ;;  %v2528_v29 = vadd.f32 %v2527_v14, %v2526_v50  ;;  %v3107_v50 = vmul.f32 %v2858_v0, %v6259_v38  ;;  %v2873_v38 = vpop.permute.xlu2 %2872 }
 0x3ba   : > { %v2175_v10 = vmax.f32 %v2173_v30, %v2174_v3 }
 0x3bb   : > { %3831 = vmatmul.msk.bf16.gmra.mxu3 %vm1799_vm4, %v1762_v24  ;;  %v2529_v22 = vrot.slane %v2528_v29, 1  ;;  %v2180_v24 = vsel %vm2065_vm5, %v5631_v7, -inf  ;;  %v3197_v46 = vsel %vm1799_vm4, %v3107_v50, 0.0 }
 0x3bc   : > { %v2177_v48 = vmax.f32 %v2175_v10, %v2176_v58 }
 0x3bd   : > { %v2530_v42 = vadd.f32 %v2529_v22, %v2528_v29 }
 0x3be   : > { %v2020_v62 = vpop.f32.mrf.mxu3  ;;  %v2179_v14 = vmax.f32 %v2177_v48, %v2178_v13 }
 0x3bf   : > { %4016 = vrcp.f32 %v2530_v42  ;;  %v5636_v51 = vadd.f32 %v5208_v47, %v2020_v62  ;;  %v6261_v62 = vmax.f32 %v4629_v17, 0.0  ;;  %v2691_v50 = vand.u32 2147483647, %v2530_v42 }
 0x3c0   : > { %v2181_v30 = vmax.f32 %v2179_v14, %v2180_v24  ;;  %vm2687_vm10 = vweird.f32 %v2530_v42 }
 0x3c1   : > { %v2182_v44 = vsel %vm2065_vm5, %v5636_v51, -inf  ;;  %vm2692_vm12 = vcmp.eq.f32.partialorder %v2691_v50, 8.507059e+37 }
 0x3c2   : > { %v2183_v18 = vmax.f32 %v2181_v30, %v2182_v44  ;;  %v6263_v44 = vmax.f32 %v4634_v28, 0.0 }
 0x3c4   : > { %v2853_v29 = vpop.permute.xlu1 %2852 }
 0x3c5   : > { %v3106_v22 = vmul.f32 %v2853_v29, %v6260_v23  ;;  %v2863_v1 = vpop.permute.xlu0 %2862  ;;  %v4017_v3 = vpop.eup %4016  ;;  %v2693_v23 = vand.u32 2147483648, %v2530_v42 }
 0x3c6   : > { %v3108_v58 = vmul.f32 %v2863_v1, %v6261_v62  ;;  %v2022_v10 = vpop.f32.mrf.mxu3  ;;  %v2683_v48 = vmul.f32 %v4017_v3, %v2530_v42  ;;  %vm2688_vm9 = vweird.f32 %v4017_v3 }
 0x3c7   : > { %v3196_v0 = vsel %vm1799_vm4, %v3106_v22, 0.0  ;;  %v5651_v13 = vadd.f32 %v5208_v47, %v2022_v10  ;;  %v6262_v47 = vmax.f32 %v4653_v15, 0.0  ;;  %vm2689_vm11 = vmor %vm2687_vm10, %vm2688_vm9  ;;  %vm3336_vm9 = vcmask 1044484  }
 0x3c8   : > { %v3198_v36 = vadd.f32 %v3197_v46, %v3196_v0  ;;  %v3199_v32 = vsel %vm1799_vm4, %v3108_v58, 0.0  ;;  %v2684_v14 = vsub.f32 1.0, %v2683_v48  ;;  %v6264_v48 = vmax.f32 %v4658_v37, 0.0 }
 0x3c9   : > { %v2184_v24 = vsel %vm2065_vm5, %v5651_v13, -inf  ;;  %v3110_v10 = vmul.f32 %v2873_v38, %v6262_v47 }
 0x3ca   : > { %v3200_v17 = vadd.f32 %v3199_v32, %v3198_v36  ;;  %v2185_v29 = vmax.f32 %v2183_v18, %v2184_v24  ;;  %v2685_v1 = vmul.f32 %v4017_v3, %v2684_v14  ;;  %v2694_v36 = vor.u32 1.1754944e-38, %v2693_v23 }
 0x3cb   : > { %v3203_v14 = vsel %vm1799_vm4, %v3110_v10, 0.0 }
 0x3cc   : > { %v2186_v22 = vrot.slane %v2185_v29, 4  ;;  %v2868_v62 = vpop.permute.xlu1 %2867  ;;  %v2686_v58 = vadd.f32 %v4017_v3, %v2685_v1  ;;  %v2888_v1 = vpop.permute.xlu2 %2887 }
 0x3cd   : > { %v3109_v30 = vmul.f32 %v2868_v62, %v6263_v44  ;;  %v2878_v46 = vpop.permute.xlu0 %2877  ;;  %v6267_v44 = vld [vmem:[#allocation6_spill] sm:$0xff] }
 0x3ce   : > { %v2187_v0 = vmax.f32 %v2185_v29, %v2186_v22  ;;  %v5660_v20 = vpop.f32.mrf.mxu3  ;;  %v3111_v32 = vmul.f32 %v2878_v46, %v6264_v48  ;;  %v2690_v24 = vsel %vm2689_vm11, %v4017_v3, %v2686_v58 }
 0x3cf   : > { %v3201_v18 = vsel %vm1799_vm4, %v3109_v30, 0.0  ;;  %v2695_v28 = vsel %vm2692_vm12, %v2694_v36, %v2690_v24  ;;  %v6268_v30 = vmax.f32 %v6267_v44, 0.0 }
 0x3d0   : > { %v2188_v15 = vrot.slane %v2187_v0, 2  ;;  %v3202_v38 = vadd.f32 %v3201_v18, %v3200_v17  ;;  %v2696_v42 = vmul.f32 %v5546_v61, %v2695_v28  ;;  %v2698_v29 = vmul.f32 %v5555_v53, %v2695_v28 }
 0x3d1   : > { %v2697_v23 = vmul.f32 %v5548_v2, %v2695_v28  ;;  %v2699_v62 = vmul.f32 %v5559_v26, %v2695_v28  ;;  %v3205_v3 = vsel %vm1799_vm4, %v3111_v32, 0.0  ;;  %v2701_v17 = vmul.f32 %v5576_v49, %v2695_v28  ;;  %v6265_v26 = vld [vmem:[#allocation7_spill] sm:$0xff] }
 0x3d2   : > { %v2189_v22 = vmax.f32 %v2187_v0, %v2188_v15  ;;  %v3204_v37 = vadd.f32 %v3203_v14, %v3202_v38  ;;  %3378 = vst.msk [vmem:[%s4918_s8 + $0x100] sm:$0xff] %vm2065_vm5, %v2696_v42  ;;  %2932 = vperm.xlu2 %3923, %v2696_v42   ;;  %2942 = vperm.xlu1 %3922, %v2698_v29   ;;  %v6266_v47 = vmax.f32 %v6265_v26, 0.0 }
 0x3d3   : > { %3380 = vst.msk [vmem:[%s4918_s8 + $0x110] sm:$0xff] %vm2065_vm5, %v2698_v29  ;;  %2937 = vperm.xlu0 %3921, %v2697_v23   ;;  %v2700_v50 = vmul.f32 %v5568_v59, %v2695_v28  ;;  %v2702_v49 = vmul.f32 %v5581_v55, %v2695_v28  ;;  %v2703_v36 = vmul.f32 %v5585_v41, %v2695_v28 }
 0x3d4   : > { %v2190_v61 = vrot.slane %v2189_v22, 1  ;;  %v3206_v53 = vadd.f32 %v3205_v3, %v3204_v37  ;;  %v2883_v2 = vpop.permute.xlu1 %2882  ;;  %v3113_v10 = vmul.f32 %v2888_v1, %v6266_v47  ;;  %3379 = vst.msk [vmem:[%s4918_s8 + $0x108] sm:$0xff] %vm2065_vm5, %v2697_v23 }
 0x3d5   : > { %v3112_v46 = vmul.f32 %v2883_v2, %v6268_v30  ;;  %3381 = vst.msk [vmem:[%s4918_s8 + $0x118] sm:$0xff] %vm2065_vm5, %v2699_v62 }
 0x3d6   : > { %v2191_v58 = vmax.f32 %v2189_v22, %v2190_v61  ;;  %v5684_v0 = vpop.f32.mrf.mxu3  ;;  %3383 = vst.msk [vmem:[%s4918_s8 + $0x128] sm:$0xff] %vm2065_vm5, %v2701_v17  ;;  %v3209_v55 = vsel %vm1799_vm4, %v3113_v10, 0.0 }
 0x3d7   : > { %v3207_v59 = vsel %vm1799_vm4, %v3112_v46, 0.0  ;;  %3382 = vst.msk [vmem:[%s4918_s8 + $0x120] sm:$0xff] %vm2065_vm5, %v2700_v50 }
 0x3d8   : > { %v3208_v18 = vadd.f32 %v3207_v59, %v3206_v53  ;;  %v2274_v48 = vsub.f32 %v5609_v11, %v2191_v58  ;;  %v2275_v32 = vsub.f32 %v5601_v63, %v2191_v58  ;;  %3384 = vst.msk [vmem:[%s4918_s8 + $0x130] sm:$0xff] %vm2065_vm5, %v2702_v49  ;;  %v2276_v24 = vsub.f32 %v5613_v8, %v2191_v58 }
 0x3d9   : > { %v2277_v15 = vsub.f32 %v5618_v35, %v2191_v58  ;;  %3385 = vst.msk [vmem:[%s4918_s8 + $0x138] sm:$0xff] %vm2065_vm5, %v2703_v36  ;;  %v2278_v38 = vsub.f32 %v5626_v19, %v2191_v58  ;;  %v2279_v63 = vsub.f32 %v5631_v7, %v2191_v58  ;;  %v2280_v35 = vsub.f32 %v5636_v51, %v2191_v58 }
 0x3da   : > { %v3210_v41 = vadd.f32 %v3209_v55, %v3208_v18  ;;  %2947 = vperm.xlu2 %3923, %v2699_v62   ;;  %2957 = vperm.xlu1 %3922, %v2701_v17   ;;  %v2378_v28 = vmul.f32 1.442695, %v2274_v48  ;;  %v2380_v14 = vmul.f32 1.442695, %v2275_v32  ;;  %v2382_v11 = vmul.f32 1.442695, %v2276_v24 }
 0x3db   : > { %2952 = vperm.xlu0 %3921, %v2700_v50   ;;  %v2384_v29 = vmul.f32 1.442695, %v2277_v15  ;;  %v2386_v1 = vmul.f32 1.442695, %v2278_v38  ;;  %v2281_v19 = vsub.f32 %v5651_v13, %v2191_v58  ;;  %v2388_v37 = vmul.f32 1.442695, %v2279_v63 }
 0x3dc   : > { %v3211_v42 = vrot.slane %v3210_v41, 4  ;;  %4018 = vpow2.f32 %v2378_v28  ;;  %v2390_v3 = vmul.f32 1.442695, %v2280_v35 }
 0x3dd   : > { %4020 = vpow2.f32 %v2380_v14  ;;  %v2392_v61 = vmul.f32 1.442695, %v2281_v19 }
 0x3de   : > { %v3212_v23 = vadd.f32 %v3211_v42, %v3210_v41  ;;  %v2030_v8 = vpop.f32.mrf.mxu3  ;;  %4022 = vpow2.f32 %v2382_v11 }
 0x3df   : > { %4024 = vpow2.f32 %v2384_v29  ;;  %v5742_v29 = vld [vmem:[#allocation2] ss:$0 sm:$0xff] }
 0x3e0   : > { %v3213_v22 = vrot.slane %v3212_v23, 2  ;;  %4026 = vpow2.f32 %v2386_v1  ;;  %v5750_v1 = vadd.f32 %v5742_v29, %v5660_v20  ;;  %v5753_v19 = vadd.f32 %v5742_v29, %v2030_v8 }
 0x3e1   : > { %4028 = vpow2.f32 %v2388_v37 }
 0x3e2   : > { %v3214_v62 = vadd.f32 %v3213_v22, %v3212_v23  ;;  %v5707_v17 = vpop.eup %4018  ;;  %2962 = vperm.xlu2 %3923, %v2702_v49   ;;  %4030 = vpow2.f32 %v2390_v3  ;;  %v5746_v23 = vadd.f32 %v5742_v29, %v5684_v0  ;;  %v2192_v0 = vsel %vm2065_vm5, %v5750_v1, -inf }
 0x3e3   : > { %v5709_v7 = vpop.eup %4020  ;;  %2967 = vperm.xlu0 %3921, %v2703_v36   ;;  %v2531_v51 = vsel %vm2065_vm5, %v5707_v17, 0.0  ;;  %4032 = vpow2.f32 %v2392_v61  ;;  %v2195_v61 = vsel %vm2065_vm5, %v5753_v19, -inf }
 0x3e4   : > { %v3215_v53 = vrot.slane %v3214_v62, 1  ;;  %v5713_v2 = vpop.eup %4022  ;;  %v2532_v13 = vsel %vm2065_vm5, %v5709_v7, 0.0  ;;  %v2193_v37 = vsel %vm2065_vm5, %v5746_v23, -inf }
 0x3e5   : > { %v5717_v50 = vpop.eup %4024  ;;  %v2533_v10 = vadd.f32 %v2532_v13, %v2531_v51  ;;  %v2534_v44 = vsel %vm2065_vm5, %v5713_v2, 0.0 }
 0x3e6   : > { %v3216_v26 = vadd.f32 %v3215_v53, %v3214_v62  ;;  %v2032_v47 = vpop.f32.mrf.mxu3  ;;  %v5721_v30 = vpop.eup %4026  ;;  %v2536_v58 = vsel %vm2065_vm5, %v5717_v50, 0.0  ;;  %v2194_v53 = vmax.f32 %v2192_v0, %v2193_v37 }
 0x3e7   : > { %v2535_v49 = vadd.f32 %v2534_v44, %v2533_v10  ;;  %v5728_v36 = vpop.eup %4028  ;;  %v2538_v18 = vsel %vm2065_vm5, %v5721_v30, 0.0  ;;  %v5758_v62 = vadd.f32 %v5742_v29, %v2032_v47 }
 0x3e8   : > { %v5724_v46 = vsel %vm3332_vm13, %v3216_v26, %v5564_v43  ;;  %v5732_v48 = vpop.eup %4030  ;;  %v2540_v55 = vsel %vm2065_vm5, %v5728_v36, 0.0  ;;  %v2196_v47 = vmax.f32 %v2194_v53, %v2195_v61 }
 0x3e9   : > { %v2537_v59 = vadd.f32 %v2536_v58, %v2535_v49  ;;  %v5736_v24 = vpop.eup %4032  ;;  %v2542_v41 = vsel %vm2065_vm5, %v5732_v48, 0.0  ;;  %v2197_v13 = vsel %vm2065_vm5, %v5758_v62, -inf }
 0x3ea   : > { %v2544_v28 = vsel %vm2065_vm5, %v5736_v24, 0.0  ;;  %v2198_v49 = vmax.f32 %v2196_v47, %v2197_v13 }
 0x3eb   : > { %v2539_v32 = vadd.f32 %v2538_v18, %v2537_v59 }
 0x3ec   : > { %v2903_v58 = vpop.permute.xlu2 %2902 }
 0x3ed   : > { %v2541_v15 = vadd.f32 %v2540_v55, %v2539_v32 }
 0x3ee   : > { %v2035_v43 = vpop.f32.mrf.mxu3 }
 0x3ef   : > { %v2543_v38 = vadd.f32 %v2542_v41, %v2541_v15  ;;  %v5765_v20 = vadd.f32 %v5742_v29, %v2035_v43  ;;  %v6269_v43 = vld [vmem:[#allocation9_spill] sm:$0xff] }
 0x3f0   : > { %v6270_v15 = vmax.f32 %v6269_v43, 0.0 }
 0x3f1   : > { %v2545_v14 = vadd.f32 %v2544_v28, %v2543_v38  ;;  %v2199_v10 = vsel %vm2065_vm5, %v5765_v20, -inf }
 0x3f2   : > { %v2200_v18 = vmax.f32 %v2198_v49, %v2199_v10 }
 0x3f3   : > { %v2546_v11 = vrot.slane %v2545_v14, 4 }
 0x3f5   : > { %v2547_v63 = vadd.f32 %v2546_v11, %v2545_v14  ;;  %v6271_v14 = vld [vmem:[#allocation10_spill] sm:$0xff] }
 0x3f6   : > { %v2037_v42 = vpop.f32.mrf.mxu3  ;;  %v6272_v11 = vmax.f32 %v6271_v14, 0.0  ;;  %v2918_v14 = vpop.permute.xlu2 %2917 }
 0x3f7   : > { %v2548_v35 = vrot.slane %v2547_v63, 2  ;;  %v5770_v26 = vadd.f32 %v5742_v29, %v2037_v42 }
 0x3f8   : > { %v3116_v42 = vmul.f32 %v2903_v58, %v6272_v11 }
 0x3f9   : > { %v2549_v22 = vadd.f32 %v2548_v35, %v2547_v63  ;;  %v2201_v59 = vsel %vm2065_vm5, %v5770_v26, -inf  ;;  %v6273_v35 = vld [vmem:[#allocation8_spill] sm:$0xff] }
 0x3fa   : > { %v2202_v63 = vmax.f32 %v2200_v18, %v2201_v59  ;;  %v3220_v58 = vsel %vm1799_vm4, %v3116_v42, 0.0 }
 0x3fb   : > { %v2550_v3 = vrot.slane %v2549_v22, 1 }
 0x3fd   : > { %v2551_v51 = vadd.f32 %v2550_v3, %v2549_v22  ;;  %v6274_v22 = vmax.f32 %v6273_v35, 0.0  ;;  %v6275_v35 = vld [vmem:[#allocation12_spill] sm:$0xff] }
 0x3fe   : > { %v2040_v8 = vpop.f32.mrf.mxu3 }
 0x3ff   : > { %4034 = vrcp.f32 %v2551_v51  ;;  %v5775_v44 = vadd.f32 %v5742_v29, %v2040_v8  ;;  %v2715_v18 = vand.u32 2147483648, %v2551_v51  ;;  %vm2709_vm15 = vweird.f32 %v2551_v51 }
 0x401   : > { %v2203_v55 = vsel %vm2065_vm5, %v5775_v44, -inf }
 0x402   : > { %v2204_v8 = vmax.f32 %v2202_v63, %v2203_v55 }
 0x404   : > { %v2898_v32 = vpop.permute.xlu1 %2897 }
 0x405   : > { %v3115_v41 = vmul.f32 %v2898_v32, %v6270_v15  ;;  %v2893_v38 = vpop.permute.xlu0 %2892  ;;  %v4035_v28 = vpop.eup %4034  ;;  %v2713_v15 = vand.u32 2147483647, %v2551_v51 }
 0x406   : > { %v3114_v37 = vmul.f32 %v2893_v38, %v6274_v22  ;;  %v2042_v3 = vpop.f32.mrf.mxu3  ;;  %v2705_v53 = vmul.f32 %v4035_v28, %v2551_v51  ;;  %vm2710_vm14 = vweird.f32 %v4035_v28  ;;  %v6276_v22 = vmax.f32 %v6275_v35, 0.0 }
 0x407   : > { %v3218_v0 = vsel %vm1799_vm4, %v3115_v41, 0.0  ;;  %v5789_v61 = vadd.f32 %v5742_v29, %v2042_v3  ;;  %v6277_v3 = vld [vmem:[#allocation11_spill] sm:$0xff]  ;;  %vm2711_vm0 = vmor %vm2709_vm15, %vm2710_vm14  ;;  %vm2714_vm1 = vcmp.eq.f32.partialorder %v2713_v15, 8.507059e+37  ;;  %vm3340_vm14 = vcmask 1046534  }
 0x408   : > { %v3217_v13 = vsel %vm1799_vm4, %v3114_v37, 0.0  ;;  %v2706_v49 = vsub.f32 1.0, %v2705_v53  ;;  %vm3342_vm15 = vcmask 1047559  }
 0x409   : > { %v3219_v47 = vadd.f32 %v3218_v0, %v3217_v13  ;;  %v2205_v10 = vsel %vm2065_vm5, %v5789_v61, -inf  ;;  %v6278_v0 = vmax.f32 %v6277_v3, 0.0 }
 0x40a   : > { %v2206_v59 = vmax.f32 %v2204_v8, %v2205_v10  ;;  %v2707_v43 = vmul.f32 %v4035_v28, %v2706_v49  ;;  %v2716_v8 = vor.u32 1.1754944e-38, %v2715_v18 }
 0x40b   : > { %v3221_v32 = vadd.f32 %v3220_v58, %v3219_v47  ;;  %v6279_v47 = vld [vmem:[#allocation13_spill] sm:$0xff] }
 0x40c   : > { %v2207_v41 = vrot.slane %v2206_v59, 4  ;;  %v2913_v38 = vpop.permute.xlu1 %2912  ;;  %v2708_v55 = vadd.f32 %v4035_v28, %v2707_v43  ;;  %v6280_v10 = vmax.f32 %v6279_v47, 0.0 }
 0x40d   : > { %v2908_v11 = vpop.permute.xlu0 %2907  ;;  %v3118_v37 = vmul.f32 %v2913_v38, %v6276_v22 }
 0x40e   : > { %v2208_v63 = vmax.f32 %v2206_v59, %v2207_v41  ;;  %v3117_v53 = vmul.f32 %v2908_v11, %v6278_v0  ;;  %v5799_v42 = vpop.f32.mrf.mxu3  ;;  %v2712_v13 = vsel %vm2711_vm0, %v4035_v28, %v2708_v55  ;;  %v3119_v49 = vmul.f32 %v2918_v14, %v6280_v10  ;;  %v6283_v0 = vld [vmem:[#allocation14_spill] sm:$0xff] }
 0x40f   : > { %v2717_v59 = vsel %vm2714_vm1, %v2716_v8, %v2712_v13  ;;  %v3224_v35 = vsel %vm1799_vm4, %v3118_v37, 0.0 }
 0x410   : > { %v2209_v58 = vrot.slane %v2208_v63, 2  ;;  %v3222_v51 = vsel %vm1799_vm4, %v3117_v53, 0.0  ;;  %v2719_v41 = vmul.f32 %v5709_v7, %v2717_v59  ;;  %v2718_v38 = vmul.f32 %v5707_v17, %v2717_v59 }
 0x411   : > { %v3223_v43 = vadd.f32 %v3222_v51, %v3221_v32  ;;  %v2720_v28 = vmul.f32 %v5713_v2, %v2717_v59  ;;  %v2722_v18 = vmul.f32 %v5721_v30, %v2717_v59  ;;  %v2721_v32 = vmul.f32 %v5717_v50, %v2717_v59  ;;  %v6281_v50 = vld [vmem:[#allocation15_spill] sm:$0xff] }
 0x412   : > { %v2210_v11 = vmax.f32 %v2208_v63, %v2209_v58  ;;  %3387 = vst.msk [vmem:[%s4918_s8 + $0x148] sm:$0xff] %vm2065_vm5, %v2719_v41  ;;  %2977 = vperm.xlu2 %3923, %v2719_v41   ;;  %2972 = vperm.xlu1 %3922, %v2718_v38   ;;  %v3226_v7 = vsel %vm1799_vm4, %v3119_v49, 0.0  ;;  %v2723_v2 = vmul.f32 %v5728_v36, %v2717_v59  ;;  %v6282_v37 = vmax.f32 %v6281_v50, 0.0 }
 0x413   : > { %v3225_v15 = vadd.f32 %v3224_v35, %v3223_v43  ;;  %3386 = vst.msk [vmem:[%s4918_s8 + $0x140] sm:$0xff] %vm2065_vm5, %v2718_v38  ;;  %2982 = vperm.xlu0 %3921, %v2720_v28   ;;  %v2725_v63 = vmul.f32 %v5736_v24, %v2717_v59  ;;  %v6284_v53 = vmax.f32 %v6283_v0, 0.0  ;;  %v2724_v36 = vmul.f32 %v5732_v48, %v2717_v59 }
 0x414   : > { %v2211_v17 = vrot.slane %v2210_v11, 1  ;;  %v2928_v14 = vpop.permute.xlu1 %2927  ;;  %3388 = vst.msk [vmem:[%s4918_s8 + $0x150] sm:$0xff] %vm2065_vm5, %v2720_v28 }
 0x415   : > { %v3227_v30 = vadd.f32 %v3226_v7, %v3225_v15  ;;  %v2923_v55 = vpop.permute.xlu0 %2922  ;;  %v3121_v3 = vmul.f32 %v2928_v14, %v6282_v37  ;;  %3390 = vst.msk [vmem:[%s4918_s8 + $0x160] sm:$0xff] %vm2065_vm5, %v2722_v18 }
 0x416   : > { %v2212_v22 = vmax.f32 %v2210_v11, %v2211_v17  ;;  %v3120_v8 = vmul.f32 %v2923_v55, %v6284_v53  ;;  %v5823_v13 = vpop.f32.mrf.mxu3  ;;  %3389 = vst.msk [vmem:[%s4918_s8 + $0x158] sm:$0xff] %vm2065_vm5, %v2721_v32 }
 0x417   : > { %3391 = vst.msk [vmem:[%s4918_s8 + $0x168] sm:$0xff] %vm2065_vm5, %v2723_v2  ;;  %v3230_v43 = vsel %vm1799_vm4, %v3121_v3, 0.0 }
 0x418   : > { %v3228_v47 = vsel %vm1799_vm4, %v3120_v8, 0.0  ;;  %v2282_v24 = vsub.f32 %v5750_v1, %v2212_v22  ;;  %v2283_v10 = vsub.f32 %v5746_v23, %v2212_v22  ;;  %3393 = vst.msk [vmem:[%s4918_s8 + $0x178] sm:$0xff] %vm2065_vm5, %v2725_v63  ;;  %v2284_v58 = vsub.f32 %v5753_v19, %v2212_v22 }
 0x419   : > { %v3229_v49 = vadd.f32 %v3228_v47, %v3227_v30  ;;  %v2285_v51 = vsub.f32 %v5758_v62, %v2212_v22  ;;  %3392 = vst.msk [vmem:[%s4918_s8 + $0x170] sm:$0xff] %vm2065_vm5, %v2724_v36  ;;  %v2286_v48 = vsub.f32 %v5765_v20, %v2212_v22  ;;  %v2287_v23 = vsub.f32 %v5770_v26, %v2212_v22 }
 0x41a   : > { %2992 = vperm.xlu2 %3923, %v2722_v18   ;;  %2987 = vperm.xlu1 %3922, %v2721_v32   ;;  %v2394_v41 = vmul.f32 1.442695, %v2282_v24  ;;  %v2396_v1 = vmul.f32 1.442695, %v2283_v10  ;;  %v2398_v38 = vmul.f32 1.442695, %v2284_v58  ;;  %v2288_v62 = vsub.f32 %v5775_v44, %v2212_v22 }
 0x41b   : > { %v3231_v59 = vadd.f32 %v3230_v43, %v3229_v49  ;;  %2997 = vperm.xlu0 %3921, %v2723_v2   ;;  %v2400_v11 = vmul.f32 1.442695, %v2285_v51  ;;  %v2402_v28 = vmul.f32 1.442695, %v2286_v48  ;;  %v2289_v20 = vsub.f32 %v5789_v61, %v2212_v22 }
 0x41c   : > { %4036 = vpow2.f32 %v2394_v41  ;;  %v2404_v18 = vmul.f32 1.442695, %v2287_v23  ;;  %v2406_v7 = vmul.f32 1.442695, %v2288_v62  ;;  %v5883_v62 = vadd.f32 %v5742_v29, %v5823_v13 }
 0x41d   : > { %v3232_v35 = vrot.slane %v3231_v59, 4  ;;  %4038 = vpow2.f32 %v2396_v1  ;;  %v2408_v2 = vmul.f32 1.442695, %v2289_v20 }
 0x41e   : > { %v2050_v19 = vpop.f32.mrf.mxu3  ;;  %4040 = vpow2.f32 %v2398_v38 }
 0x41f   : > { %v3233_v15 = vadd.f32 %v3232_v35, %v3231_v59  ;;  %4042 = vpow2.f32 %v2400_v11  ;;  %v5890_v20 = vadd.f32 %v5742_v29, %v2050_v19 }
 0x420   : > { %4044 = vpow2.f32 %v2402_v28 }
 0x421   : > { %v3234_v32 = vrot.slane %v3233_v15, 2  ;;  %4046 = vpow2.f32 %v2404_v18 }
 0x422   : > { %v5846_v17 = vpop.eup %4036  ;;  %3007 = vperm.xlu2 %3923, %v2725_v63   ;;  %3002 = vperm.xlu1 %3922, %v2724_v36   ;;  %4048 = vpow2.f32 %v2406_v7 }
 0x423   : > { %v3235_v26 = vadd.f32 %v3234_v32, %v3233_v15  ;;  %v5848_v14 = vpop.eup %4038  ;;  %v2552_v44 = vsel %vm2065_vm5, %v5846_v17, 0.0  ;;  %4050 = vpow2.f32 %v2408_v2  ;;  %v5887_v15 = vadd.f32 %v5742_v29, %v5799_v42 }
 0x424   : > { %v5852_v30 = vpop.eup %4040  ;;  %v2553_v55 = vsel %vm2065_vm5, %v5848_v14, 0.0  ;;  %v2214_v32 = vsel %vm2065_vm5, %v5883_v62, -inf }
 0x425   : > { %v3236_v61 = vrot.slane %v3235_v26, 1  ;;  %v5856_v22 = vpop.eup %4042  ;;  %v2554_v37 = vadd.f32 %v2553_v55, %v2552_v44  ;;  %v2555_v3 = vsel %vm2065_vm5, %v5852_v30, 0.0  ;;  %v2213_v13 = vsel %vm2065_vm5, %v5887_v15, -inf }
 0x426   : > { %v2052_v50 = vpop.f32.mrf.mxu3  ;;  %v5860_v0 = vpop.eup %4044  ;;  %v2557_v8 = vsel %vm2065_vm5, %v5856_v22, 0.0  ;;  %v2216_v44 = vsel %vm2065_vm5, %v5890_v20, -inf  ;;  %v2215_v19 = vmax.f32 %v2213_v13, %v2214_v32  ;;  %v6289_v32 = vld [vmem:[#allocation17_spill] sm:$0xff] }
 0x427   : > { %v3237_v63 = vadd.f32 %v3236_v61, %v3235_v26  ;;  %v2556_v53 = vadd.f32 %v2555_v3, %v2554_v37  ;;  %v5867_v47 = vpop.eup %4046  ;;  %v2559_v10 = vsel %vm2065_vm5, %v5860_v0, 0.0  ;;  %v5895_v7 = vadd.f32 %v5742_v29, %v2052_v50 }
 0x428   : > { %v5871_v49 = vpop.eup %4048  ;;  %v2561_v51 = vsel %vm2065_vm5, %v5867_v47, 0.0 }
 0x429   : > { %v5865_v36 = vsel %vm3334_vm2, %v3237_v63, %v5724_v46  ;;  %v2558_v24 = vadd.f32 %v2557_v8, %v2556_v53  ;;  %v5875_v43 = vpop.eup %4050  ;;  %v2563_v46 = vsel %vm2065_vm5, %v5871_v49, 0.0  ;;  %v2218_v37 = vsel %vm2065_vm5, %v5895_v7, -inf }
 0x42a   : > { %v2565_v1 = vsel %vm2065_vm5, %v5875_v43, 0.0  ;;  %v2217_v63 = vmax.f32 %v2215_v19, %v2216_v44 }
 0x42b   : > { %v2560_v58 = vadd.f32 %v2559_v10, %v2558_v24 }
 0x42c   : > { %v2933_v26 = vpop.permute.xlu2 %2932  ;;  %v2219_v8 = vmax.f32 %v2217_v63, %v2218_v37 }
 0x42d   : > { %v2562_v59 = vadd.f32 %v2561_v51, %v2560_v58  ;;  %v6285_v58 = vld [vmem:[#allocation16_spill] sm:$0xff] }
 0x42e   : > { %v2055_v48 = vpop.f32.mrf.mxu3  ;;  %v6286_v51 = vmax.f32 %v6285_v58, 0.0 }
 0x42f   : > { %v2564_v41 = vadd.f32 %v2563_v46, %v2562_v59  ;;  %v5902_v42 = vadd.f32 %v5742_v29, %v2055_v48 }
 0x430   : > { %v3122_v48 = vmul.f32 %v2933_v26, %v6286_v51 }
 0x431   : > { %v2566_v23 = vadd.f32 %v2565_v1, %v2564_v41  ;;  %v2220_v3 = vsel %vm2065_vm5, %v5902_v42, -inf }
 0x432   : > { %v2221_v10 = vmax.f32 %v2219_v8, %v2220_v3  ;;  %v6291_v8 = vld [vmem:[#allocation19_spill] sm:$0xff] }
 0x433   : > { %v2567_v38 = vrot.slane %v2566_v23, 4 }
 0x434   : > { %v2948_v59 = vpop.permute.xlu2 %2947 }
 0x435   : > { %v2568_v35 = vadd.f32 %v2567_v38, %v2566_v23 }
 0x436   : > { %v2057_v11 = vpop.f32.mrf.mxu3 }
 0x437   : > { %v2569_v28 = vrot.slane %v2568_v35, 2  ;;  %v5907_v50 = vadd.f32 %v5742_v29, %v2057_v11 }
 0x439   : > { %v2570_v18 = vadd.f32 %v2569_v28, %v2568_v35  ;;  %v2222_v24 = vsel %vm2065_vm5, %v5907_v50, -inf  ;;  %v6287_v35 = vld [vmem:[#allocation18_spill] sm:$0xff] }
 0x43a   : > { %v2223_v23 = vmax.f32 %v2221_v10, %v2222_v24  ;;  %v6288_v28 = vmax.f32 %v6287_v35, 0.0  ;;  %v6292_v24 = vmax.f32 %v6291_v8, 0.0 }
 0x43b   : > { %v2571_v2 = vrot.slane %v2570_v18, 1 }
 0x43c   : > { %v3125_v10 = vmul.f32 %v2948_v59, %v6292_v24  ;;  %v6293_v59 = vld [vmem:[#allocation21_spill] sm:$0xff] }
 0x43d   : > { %v2572_v55 = vadd.f32 %v2571_v2, %v2570_v18  ;;  %v6290_v2 = vmax.f32 %v6289_v32, 0.0 }
 0x43e   : > { %v2060_v61 = vpop.f32.mrf.mxu3 }
 0x43f   : > { %4052 = vrcp.f32 %v2572_v55  ;;  %v5912_v53 = vadd.f32 %v5742_v29, %v2060_v61  ;;  %v3238_v61 = vsel %vm1799_vm4, %v3122_v48, 0.0  ;;  %vm2731_vm6 = vweird.f32 %v2572_v55 }
 0x441   : > { %v2224_v46 = vsel %vm2065_vm5, %v5912_v53, -inf }
 0x442   : > { %v2225_v26 = vmax.f32 %v2223_v23, %v2224_v46 }
 0x444   : > { %v2943_v41 = vpop.permute.xlu1 %2942 }
 0x445   : > { %v4053_v1 = vpop.eup %4052  ;;  %v2938_v38 = vpop.permute.xlu0 %2937  ;;  %v3124_v18 = vmul.f32 %v2943_v41, %v6288_v28  ;;  %v2737_v41 = vand.u32 2147483648, %v2572_v55  ;;  %v3243_v28 = vsel %vm1799_vm4, %v3125_v10, 0.0 }
 0x446   : > { %v2062_v11 = vpop.f32.mrf.mxu3  ;;  %v3123_v13 = vmul.f32 %v2938_v38, %v6290_v2  ;;  %v2727_v19 = vmul.f32 %v4053_v1, %v2572_v55  ;;  %vm2732_vm3 = vweird.f32 %v4053_v1 }
 0x447   : > { %v5925_v44 = vadd.f32 %v5742_v29, %v2062_v11  ;;  %v3241_v38 = vsel %vm1799_vm4, %v3124_v18, 0.0  ;;  %v2735_v11 = vand.u32 2147483647, %v2572_v55  ;;  %vm2733_vm7 = vmor %vm2731_vm6, %vm2732_vm3 }
 0x448   : > { %v3239_v37 = vsel %vm1799_vm4, %v3123_v13, 0.0  ;;  %v2728_v3 = vsub.f32 1.0, %v2727_v19  ;;  %v2738_v13 = vor.u32 1.1754944e-38, %v2737_v41  ;;  %v6294_v19 = vmax.f32 %v6293_v59, 0.0 }
 0x449   : > { %v2226_v63 = vsel %vm2065_vm5, %v5925_v44, -inf  ;;  %v3240_v58 = vadd.f32 %v3239_v37, %v3238_v61  ;;  %v6295_v61 = vld [vmem:[#allocation20_spill] sm:$0xff]  ;;  %vm2736_vm8 = vcmp.eq.f32.partialorder %v2735_v11, 8.507059e+37 }
 0x44a   : > { %v2227_v51 = vmax.f32 %v2225_v26, %v2226_v63  ;;  %v2729_v29 = vmul.f32 %v4053_v1, %v2728_v3  ;;  %v6296_v37 = vmax.f32 %v6295_v61, 0.0  ;;  %v2963_v3 = vpop.permute.xlu2 %2962 }
 0x44b   : > { %v3242_v46 = vadd.f32 %v3241_v38, %v3240_v58 }
 0x44c   : > { %v2228_v23 = vrot.slane %v2227_v51, 4  ;;  %v2958_v48 = vpop.permute.xlu1 %2957  ;;  %v2730_v35 = vadd.f32 %v4053_v1, %v2729_v29 }
 0x44d   : > { %v2953_v2 = vpop.permute.xlu0 %2952  ;;  %v3127_v26 = vmul.f32 %v2958_v48, %v6294_v19  ;;  %v3244_v24 = vadd.f32 %v3243_v28, %v3242_v46 }
 0x44e   : > { %v2229_v32 = vmax.f32 %v2227_v51, %v2228_v23  ;;  %v3126_v18 = vmul.f32 %v2953_v2, %v6296_v37  ;;  %v2734_v63 = vsel %vm2733_vm7, %v4053_v1, %v2730_v35  ;;  %v6297_v1 = vld [vmem:[#allocation22_spill] sm:$0xff] }
 0x44f   : > { %v2739_v58 = vsel %vm2736_vm8, %v2738_v13, %v2734_v63  ;;  %v6298_v11 = vmax.f32 %v6297_v1, 0.0  ;;  %v3247_v46 = vsel %vm1799_vm4, %v3127_v26, 0.0  ;;  %v6299_v13 = vld [vmem:[#allocation23_spill] sm:$0xff] }
 0x450   : > { %v2230_v8 = vrot.slane %v2229_v32, 2  ;;  %v3245_v55 = vsel %vm1799_vm4, %v3126_v18, 0.0  ;;  %v2742_v10 = vmul.f32 %v5852_v30, %v2739_v58  ;;  %v2741_v51 = vmul.f32 %v5848_v14, %v2739_v58 }
 0x451   : > { %v2740_v41 = vmul.f32 %v5846_v17, %v2739_v58  ;;  %v3246_v29 = vadd.f32 %v3245_v55, %v3244_v24  ;;  %v2744_v23 = vmul.f32 %v5860_v0, %v2739_v58  ;;  %v3128_v48 = vmul.f32 %v2963_v3, %v6298_v11 }
 0x452   : > { %v2231_v38 = vmax.f32 %v2229_v32, %v2230_v8  ;;  %3396 = vst.msk [vmem:[%s4918_s8 + $0x190] sm:$0xff] %vm2065_vm5, %v2742_v10  ;;  %3022 = vperm.xlu2 %3923, %v2742_v10   ;;  %3017 = vperm.xlu1 %3922, %v2741_v51   ;;  %v2743_v14 = vmul.f32 %v5856_v22, %v2739_v58  ;;  %v6300_v59 = vmax.f32 %v6299_v13, 0.0 }
 0x453   : > { %v3248_v17 = vadd.f32 %v3247_v46, %v3246_v29  ;;  %3395 = vst.msk [vmem:[%s4918_s8 + $0x188] sm:$0xff] %vm2065_vm5, %v2741_v51  ;;  %3012 = vperm.xlu0 %3921, %v2740_v41   ;;  %v2745_v0 = vmul.f32 %v5867_v47, %v2739_v58  ;;  %v2746_v35 = vmul.f32 %v5871_v49, %v2739_v58  ;;  %v3249_v2 = vsel %vm1799_vm4, %v3128_v48, 0.0 }
 0x454   : > { %v2232_v30 = vrot.slane %v2231_v38, 1  ;;  %3394 = vst.msk [vmem:[%s4918_s8 + $0x180] sm:$0xff] %vm2065_vm5, %v2740_v41  ;;  %v5959_v22 = vmul.f32 %v5875_v43, %v2739_v58 }
 0x455   : > { %v2968_v32 = vpop.permute.xlu0 %2967  ;;  %3398 = vst.msk [vmem:[%s4918_s8 + $0x1a0] sm:$0xff] %vm2065_vm5, %v2744_v23  ;;  %v3250_v47 = vadd.f32 %v3249_v2, %v3248_v17 }
 0x456   : > { %v2233_v28 = vmax.f32 %v2231_v38, %v2232_v30  ;;  %v3129_v19 = vmul.f32 %v2968_v32, %v6300_v59  ;;  %3397 = vst.msk [vmem:[%s4918_s8 + $0x198] sm:$0xff] %vm2065_vm5, %v2743_v14 }
 0x457   : > { %3399 = vst.msk [vmem:[%s4918_s8 + $0x1a8] sm:$0xff] %vm2065_vm5, %v2745_v0 }
 0x458   : > { %v2290_v49 = vsub.f32 %v5887_v15, %v2233_v28  ;;  %v2291_v26 = vsub.f32 %v5883_v62, %v2233_v28  ;;  %v2292_v61 = vsub.f32 %v5890_v20, %v2233_v28  ;;  %v3251_v37 = vsel %vm1799_vm4, %v3129_v19, 0.0  ;;  %3400 = vst.msk [vmem:[%s4918_s8 + $0x1b0] sm:$0xff] %vm2065_vm5, %v2746_v35 }
 0x459   : > { %v2293_v43 = vsub.f32 %v5895_v7, %v2233_v28  ;;  %v3252_v18 = vadd.f32 %v3251_v37, %v3250_v47  ;;  %v2294_v63 = vsub.f32 %v5902_v42, %v2233_v28  ;;  %3401 = vst.msk [vmem:[%s4918_s8 + $0x1b8] sm:$0xff] %vm2065_vm5, %v5959_v22  ;;  %v2295_v62 = vsub.f32 %v5907_v50, %v2233_v28 }
 0x45a   : > { %v2410_v3 = vmul.f32 1.442695, %v2290_v49  ;;  %3032 = vperm.xlu1 %3922, %v2744_v23   ;;  %v2412_v8 = vmul.f32 1.442695, %v2291_v26  ;;  %v2414_v15 = vmul.f32 1.442695, %v2292_v61  ;;  %v2296_v55 = vsub.f32 %v5912_v53, %v2233_v28 }
 0x45b   : > { %v3253_v24 = vrot.slane %v3252_v18, 4  ;;  %3027 = vperm.xlu0 %3921, %v2743_v14   ;;  %v2416_v20 = vmul.f32 1.442695, %v2293_v43  ;;  %v2418_v7 = vmul.f32 1.442695, %v2294_v63  ;;  %v2297_v42 = vsub.f32 %v5925_v44, %v2233_v28 }
 0x45c   : > { %4054 = vpow2.f32 %v2410_v3  ;;  %v2420_v51 = vmul.f32 1.442695, %v2295_v62  ;;  %v2422_v38 = vmul.f32 1.442695, %v2296_v55 }
 0x45d   : > { %v3254_v58 = vadd.f32 %v3253_v24, %v3252_v18  ;;  %4056 = vpow2.f32 %v2412_v8  ;;  %v2424_v50 = vmul.f32 1.442695, %v2297_v42 }
 0x45e   : > { %4058 = vpow2.f32 %v2414_v15 }
 0x45f   : > { %v3255_v10 = vrot.slane %v3254_v58, 2  ;;  %4060 = vpow2.f32 %v2416_v20 }
 0x460   : > { %4062 = vpow2.f32 %v2418_v7 }
 0x461   : > { %v3256_v41 = vadd.f32 %v3255_v10, %v3254_v58  ;;  %4064 = vpow2.f32 %v2420_v51 }
 0x462   : > { %v4055_v29 = vpop.eup %4054  ;;  %3037 = vperm.xlu1 %3922, %v2745_v0   ;;  %4066 = vpow2.f32 %v2422_v38 }
 0x463   : > { %v4057_v23 = vpop.eup %4056  ;;  %v3257_v1 = vrot.slane %v3256_v41, 1  ;;  %3042 = vperm.xlu0 %3921, %v2746_v35   ;;  %v2573_v53 = vsel %vm2065_vm5, %v4055_v29, 0.0  ;;  %4068 = vpow2.f32 %v2424_v50 }
 0x464   : > { %v4059_v11 = vpop.eup %4058  ;;  %v2574_v48 = vsel %vm2065_vm5, %v4057_v23, 0.0 }
 0x465   : > { %v4061_v44 = vpop.eup %4060  ;;  %v3258_v46 = vadd.f32 %v3257_v1, %v3256_v41  ;;  %v2575_v14 = vadd.f32 %v2574_v48, %v2573_v53  ;;  %v2576_v30 = vsel %vm2065_vm5, %v4059_v11, 0.0 }
 0x466   : > { %v4063_v17 = vpop.eup %4062  ;;  %v2578_v35 = vsel %vm2065_vm5, %v4061_v44, 0.0 }
 0x467   : > { %v2577_v0 = vadd.f32 %v2576_v30, %v2575_v14  ;;  %v5986_v28 = vsel %vm3336_vm9, %v3258_v46, %v5865_v36  ;;  %v4065_v32 = vpop.eup %4064  ;;  %v2580_v13 = vsel %vm2065_vm5, %v4063_v17, 0.0 }
 0x468   : > { %v4067_v59 = vpop.eup %4066  ;;  %v2582_v47 = vsel %vm2065_vm5, %v4065_v32, 0.0 }
 0x469   : > { %v2579_v2 = vadd.f32 %v2578_v35, %v2577_v0  ;;  %v4069_v49 = vpop.eup %4068  ;;  %v2584_v61 = vsel %vm2065_vm5, %v4067_v59, 0.0 }
 0x46a   : > { %v2586_v43 = vsel %vm2065_vm5, %v4069_v49, 0.0 }
 0x46b   : > { %v2581_v19 = vadd.f32 %v2580_v13, %v2579_v2 }
 0x46d   : > { %v2583_v26 = vadd.f32 %v2582_v47, %v2581_v19 }
 0x46f   : > { %v2585_v37 = vadd.f32 %v2584_v61, %v2583_v26 }
 0x471   : > { %v2587_v18 = vadd.f32 %v2586_v43, %v2585_v37  ;;  %v6303_v37 = vld [vmem:[#allocation25_spill] sm:$0xff] }
 0x472   : > { %v6304_v43 = vmax.f32 %v6303_v37, 0.0 }
 0x473   : > { %v2588_v36 = vrot.slane %v2587_v18, 4 }
 0x475   : > { %v2589_v63 = vadd.f32 %v2588_v36, %v2587_v18 }
 0x477   : > { %v2590_v3 = vrot.slane %v2589_v63, 2 }
 0x479   : > { %v2591_v8 = vadd.f32 %v2590_v3, %v2589_v63 }
 0x47b   : > { %v2592_v15 = vrot.slane %v2591_v8, 1 }
 0x47d   : > { %v2593_v24 = vadd.f32 %v2592_v15, %v2591_v8  ;;  %v6307_v8 = vld [vmem:[#allocation32_spill] sm:$0xff] }
 0x47e   : > { %v6308_v15 = vmax.f32 %v6307_v8, 0.0 }
 0x47f   : > { %4070 = vrcp.f32 %v2593_v24  ;;  %v2759_v55 = vand.u32 2147483648, %v2593_v24  ;;  %v2757_v42 = vand.u32 2147483647, %v2593_v24  ;;  %vm2753_vm11 = vweird.f32 %v2593_v24 }
 0x481   : > { %v2760_v51 = vor.u32 1.1754944e-38, %v2759_v55  ;;  %vm2758_vm13 = vcmp.eq.f32.partialorder %v2757_v42, 8.507059e+37  ;;  %v6309_v55 = vld [vmem:[#allocation26_spill] sm:$0xff] }
 0x485   : > { %v4071_v62 = vpop.eup %4070  ;;  %v2983_v0 = vpop.permute.xlu0 %2982 }
 0x486   : > { %v2749_v20 = vmul.f32 %v4071_v62, %v2593_v24  ;;  %vm2754_vm10 = vweird.f32 %v4071_v62 }
 0x487   : > { %vm2755_vm12 = vmor %vm2753_vm11, %vm2754_vm10 }
 0x488   : > { %v2750_v58 = vsub.f32 1.0, %v2749_v20 }
 0x48a   : > { %v2751_v7 = vmul.f32 %v4071_v62, %v2750_v58 }
 0x48c   : > { %v2752_v10 = vadd.f32 %v4071_v62, %v2751_v7  ;;  %v6310_v7 = vmax.f32 %v6309_v55, 0.0  ;;  %v6321_v55 = vld [vmem:[#allocation31_spill] sm:$0xff] }
 0x48d   : > { %v2998_v2 = vpop.permute.xlu0 %2997 }
 0x48e   : > { %v2756_v41 = vsel %vm2755_vm12, %v4071_v62, %v2752_v10  ;;  %v3132_v42 = vmul.f32 %v2983_v0, %v6310_v7  ;;  %v6311_v10 = vld [vmem:[#allocation27_spill] sm:$0xff] }
 0x48f   : > { %v2761_v38 = vsel %vm2758_vm13, %v2760_v51, %v2756_v41  ;;  %v6312_v51 = vmax.f32 %v6311_v10, 0.0 }
 0x490   : > { %v2762_v50 = vmul.f32 %v4055_v29, %v2761_v38  ;;  %v2764_v1 = vmul.f32 %v4059_v11, %v2761_v38  ;;  %v2763_v53 = vmul.f32 %v4057_v23, %v2761_v38  ;;  %v2765_v48 = vmul.f32 %v4061_v44, %v2761_v38  ;;  %v2978_v23 = vpop.permute.xlu2 %2977  ;;  %v2973_v11 = vpop.permute.xlu1 %2972 }
 0x491   : > { %v2768_v46 = vmul.f32 %v4067_v59, %v2761_v38  ;;  %v2766_v14 = vmul.f32 %v4063_v17, %v2761_v38  ;;  %v2767_v30 = vmul.f32 %v4065_v32, %v2761_v38  ;;  %v2769_v29 = vmul.f32 %v4069_v49, %v2761_v38  ;;  %v6301_v49 = vld [vmem:[#allocation24_spill] sm:$0xff] }
 0x492   : > { %3402 = vst.msk [vmem:[%s4918_s8 + $0x1c0] sm:$0xff] %vm2065_vm5, %v2762_v50  ;;  %3052 = vperm.xlu2 %3923, %v2762_v50   ;;  %3062 = vperm.xlu1 %3922, %v2764_v1   ;;  %v6302_v26 = vmax.f32 %v6301_v49, 0.0  ;;  %v3131_v18 = vmul.f32 %v2978_v23, %v6304_v43  ;;  %v6316_v43 = vld [vmem:[#allocation29_spill] sm:$0xff] }
 0x493   : > { %3404 = vst.msk [vmem:[%s4918_s8 + $0x1d0] sm:$0xff] %vm2065_vm5, %v2764_v1  ;;  %3057 = vperm.xlu0 %3921, %v2763_v53  }
 0x494   : > { %3403 = vst.msk [vmem:[%s4918_s8 + $0x1c8] sm:$0xff] %vm2065_vm5, %v2763_v53  ;;  %v3130_v61 = vmul.f32 %v2973_v11, %v6302_v26  ;;  %v3260_v58 = vsel %vm1799_vm4, %v3131_v18, 0.0  ;;  %v6313_v11 = vld [vmem:[#allocation28_spill] sm:$0xff]  ;;  %v6317_v18 = vmax.f32 %v6316_v43, 0.0  ;;  %v6327_v43 = vmax.f32 %v5592_v39, 0.0 }
 0x495   : > { %3405 = vst.msk [vmem:[%s4918_s8 + $0x1d8] sm:$0xff] %vm2065_vm5, %v2765_v48 }
 0x496   : > { %3408 = vst.msk [vmem:[%s4918_s8 + $0x1f0] sm:$0xff] %vm2065_vm5, %v2768_v46  ;;  %v3259_v62 = vsel %vm1799_vm4, %v3130_v61, 0.0 }
 0x497   : > { %3406 = vst.msk [vmem:[%s4918_s8 + $0x1e0] sm:$0xff] %vm2065_vm5, %v2766_v14  ;;  %v3261_v50 = vadd.f32 %v3260_v58, %v3259_v62 }
 0x498   : > { %3407 = vst.msk [vmem:[%s4918_s8 + $0x1e8] sm:$0xff] %vm2065_vm5, %v2767_v30  ;;  %v2993_v44 = vpop.permute.xlu2 %2992  ;;  %v2988_v17 = vpop.permute.xlu1 %2987 }
 0x499   : > { %3409 = vst.msk [vmem:[%s4918_s8 + $0x1f8] sm:$0xff] %vm2065_vm5, %v2769_v29  ;;  %v3133_v41 = vmul.f32 %v2988_v17, %v6312_v51  ;;  %v6314_v17 = vmax.f32 %v6313_v11, 0.0  ;;  %vm3338_vm5 = vcmask 1045509   ;;  %s3431_s8 = sshll.u32 %s3427_s14, 4  ;;  %s3432_s8 = int_to_ptr.hbm [resolvable:$true] %s3431_s8 }
 0x49a   : > { %3067 = vperm.xlu2 %3923, %v2765_v48   ;;  %3082 = vperm.xlu1 %3922, %v2768_v46   ;;  %s4092_s13 = sshra.s32 %s3432_s8, 4  ;;  %s4093_s13 = int_to_ptr.hbm [resolvable:$true] %s4092_s13 }
 0x49b   : > { %3072 = vperm.xlu0 %3921, %v2766_v14   ;;  %v3262_v14 = vsel %vm1799_vm4, %v3132_v42, 0.0  ;;  %v3134_v0 = vmul.f32 %v2993_v44, %v6314_v17  ;;  %v3135_v44 = vmul.f32 %v2998_v2, %v6317_v18  ;;  %v6322_v2 = vmax.f32 %v6321_v55, 0.0  ;;  %s4094_s26 = scalar_lea.hbm %s4093_s13, 8  ;;  %p4099_p0 = scmp.lt.s32.totalorder %s4093_s13, %s6125_s9 }
 0x49c   : > { %v3263_v23 = vadd.f32 %v3262_v14, %v3261_v50  ;;  %p4095_p11 = scmp.ne.s32.totalorder %s4093_s13, %s4094_s26  ;;  %p4100_p1 = scmp.lt.s32.totalorder %s4098_s29, %s4094_s26 }
 0x49d   : > { %v3266_v37 = vsel %vm1799_vm4, %v3134_v0, 0.0  ;;  %v3268_v57 = vsel %vm1799_vm4, %v3135_v44, 0.0 }
 0x49e   : > { %p4096_p12 = pnand %p4095_p11, %p4236_p5  ;;  %p4101_p2 = por %p4100_p1, %p4099_p0 }
 0x4a0   : > { %v3008_v35 = vpop.permute.xlu2 %3007  ;;  %v3003_v32 = vpop.permute.xlu1 %3002  ;;  %p4097_p13 = pneg %p4096_p12 }
 0x4a1   : > { %v3137_v7 = vmul.f32 %v3008_v35, %v6322_v2 }
 0x4a2   : > { %3077 = vperm.xlu2 %3923, %v2767_v30   ;;  %v3264_v30 = vsel %vm1799_vm4, %v3133_v41, 0.0  ;;  %p4102_p3 = pnand %p4101_p2, %p4097_p13 }
 0x4a3   : > { %3087 = vperm.xlu0 %3921, %v2769_v29  }
 0x4aa   : > { %3047 = vperm.xlu2 %3923, %v5959_v22   ;;  %v6305_v22 = vld [vmem:[#allocation33_spill] sm:$0xff] }
 0x4ab   : > { %v6306_v63 = vmax.f32 %v6305_v22, 0.0  ;;  %v6318_v22 = vld [vmem:[#allocation30_spill] sm:$0xff] }
 0x4ac   : > { %v3023_v13 = vpop.permute.xlu2 %3022 }
 0x4ad   : > { %v3140_v48 = vmul.f32 %v3023_v13, %v1717_v52 }
 0x4af   : > { %v3283_v49 = vsel %vm1799_vm4, %v3140_v48, 0.0 }
 0x4c4   : > { %v3018_v59 = vpop.permute.xlu1 %3017 }
 0x4c5   : > { %v3013_v19 = vpop.permute.xlu0 %3012  ;;  %v3139_v3 = vmul.f32 %v3018_v59, %v6306_v63  ;;  %v6319_v63 = vmax.f32 %v6318_v22, 0.0  ;;  %v6328_v22 = vmax.f32 %v5595_v25, 0.0 }
 0x4c6   : > { %v3138_v24 = vmul.f32 %v3013_v19, %v6308_v15  ;;  %v3265_v19 = vadd.f32 %v3264_v30, %v3263_v23 }
 0x4c7   : > { %v3281_v1 = vsel %vm1799_vm4, %v3139_v3, 0.0  ;;  %v3136_v3 = vmul.f32 %v3003_v32, %v6319_v63  ;;  %v6323_v32 = vmax.f32 %v5442_v4, 0.0  ;;  %v3272_v4 = vsel %vm1799_vm4, %v3137_v7, 0.0 }
 0x4c8   : > { %v3280_v53 = vsel %vm1799_vm4, %v3138_v24, 0.0  ;;  %v3267_v15 = vadd.f32 %v3266_v37, %v3265_v19 }
 0x4c9   : > { %v3282_v29 = vadd.f32 %v3281_v1, %v3280_v53  ;;  %v6324_v1 = vmax.f32 %v5397_v56, 0.0 }
 0x4cb   : > { %v3284_v16 = vadd.f32 %v3283_v49, %v3282_v29 }
 0x4cc   : > { %v3033_v36 = vpop.permute.xlu1 %3032 }
 0x4cd   : > { %v3028_v20 = vpop.permute.xlu0 %3027  ;;  %v3142_v9 = vmul.f32 %v3033_v36, %v1719_v40  ;;  %v3269_v36 = vadd.f32 %v3268_v57, %v3267_v15 }
 0x4ce   : > { %v3141_v46 = vmul.f32 %v3028_v20, %v1718_v5  ;;  %v6315_v5 = vmax.f32 %v5360_v27, 0.0  ;;  %v3270_v27 = vsel %vm1799_vm4, %v3136_v3, 0.0  ;;  %v6320_v20 = vmax.f32 %v5394_v12, 0.0 }
 0x4cf   : > { %v3287_v24 = vsel %vm1799_vm4, %v3142_v9, 0.0  ;;  %v3271_v50 = vadd.f32 %v3270_v27, %v3269_v36  ;;  %v6325_v12 = vmax.f32 %v5452_v60, 0.0 }
 0x4d0   : > { %v3285_v26 = vsel %vm1799_vm4, %v3141_v46, 0.0 }
 0x4d1   : > { %v3286_v8 = vadd.f32 %v3285_v26, %v3284_v16  ;;  %v3273_v56 = vadd.f32 %v3272_v4, %v3271_v50  ;;  %v6326_v16 = vmax.f32 %v5544_v34, 0.0 }
 0x4d3   : > { %v3288_v40 = vadd.f32 %v3287_v24, %v3286_v8  ;;  %v3274_v0 = vrot.slane %v3273_v56, 4 }
 0x4d4   : > { %v3038_v59 = vpop.permute.xlu1 %3037 }
 0x4d5   : > { %v3143_v13 = vmul.f32 %v3038_v59, %v6315_v5  ;;  %v3043_v61 = vpop.permute.xlu0 %3042 }
 0x4d6   : > { %v3144_v58 = vmul.f32 %v3043_v61, %v6320_v20 }
 0x4d7   : > { %v3289_v62 = vsel %vm1799_vm4, %v3143_v13, 0.0 }
 0x4d8   : > { %v3290_v42 = vadd.f32 %v3289_v62, %v3288_v40  ;;  %v3291_v30 = vsel %vm1799_vm4, %v3144_v58, 0.0 }
 0x4ec   : > { %v3053_v47 = vpop.permute.xlu2 %3052 }
 0x4ed   : > { %v3146_v10 = vmul.f32 %v3053_v47, %v6323_v32  ;;  %v3292_v47 = vadd.f32 %v3291_v30, %v3290_v42 }
 0x4ef   : > { %v3301_v29 = vsel %vm1799_vm4, %v3146_v10, 0.0 }
 0x4f4   : > { %v3068_v38 = vpop.permute.xlu2 %3067 }
 0x4f5   : > { %v3149_v45 = vmul.f32 %v3068_v38, %v1726_v31  ;;  %v3275_v31 = vadd.f32 %v3274_v0, %v3273_v56 }
 0x4f7   : > { %v3306_v19 = vsel %vm1799_vm4, %v3149_v45, 0.0  ;;  %v3276_v33 = vrot.slane %v3275_v31, 2 }
 0x4f9   : > { %v3277_v15 = vadd.f32 %v3276_v33, %v3275_v31 }
 0x4fb   : > { %v3278_v39 = vrot.slane %v3277_v15, 1 }
 0x4fc   : > { %v3078_v52 = vpop.permute.xlu2 %3077 }
 0x4fd   : > { %v3151_v49 = vmul.f32 %v3078_v52, %v1728_v6  ;;  %v3279_v20 = vadd.f32 %v3278_v39, %v3277_v15 }
 0x4ff   : > { %v3310_v61 = vsel %vm1799_vm4, %v3151_v49, 0.0  ;;  %v3339_v7 = vsel %vm3338_vm5, %v3279_v20, %v5986_v28 }
 0x504   : > { %v3048_v51 = vpop.permute.xlu2 %3047  ;;  %v3063_v41 = vpop.permute.xlu1 %3062 }
 0x505   : > { %v3145_v53 = vmul.f32 %v3048_v51, %v6324_v1  ;;  %v3058_v48 = vpop.permute.xlu0 %3057  ;;  %v3148_v46 = vmul.f32 %v3063_v41, %v1725_v54 }
 0x506   : > { %v3147_v14 = vmul.f32 %v3058_v48, %v6325_v12 }
 0x507   : > { %v3293_v35 = vsel %vm1799_vm4, %v3145_v53, 0.0  ;;  %v3304_v60 = vsel %vm1799_vm4, %v3148_v46, 0.0 }
 0x508   : > { %v3302_v23 = vsel %vm1799_vm4, %v3147_v14, 0.0  ;;  %v3294_v54 = vadd.f32 %v3293_v35, %v3292_v47 }
 0x509   : > { %v3303_v11 = vadd.f32 %v3302_v23, %v3301_v29 }
 0x50a   : > { %v3295_v26 = vrot.slane %v3294_v54, 4 }
 0x50b   : > { %v3305_v17 = vadd.f32 %v3304_v60, %v3303_v11 }
 0x50c   : > { %v3083_v5 = vpop.permute.xlu1 %3082  ;;  %v3296_v37 = vadd.f32 %v3295_v26, %v3294_v54 }
 0x50d   : > { %v3073_v59 = vpop.permute.xlu0 %3072  ;;  %v3307_v13 = vadd.f32 %v3306_v19, %v3305_v17  ;;  %v3152_v18 = vmul.f32 %v3083_v5, %v6327_v43 }
 0x50e   : > { %v3150_v9 = vmul.f32 %v3073_v59, %v6326_v16  ;;  %v3297_v52 = vrot.slane %v3296_v37, 2 }
 0x50f   : > { %v3312_v34 = vsel %vm1799_vm4, %v3152_v18, 0.0 }
 0x510   : > { %v3308_v21 = vsel %vm1799_vm4, %v3150_v9, 0.0  ;;  %v3298_v62 = vadd.f32 %v3297_v52, %v3296_v37 }
 0x511   : > { %v3309_v38 = vadd.f32 %v3308_v21, %v3307_v13 }
 0x512   : > { %v3299_v40 = vrot.slane %v3298_v62, 1 }
 0x513   : > { %v3311_v44 = vadd.f32 %v3310_v61, %v3309_v38 }
 0x514   : > { %v3300_v58 = vadd.f32 %v3299_v40, %v3298_v62 }
 0x515   : > { %v3088_v6 = vpop.permute.xlu0 %3087  ;;  %v3313_v3 = vadd.f32 %v3312_v34, %v3311_v44 }
 0x516   : > { %v3153_v63 = vmul.f32 %v3088_v6, %v6328_v22  ;;  %v3341_v42 = vsel %vm3340_vm14, %v3300_v58, %v3339_v7 }
 0x518   : > { %v3314_v8 = vsel %vm1799_vm4, %v3153_v63, 0.0 }
 0x519   : > { %v3315_v24 = vadd.f32 %v3314_v8, %v3313_v3 }
 0x51b   : > { %v3316_v57 = vrot.slane %v3315_v24, 4 }
 0x51d   : > { %v3317_v27 = vadd.f32 %v3316_v57, %v3315_v24 }
 0x51f   : > { %v3318_v36 = vrot.slane %v3317_v27, 2 }
 0x521   : > { %v3319_v25 = vadd.f32 %v3318_v36, %v3317_v27 }
 0x523   : > { %v3320_v55 = vrot.slane %v3319_v25, 1 }
 0x525   : > { %v3321_v2 = vadd.f32 %v3320_v55, %v3319_v25 }
 0x527   : > { %v3343_v32 = vsel %vm3342_vm15, %v3321_v2, %v3341_v42 }
 0x528   : > { %3345 = vst.msk [vmem:[%s358_s19] sm:$0xff] %vm1799_vm4, %v3343_v32 }
 0x529   : > { %4105 = shalt.err (!%p4102_p3)
}
 0x52a   : > { %3881 = dma.vmem_to_hbm [thread:$0]  (%p4236_p5), %s3430_s21, 128, %s3432_s8, %s3411_s30  }
 0x52b PF: > { %p3887_p4 = scmp.ge.s32.totalorder %s4140_s18, 2  ;;  %s3447_s22 = sand.u32 1, %s4128_s15  }
 0x52c   : > { %s3448_s14 = scalar_lea.sflag [#allocation4], %s3447_s22 }
 0x52d   : > { %p3884_p7 = pnand %p3887_p4, %p4240_p6 }
 0x52f   : > { %p3885_p8 = pneg %p3884_p7 }
 0x531   : > { %4123 = dma.done.wait (%p3885_p8), %s3448_s14, 128  }
 0x532   : > { %4125 = vsyncadd (%p3885_p8), %s3448_s14, 4294967168  ;;  %p23_p9 = scmp.ge.s32.totalorder %s4224_s20, 4   ;;  %s6329_s15 = smov %s4132_s16 }
 0x533   : > { %s6330_s16 = smov %s4136_s17  ;;  %s6331_s17 = smov %s4234_s23 }
 0x534   : > { %s6332_s18 = smov %s4224_s20  ;;  %25 = sbr.rel (!%p23_p9) target bundleno = 6 (0x6), region = 103 }
 0x539   :  { %3463 = vsyncpa [#allocation4], 1 }
 0x53a   :  { %3465 = vsyncpa [#allocation4 + $0x1], 1 }

</bundles_post_ra>
